<compile_context>
chip_gen: v7x
topology: tpu7x:2x2x1
jax: 0.10.0
libtpu: 0.0.40
codegen_flags: <defaults>
</compile_context>

<pallas_src>
import jax
import jax.numpy as jnp
import numpy as np
from jax.experimental import pallas as pl
from jax.experimental.pallas import tpu as pltpu

LATENT_SIZE = 16
XYZ_EMBED = 60                       # the "+60" positional-embedding part
D_IN = LATENT_SIZE + XYZ_EMBED       # 76
HIDDEN = 128
H1 = HIDDEN - D_IN                   # 52  (out_dim of lin1 = dims[2] - dims[0])
LN_EPS = 1e-5

# Row indices inside the packed (16, 128) parameter slab.
R_B0, R_G0, R_BE0 = 0, 1, 2
R_B1, R_G1, R_BE1 = 3, 4, 5
R_B2, R_G2, R_BE2 = 6, 7, 8
R_B3, R_G3, R_BE3 = 9, 10, 11
R_B4 = 12
N_ROWS_PAD = 16


def decoder_kernel(x_ref, wbig_ref, w1_ref, w2b_ref, w3_ref, w4p_ref,
                   rows_ref, out_ref):
    inp = x_ref[...]                                      # (TN, 76) bf16

    def ln_relu_bf16(h, gi, bi, width):
        # One-pass LayerNorm stats (var = E[h^2] - mu^2), fused
        # scale/shift -> ReLU -> bf16 write for the next MXU operand.
        g = rows_ref[gi:gi + 1, 0:width]                  # (1, width) f32
        b = rows_ref[bi:bi + 1, 0:width]
        inv_w = 1.0 / float(width)
        mu = jnp.sum(h, axis=-1, keepdims=True) * inv_w
        var = jnp.sum(h * h, axis=-1, keepdims=True) * inv_w - mu * mu
        inv_std = jax.lax.rsqrt(var + LN_EPS)
        return jnp.maximum((h - mu) * inv_std * g + b, 0.0).astype(jnp.bfloat16)

    # Layer 0 fused with the inp-half of layer 2: (TN,76) @ (76,256).
    y = jnp.dot(inp, wbig_ref[...], preferred_element_type=jnp.float32)
    c2 = y[:, HIDDEN:2 * HIDDEN]                          # layer-2 partial (f32)
    h = y[:, 0:HIDDEN] + rows_ref[R_B0:R_B0 + 1, :]
    h = ln_relu_bf16(h, R_G0, R_BE0, HIDDEN)              # (TN,128) bf16

    # Layer 1: 128 -> 52.
    h = jnp.dot(h, w1_ref[...], preferred_element_type=jnp.float32)
    h = h + rows_ref[R_B1:R_B1 + 1, 0:H1]
    h = ln_relu_bf16(h, R_G1, R_BE1, H1)                  # (TN,52) bf16

    # Layer 2: h @ w2b + (inp @ w2a) + b2  -- concat eliminated.
    h = jnp.dot(h, w2b_ref[...], preferred_element_type=jnp.float32)
    h = h + c2 + rows_ref[R_B2:R_B2 + 1, :]
    h = ln_relu_bf16(h, R_G2, R_BE2, HIDDEN)

    # Layer 3: 128 -> 128.
    h = jnp.dot(h, w3_ref[...], preferred_element_type=jnp.float32)
    h = h + rows_ref[R_B3:R_B3 + 1, :]
    h = ln_relu_bf16(h, R_G3, R_BE3, HIDDEN)

    # Layer 4 on the MXU: 128 -> 1 via a zero-padded (128,128) weight
    # (only column 0 meaningful); keeps the reduction off the VPU/XLU.
    s = jnp.dot(h, w4p_ref[...], preferred_element_type=jnp.float32)
    s = s[:, 0:1] + rows_ref[R_B4:R_B4 + 1, 0:1]          # (TN, 1) f32

    # Final tanh (self.th).
    out_ref[...] = jnp.tanh(s)


def _row(v):
    """(k,) f32 -> (1, 128) f32, zero-padded on lanes."""
    v = jnp.asarray(v, jnp.float32).reshape(1, -1)
    return jnp.pad(v, ((0, 0), (0, HIDDEN - v.shape[1])))


def pack_params(p):
    """One-time packing (call at parameter-load time, not per forward)."""
    f32, bf16 = jnp.float32, jnp.bfloat16
    w0 = jnp.asarray(p["w0"], f32)                                   # (76, 128)
    w2 = jnp.asarray(p["w2"], f32)                                   # (128, 128)
    # Module concat order is [h(52), inp(76)]: rows 0..51 of w2 hit h,
    # rows 52..127 hit inp.  Fuse the inp-part into layer 0.
    w_big = jnp.concatenate([w0, w2[H1:, :]], axis=1).astype(bf16)   # (76, 256)
    w1 = jnp.asarray(p["w1"], f32).astype(bf16)                      # (128, 52)
    w2b = w2[:H1, :].astype(bf16)                                    # (52, 128)
    w3 = jnp.asarray(p["w3"], f32).astype(bf16)                      # (128, 128)
    w4p = jnp.zeros((HIDDEN, HIDDEN), f32).at[:, 0].set(
        jnp.asarray(p["w4"], f32)).astype(bf16)                      # (128, 128)

    rows = jnp.concatenate([
        _row(p["b0"]), _row(p["g0"]), _row(p["be0"]),
        _row(p["b1"]), _row(p["g1"]), _row(p["be1"]),
        _row(p["b2"]), _row(p["g2"]), _row(p["be2"]),
        _row(p["b3"]), _row(p["g3"]), _row(p["be3"]),
        _row(p["b4"]),
    ], axis=0)                                                       # (13, 128)
    rows = jnp.pad(rows, ((0, N_ROWS_PAD - rows.shape[0]), (0, 0)))  # (16, 128)
    return w_big, w1, w2b, w3, w4p, rows


def _round_up(n, m):
    return -(-n // m) * m


def deep_sdf_decoder(x, packed, *, tile_n=2048):
    """x: (N, 76) float32; packed: output of pack_params()."""
    N, d_in = x.shape
    assert d_in == D_IN
    w_big, w1, w2b, w3, w4p, rows = packed

    # v7x megacore guard: clamp tile_n so the grid keeps >= 2 steps (both
    # TensorCores busy) while still amortizing the ~0.35us per-step overhead.
    tn = max(128, min(tile_n, _round_up(pl.cdiv(N, 2), 128)))
    n_pad = _round_up(N, tn)

    x_bf = x.astype(jnp.bfloat16)
    if n_pad != N:
        x_bf = jnp.pad(x_bf, ((0, n_pad - N), (0, 0)))

    in_specs = [
        pl.BlockSpec((tn, D_IN), lambda i: (i, 0)),               # x tile
        pl.BlockSpec((D_IN, 2 * HIDDEN), lambda i: (0, 0)),       # [w0 | w2a]
        pl.BlockSpec((HIDDEN, H1), lambda i: (0, 0)),             # w1
        pl.BlockSpec((H1, HIDDEN), lambda i: (0, 0)),             # w2b
        pl.BlockSpec((HIDDEN, HIDDEN), lambda i: (0, 0)),         # w3
        pl.BlockSpec((HIDDEN, HIDDEN), lambda i: (0, 0)),         # w4 (padded)
        pl.BlockSpec((N_ROWS_PAD, HIDDEN), lambda i: (0, 0)),     # rows slab
    ]
    out_spec = pl.BlockSpec((tn, 1), lambda i: (i, 0))

    out = pl.pallas_call(
        decoder_kernel,
        out_shape=jax.ShapeDtypeStruct((n_pad, 1), jnp.float32),
        grid_spec=pltpu.PrefetchScalarGridSpec(
            num_scalar_prefetch=0,
            grid=(n_pad // tn,),
            in_specs=in_specs,
            out_specs=out_spec,
        ),
        compiler_params=pltpu.CompilerParams(
            dimension_semantics=("parallel",),
            vmem_limit_bytes=48 * 1024 * 1024,
        ),
    )(x_bf, w_big, w1, w2b, w3, w4p, rows)

    return out[:N]


def init_params(key):
    """Deterministic synthetic parameters (PyTorch Linear fan-in init).
    Weights are stored (in, out), i.e. already transposed vs. torch Linear."""
    shapes = {
        "w0": (D_IN, HIDDEN), "w1": (HIDDEN, H1),
        "w2": (HIDDEN, HIDDEN), "w3": (HIDDEN, HIDDEN), "w4": (HIDDEN, 1),
    }
    params = {}
    keys = jax.random.split(key, 10)
    for li, name in enumerate(["w0", "w1", "w2", "w3", "w4"]):
        fan_in, fan_out = shapes[name]
        bound = 1.0 / np.sqrt(fan_in)
        params[name] = jax.random.uniform(keys[2 * li], (fan_in, fan_out),
                                          jnp.float32, -bound, bound)
        params[f"b{li}"] = jax.random.uniform(keys[2 * li + 1], (fan_out,),
                                              jnp.float32, -bound, bound)
    # LayerNorm default init: gamma = 1, beta = 0.
    for li, width in zip((0, 1, 2, 3), (HIDDEN, H1, HIDDEN, HIDDEN)):
        params[f"g{li}"] = jnp.ones((width,), jnp.float32)
        params[f"be{li}"] = jnp.zeros((width,), jnp.float32)
    params["w4"] = params["w4"].reshape(-1)
    params["b4"] = params["b4"].reshape(-1)
    return params


def reference_forward(x, params):
    """Pure-JAX reference mirroring the PyTorch forward (eval mode), with the
    same bf16-matmul / f32-accumulate precision as the kernel but the original
    two-pass LayerNorm and unfused concat structure."""
    bf16, f32 = jnp.bfloat16, jnp.float32

    def ln(h, g, b):
        mu = jnp.mean(h, axis=-1, keepdims=True)
        var = jnp.mean((h - mu) ** 2, axis=-1, keepdims=True)
        return (h - mu) * jax.lax.rsqrt(var + LN_EPS) * g + b

    inp = x.astype(bf16)
    w0, w1 = params["w0"].astype(bf16), params["w1"].astype(bf16)
    w2, w3 = params["w2"].astype(bf16), params["w3"].astype(bf16)
    w4 = params["w4"].astype(bf16).reshape(-1, 1)

    h = jnp.dot(inp, w0, preferred_element_type=f32) + params["b0"]
    h = jnp.maximum(ln(h, params["g0"], params["be0"]), 0.0)

    h = jnp.dot(h.astype(bf16), w1, preferred_element_type=f32) + params["b1"]
    h = jnp.maximum(ln(h, params["g1"], params["be1"]), 0.0)

    h = jnp.concatenate([h.astype(bf16), inp], axis=-1)   # torch.cat([x, input])
    h = jnp.dot(h, w2, preferred_element_type=f32) + params["b2"]
    h = jnp.maximum(ln(h, params["g2"], params["be2"]), 0.0)

    h = jnp.dot(h.astype(bf16), w3, preferred_element_type=f32) + params["b3"]
    h = jnp.maximum(ln(h, params["g3"], params["be3"]), 0.0)

    s = jnp.dot(h.astype(bf16), w4, preferred_element_type=f32)
    s = s + params["b4"].reshape(1, 1)
    return jnp.tanh(s)


if __name__ == "__main__":
    # TODO(synk): dropout / latent_dropout branches are training-only; this
    # kernel implements eval-mode semantics (dropout == identity).
    key = jax.random.PRNGKey(0)
    k_x, k_p = jax.random.split(key)

    N = 500  # small; not a multiple of the tile -> exercises pad + slice (grid=(2,))
    x = jax.random.normal(k_x, (N, D_IN), jnp.float32)
    params = init_params(k_p)

    packed = pack_params(params)                 # once, at parameter-load time
    fwd = jax.jit(lambda xx: deep_sdf_decoder(xx, packed))

    out = jax.block_until_ready(fwd(x))
    ref = jax.block_until_ready(reference_forward(x, params))

    assert out.shape == (N, 1)
    # One-pass LN reassociation + split layer-2 matmul + bf16 activation
    # rounding -> slightly looser tolerance than the f32-exact case.
    np.testing.assert_allclose(np.asarray(out), np.asarray(ref),
                               rtol=2e-3, atol=2e-3)
    print("KERNEL_OK")
</pallas_src>

<mosaic_0001>
module attributes {stable_mosaic.version = 11 : i64} {
  func.func @decoder_kernel(%arg0: i32, %arg1: memref<256x76xbf16, #tpu.memory_space<vmem>>, %arg2: memref<76x256xbf16, #tpu.memory_space<vmem>>, %arg3: memref<128x52xbf16, #tpu.memory_space<vmem>>, %arg4: memref<52x128xbf16, #tpu.memory_space<vmem>>, %arg5: memref<128x128xbf16, #tpu.memory_space<vmem>>, %arg6: memref<128x128xbf16, #tpu.memory_space<vmem>>, %arg7: memref<16x128xf32, #tpu.memory_space<vmem>>, %arg8: memref<256x1xf32, #tpu.memory_space<vmem>>) attributes {dimension_semantics = [#tpu.dimension_semantics<parallel>], iteration_bounds = array<i64: 2>, scalar_prefetch = 0 : i64, scratch_operands = 0 : i64, tpu.core_type = #tpu.core_type<tc>, window_params = [{transform_indices = @transform_0, window_bounds = array<i64: 256, 76>}, {pipeline_mode = #tpu.pipeline_mode<synchronous>, transform_indices = @transform_1, window_bounds = array<i64: 76, 256>}, {pipeline_mode = #tpu.pipeline_mode<synchronous>, transform_indices = @transform_2, window_bounds = array<i64: 128, 52>}, {pipeline_mode = #tpu.pipeline_mode<synchronous>, transform_indices = @transform_3, window_bounds = array<i64: 52, 128>}, {pipeline_mode = #tpu.pipeline_mode<synchronous>, transform_indices = @transform_4, window_bounds = array<i64: 128, 128>}, {pipeline_mode = #tpu.pipeline_mode<synchronous>, transform_indices = @transform_5, window_bounds = array<i64: 128, 128>}, {pipeline_mode = #tpu.pipeline_mode<synchronous>, transform_indices = @transform_6, window_bounds = array<i64: 16, 128>}, {transform_indices = @transform_7, window_bounds = array<i64: 256, 1>}]} {
    %c0 = arith.constant 0 : index
    %c0_0 = arith.constant 0 : index
    %0 = vector.load %arg1[%c0, %c0_0] : memref<256x76xbf16, #tpu.memory_space<vmem>>, vector<256x76xbf16>
    %c0_1 = arith.constant 0 : index
    %c0_2 = arith.constant 0 : index
    %1 = vector.load %arg2[%c0_1, %c0_2] : memref<76x256xbf16, #tpu.memory_space<vmem>>, vector<76x256xbf16>
    %cst = arith.constant dense<0.000000e+00> : vector<256x256xf32>
    %2 = tpu.matmul %0, %1, %cst {dimension_numbers = #tpu.dot_dimension_numbers<[1], [0], [0], [1], [0, 0, 1, 1], [], []>} : vector<256x76xbf16>, vector<76x256xbf16>, vector<256x256xf32> -> vector<256x256xf32>
    %3 = vector.extract_strided_slice %2 {offsets = [0, 128], sizes = [256, 128], strides = [1, 1]} : vector<256x256xf32> to vector<256x128xf32>
    %4 = vector.extract_strided_slice %2 {offsets = [0, 0], sizes = [256, 128], strides = [1, 1]} : vector<256x256xf32> to vector<256x128xf32>
    %c0_3 = arith.constant 0 : index
    %c0_4 = arith.constant 0 : index
    %5 = vector.load %arg7[%c0_3, %c0_4] : memref<16x128xf32, #tpu.memory_space<vmem>>, vector<1x128xf32>
    %6 = vector.broadcast %5 : vector<1x128xf32> to vector<256x128xf32>
    %7 = arith.addf %4, %6 : vector<256x128xf32>
    %c1 = arith.constant 1 : index
    %c0_5 = arith.constant 0 : index
    %8 = vector.load %arg7[%c1, %c0_5] : memref<16x128xf32, #tpu.memory_space<vmem>>, vector<1x128xf32>
    %c2 = arith.constant 2 : index
    %c0_6 = arith.constant 0 : index
    %9 = vector.load %arg7[%c2, %c0_6] : memref<16x128xf32, #tpu.memory_space<vmem>>, vector<1x128xf32>
    %cst_7 = arith.constant dense<0.000000e+00> : vector<256xf32>
    %10 = vector.multi_reduction <add>, %7, %cst_7 [1] : vector<256x128xf32> to vector<256xf32>
    %11 = vector.shape_cast %10 : vector<256xf32> to vector<256x1xf32>
    %cst_8 = arith.constant 7.812500e-03 : f32
    %12 = vector.broadcast %cst_8 : f32 to vector<256x1xf32>
    %13 = arith.mulf %11, %12 : vector<256x1xf32>
    %14 = arith.mulf %7, %7 : vector<256x128xf32>
    %cst_9 = arith.constant dense<0.000000e+00> : vector<256xf32>
    %15 = vector.multi_reduction <add>, %14, %cst_9 [1] : vector<256x128xf32> to vector<256xf32>
    %16 = vector.shape_cast %15 : vector<256xf32> to vector<256x1xf32>
    %cst_10 = arith.constant 7.812500e-03 : f32
    %17 = vector.broadcast %cst_10 : f32 to vector<256x1xf32>
    %18 = arith.mulf %16, %17 : vector<256x1xf32>
    %19 = arith.mulf %13, %13 : vector<256x1xf32>
    %20 = arith.subf %18, %19 : vector<256x1xf32>
    %cst_11 = arith.constant 9.99999974E-6 : f32
    %21 = vector.broadcast %cst_11 : f32 to vector<256x1xf32>
    %22 = arith.addf %20, %21 : vector<256x1xf32>
    %23 = math.rsqrt %22 : vector<256x1xf32>
    %24 = vector.broadcast %13 : vector<256x1xf32> to vector<256x128xf32>
    %25 = arith.subf %7, %24 : vector<256x128xf32>
    %26 = vector.broadcast %23 : vector<256x1xf32> to vector<256x128xf32>
    %27 = arith.mulf %25, %26 : vector<256x128xf32>
    %28 = vector.broadcast %8 : vector<1x128xf32> to vector<256x128xf32>
    %29 = arith.mulf %27, %28 : vector<256x128xf32>
    %30 = vector.broadcast %9 : vector<1x128xf32> to vector<256x128xf32>
    %31 = arith.addf %29, %30 : vector<256x128xf32>
    %cst_12 = arith.constant 0.000000e+00 : f32
    %32 = vector.broadcast %cst_12 : f32 to vector<256x128xf32>
    %33 = arith.maximumf %31, %32 : vector<256x128xf32>
    %34 = arith.truncf %33 : vector<256x128xf32> to vector<256x128xbf16>
    %c0_13 = arith.constant 0 : index
    %c0_14 = arith.constant 0 : index
    %35 = vector.load %arg3[%c0_13, %c0_14] : memref<128x52xbf16, #tpu.memory_space<vmem>>, vector<128x52xbf16>
    %cst_15 = arith.constant dense<0.000000e+00> : vector<256x52xf32>
    %36 = tpu.matmul %34, %35, %cst_15 {dimension_numbers = #tpu.dot_dimension_numbers<[1], [0], [0], [1], [0, 0, 1, 1], [], []>} : vector<256x128xbf16>, vector<128x52xbf16>, vector<256x52xf32> -> vector<256x52xf32>
    %c3 = arith.constant 3 : index
    %c0_16 = arith.constant 0 : index
    %37 = vector.load %arg7[%c3, %c0_16] : memref<16x128xf32, #tpu.memory_space<vmem>>, vector<1x52xf32>
    %38 = vector.broadcast %37 : vector<1x52xf32> to vector<256x52xf32>
    %39 = arith.addf %36, %38 : vector<256x52xf32>
    %c4 = arith.constant 4 : index
    %c0_17 = arith.constant 0 : index
    %40 = vector.load %arg7[%c4, %c0_17] : memref<16x128xf32, #tpu.memory_space<vmem>>, vector<1x52xf32>
    %c5 = arith.constant 5 : index
    %c0_18 = arith.constant 0 : index
    %41 = vector.load %arg7[%c5, %c0_18] : memref<16x128xf32, #tpu.memory_space<vmem>>, vector<1x52xf32>
    %cst_19 = arith.constant dense<0.000000e+00> : vector<256xf32>
    %42 = vector.multi_reduction <add>, %39, %cst_19 [1] : vector<256x52xf32> to vector<256xf32>
    %43 = vector.shape_cast %42 : vector<256xf32> to vector<256x1xf32>
    %cst_20 = arith.constant 0.0192307699 : f32
    %44 = vector.broadcast %cst_20 : f32 to vector<256x1xf32>
    %45 = arith.mulf %43, %44 : vector<256x1xf32>
    %46 = arith.mulf %39, %39 : vector<256x52xf32>
    %cst_21 = arith.constant dense<0.000000e+00> : vector<256xf32>
    %47 = vector.multi_reduction <add>, %46, %cst_21 [1] : vector<256x52xf32> to vector<256xf32>
    %48 = vector.shape_cast %47 : vector<256xf32> to vector<256x1xf32>
    %cst_22 = arith.constant 0.0192307699 : f32
    %49 = vector.broadcast %cst_22 : f32 to vector<256x1xf32>
    %50 = arith.mulf %48, %49 : vector<256x1xf32>
    %51 = arith.mulf %45, %45 : vector<256x1xf32>
    %52 = arith.subf %50, %51 : vector<256x1xf32>
    %cst_23 = arith.constant 9.99999974E-6 : f32
    %53 = vector.broadcast %cst_23 : f32 to vector<256x1xf32>
    %54 = arith.addf %52, %53 : vector<256x1xf32>
    %55 = math.rsqrt %54 : vector<256x1xf32>
    %56 = vector.broadcast %45 : vector<256x1xf32> to vector<256x52xf32>
    %57 = arith.subf %39, %56 : vector<256x52xf32>
    %58 = vector.broadcast %55 : vector<256x1xf32> to vector<256x52xf32>
    %59 = arith.mulf %57, %58 : vector<256x52xf32>
    %60 = vector.broadcast %40 : vector<1x52xf32> to vector<256x52xf32>
    %61 = arith.mulf %59, %60 : vector<256x52xf32>
    %62 = vector.broadcast %41 : vector<1x52xf32> to vector<256x52xf32>
    %63 = arith.addf %61, %62 : vector<256x52xf32>
    %cst_24 = arith.constant 0.000000e+00 : f32
    %64 = vector.broadcast %cst_24 : f32 to vector<256x52xf32>
    %65 = arith.maximumf %63, %64 : vector<256x52xf32>
    %66 = arith.truncf %65 : vector<256x52xf32> to vector<256x52xbf16>
    %c0_25 = arith.constant 0 : index
    %c0_26 = arith.constant 0 : index
    %67 = vector.load %arg4[%c0_25, %c0_26] : memref<52x128xbf16, #tpu.memory_space<vmem>>, vector<52x128xbf16>
    %cst_27 = arith.constant dense<0.000000e+00> : vector<256x128xf32>
    %68 = tpu.matmul %66, %67, %cst_27 {dimension_numbers = #tpu.dot_dimension_numbers<[1], [0], [0], [1], [0, 0, 1, 1], [], []>} : vector<256x52xbf16>, vector<52x128xbf16>, vector<256x128xf32> -> vector<256x128xf32>
    %69 = arith.addf %68, %3 : vector<256x128xf32>
    %c6 = arith.constant 6 : index
    %c0_28 = arith.constant 0 : index
    %70 = vector.load %arg7[%c6, %c0_28] : memref<16x128xf32, #tpu.memory_space<vmem>>, vector<1x128xf32>
    %71 = vector.broadcast %70 : vector<1x128xf32> to vector<256x128xf32>
    %72 = arith.addf %69, %71 : vector<256x128xf32>
    %c7 = arith.constant 7 : index
    %c0_29 = arith.constant 0 : index
    %73 = vector.load %arg7[%c7, %c0_29] : memref<16x128xf32, #tpu.memory_space<vmem>>, vector<1x128xf32>
    %c8 = arith.constant 8 : index
    %c0_30 = arith.constant 0 : index
    %74 = vector.load %arg7[%c8, %c0_30] : memref<16x128xf32, #tpu.memory_space<vmem>>, vector<1x128xf32>
    %cst_31 = arith.constant dense<0.000000e+00> : vector<256xf32>
    %75 = vector.multi_reduction <add>, %72, %cst_31 [1] : vector<256x128xf32> to vector<256xf32>
    %76 = vector.shape_cast %75 : vector<256xf32> to vector<256x1xf32>
    %cst_32 = arith.constant 7.812500e-03 : f32
    %77 = vector.broadcast %cst_32 : f32 to vector<256x1xf32>
    %78 = arith.mulf %76, %77 : vector<256x1xf32>
    %79 = arith.mulf %72, %72 : vector<256x128xf32>
    %cst_33 = arith.constant dense<0.000000e+00> : vector<256xf32>
    %80 = vector.multi_reduction <add>, %79, %cst_33 [1] : vector<256x128xf32> to vector<256xf32>
    %81 = vector.shape_cast %80 : vector<256xf32> to vector<256x1xf32>
    %cst_34 = arith.constant 7.812500e-03 : f32
    %82 = vector.broadcast %cst_34 : f32 to vector<256x1xf32>
    %83 = arith.mulf %81, %82 : vector<256x1xf32>
    %84 = arith.mulf %78, %78 : vector<256x1xf32>
    %85 = arith.subf %83, %84 : vector<256x1xf32>
    %cst_35 = arith.constant 9.99999974E-6 : f32
    %86 = vector.broadcast %cst_35 : f32 to vector<256x1xf32>
    %87 = arith.addf %85, %86 : vector<256x1xf32>
    %88 = math.rsqrt %87 : vector<256x1xf32>
    %89 = vector.broadcast %78 : vector<256x1xf32> to vector<256x128xf32>
    %90 = arith.subf %72, %89 : vector<256x128xf32>
    %91 = vector.broadcast %88 : vector<256x1xf32> to vector<256x128xf32>
    %92 = arith.mulf %90, %91 : vector<256x128xf32>
    %93 = vector.broadcast %73 : vector<1x128xf32> to vector<256x128xf32>
    %94 = arith.mulf %92, %93 : vector<256x128xf32>
    %95 = vector.broadcast %74 : vector<1x128xf32> to vector<256x128xf32>
    %96 = arith.addf %94, %95 : vector<256x128xf32>
    %cst_36 = arith.constant 0.000000e+00 : f32
    %97 = vector.broadcast %cst_36 : f32 to vector<256x128xf32>
    %98 = arith.maximumf %96, %97 : vector<256x128xf32>
    %99 = arith.truncf %98 : vector<256x128xf32> to vector<256x128xbf16>
    %c0_37 = arith.constant 0 : index
    %c0_38 = arith.constant 0 : index
    %100 = vector.load %arg5[%c0_37, %c0_38] : memref<128x128xbf16, #tpu.memory_space<vmem>>, vector<128x128xbf16>
    %cst_39 = arith.constant dense<0.000000e+00> : vector<256x128xf32>
    %101 = tpu.matmul %99, %100, %cst_39 {dimension_numbers = #tpu.dot_dimension_numbers<[1], [0], [0], [1], [0, 0, 1, 1], [], []>} : vector<256x128xbf16>, vector<128x128xbf16>, vector<256x128xf32> -> vector<256x128xf32>
    %c9 = arith.constant 9 : index
    %c0_40 = arith.constant 0 : index
    %102 = vector.load %arg7[%c9, %c0_40] : memref<16x128xf32, #tpu.memory_space<vmem>>, vector<1x128xf32>
    %103 = vector.broadcast %102 : vector<1x128xf32> to vector<256x128xf32>
    %104 = arith.addf %101, %103 : vector<256x128xf32>
    %c10 = arith.constant 10 : index
    %c0_41 = arith.constant 0 : index
    %105 = vector.load %arg7[%c10, %c0_41] : memref<16x128xf32, #tpu.memory_space<vmem>>, vector<1x128xf32>
    %c11 = arith.constant 11 : index
    %c0_42 = arith.constant 0 : index
    %106 = vector.load %arg7[%c11, %c0_42] : memref<16x128xf32, #tpu.memory_space<vmem>>, vector<1x128xf32>
    %cst_43 = arith.constant dense<0.000000e+00> : vector<256xf32>
    %107 = vector.multi_reduction <add>, %104, %cst_43 [1] : vector<256x128xf32> to vector<256xf32>
    %108 = vector.shape_cast %107 : vector<256xf32> to vector<256x1xf32>
    %cst_44 = arith.constant 7.812500e-03 : f32
    %109 = vector.broadcast %cst_44 : f32 to vector<256x1xf32>
    %110 = arith.mulf %108, %109 : vector<256x1xf32>
    %111 = arith.mulf %104, %104 : vector<256x128xf32>
    %cst_45 = arith.constant dense<0.000000e+00> : vector<256xf32>
    %112 = vector.multi_reduction <add>, %111, %cst_45 [1] : vector<256x128xf32> to vector<256xf32>
    %113 = vector.shape_cast %112 : vector<256xf32> to vector<256x1xf32>
    %cst_46 = arith.constant 7.812500e-03 : f32
    %114 = vector.broadcast %cst_46 : f32 to vector<256x1xf32>
    %115 = arith.mulf %113, %114 : vector<256x1xf32>
    %116 = arith.mulf %110, %110 : vector<256x1xf32>
    %117 = arith.subf %115, %116 : vector<256x1xf32>
    %cst_47 = arith.constant 9.99999974E-6 : f32
    %118 = vector.broadcast %cst_47 : f32 to vector<256x1xf32>
    %119 = arith.addf %117, %118 : vector<256x1xf32>
    %120 = math.rsqrt %119 : vector<256x1xf32>
    %121 = vector.broadcast %110 : vector<256x1xf32> to vector<256x128xf32>
    %122 = arith.subf %104, %121 : vector<256x128xf32>
    %123 = vector.broadcast %120 : vector<256x1xf32> to vector<256x128xf32>
    %124 = arith.mulf %122, %123 : vector<256x128xf32>
    %125 = vector.broadcast %105 : vector<1x128xf32> to vector<256x128xf32>
    %126 = arith.mulf %124, %125 : vector<256x128xf32>
    %127 = vector.broadcast %106 : vector<1x128xf32> to vector<256x128xf32>
    %128 = arith.addf %126, %127 : vector<256x128xf32>
    %cst_48 = arith.constant 0.000000e+00 : f32
    %129 = vector.broadcast %cst_48 : f32 to vector<256x128xf32>
    %130 = arith.maximumf %128, %129 : vector<256x128xf32>
    %131 = arith.truncf %130 : vector<256x128xf32> to vector<256x128xbf16>
    %c0_49 = arith.constant 0 : index
    %c0_50 = arith.constant 0 : index
    %132 = vector.load %arg6[%c0_49, %c0_50] : memref<128x128xbf16, #tpu.memory_space<vmem>>, vector<128x128xbf16>
    %cst_51 = arith.constant dense<0.000000e+00> : vector<256x128xf32>
    %133 = tpu.matmul %131, %132, %cst_51 {dimension_numbers = #tpu.dot_dimension_numbers<[1], [0], [0], [1], [0, 0, 1, 1], [], []>} : vector<256x128xbf16>, vector<128x128xbf16>, vector<256x128xf32> -> vector<256x128xf32>
    %134 = vector.extract_strided_slice %133 {offsets = [0, 0], sizes = [256, 1], strides = [1, 1]} : vector<256x128xf32> to vector<256x1xf32>
    %c12 = arith.constant 12 : index
    %c0_52 = arith.constant 0 : index
    %135 = vector.load %arg7[%c12, %c0_52] : memref<16x128xf32, #tpu.memory_space<vmem>>, vector<1x1xf32>
    %136 = vector.broadcast %135 : vector<1x1xf32> to vector<256x1xf32>
    %137 = arith.addf %134, %136 : vector<256x1xf32>
    %138 = math.tanh %137 : vector<256x1xf32>
    %c0_53 = arith.constant 0 : index
    %c0_54 = arith.constant 0 : index
    %139 = vector.load %arg8[%c0_53, %c0_54] : memref<256x1xf32, #tpu.memory_space<vmem>>, vector<256x1xf32>
    tpu.vector_store %arg8[%c0_53, %c0_54], %138 {strides = array<i32>} : memref<256x1xf32, #tpu.memory_space<vmem>>, vector<256x1xf32>,
    return
  }
  func.func @transform_0(%arg0: i32) -> (i32, i32) {
    %c0_i32 = arith.constant 0 : i32
    %c0_i32_0 = arith.constant 0 : i32
    return %arg0, %c0_i32 : i32, i32
  }
  func.func @transform_1(%arg0: i32) -> (i32, i32) {
    %c0_i32 = arith.constant 0 : i32
    %c0_i32_0 = arith.constant 0 : i32
    %c0_i32_1 = arith.constant 0 : i32
    return %c0_i32, %c0_i32_0 : i32, i32
  }
  func.func @transform_2(%arg0: i32) -> (i32, i32) {
    %c0_i32 = arith.constant 0 : i32
    %c0_i32_0 = arith.constant 0 : i32
    %c0_i32_1 = arith.constant 0 : i32
    return %c0_i32, %c0_i32_0 : i32, i32
  }
  func.func @transform_3(%arg0: i32) -> (i32, i32) {
    %c0_i32 = arith.constant 0 : i32
    %c0_i32_0 = arith.constant 0 : i32
    %c0_i32_1 = arith.constant 0 : i32
    return %c0_i32, %c0_i32_0 : i32, i32
  }
  func.func @transform_4(%arg0: i32) -> (i32, i32) {
    %c0_i32 = arith.constant 0 : i32
    %c0_i32_0 = arith.constant 0 : i32
    %c0_i32_1 = arith.constant 0 : i32
    return %c0_i32, %c0_i32_0 : i32, i32
  }
  func.func @transform_5(%arg0: i32) -> (i32, i32) {
    %c0_i32 = arith.constant 0 : i32
    %c0_i32_0 = arith.constant 0 : i32
    %c0_i32_1 = arith.constant 0 : i32
    return %c0_i32, %c0_i32_0 : i32, i32
  }
  func.func @transform_6(%arg0: i32) -> (i32, i32) {
    %c0_i32 = arith.constant 0 : i32
    %c0_i32_0 = arith.constant 0 : i32
    %c0_i32_1 = arith.constant 0 : i32
    return %c0_i32, %c0_i32_0 : i32, i32
  }
  func.func @transform_7(%arg0: i32) -> (i32, i32) {
    %c0_i32 = arith.constant 0 : i32
    %c0_i32_0 = arith.constant 0 : i32
    return %arg0, %c0_i32 : i32, i32
  }
}

</mosaic_0001>

<bundles_post_ra>
// kernel: _lambda_.1
= control target key start
LH: loop header
LB: loop body
LE: loop exit
PB: predicated region body
PF: predicated region fallthrough
CT: control target
= control target key end

     0   :  { %s4902_s24 = smov 0   ;;  %s7148_s0 = inlined_call_operand.vmem [shape: bf16[512,76], index: 0, kind: input, shape index: {}]   ;;  %s7149_s1 = inlined_call_operand.vmem [shape: bf16[76,256], index: 1, kind: input, shape index: {}]   ;;  %s7150_s2 = inlined_call_operand.vmem [shape: bf16[128,52], index: 2, kind: input, shape index: {}]   ;;  %s7151_s3 = inlined_call_operand.vmem [shape: bf16[52,128], index: 3, kind: input, shape index: {}]   ;;  %s7152_s4 = inlined_call_operand.vmem [shape: bf16[128,128], index: 4, kind: input, shape index: {}]   ;;  %s7153_s5 = inlined_call_operand.vmem [shape: bf16[128,128], index: 5, kind: input, shape index: {}]   ;;  %s7154_s6 = inlined_call_operand.vmem [shape: f32[16,128], index: 6, kind: input, shape index: {}]   ;;  %s7155_s7 = inlined_call_operand.vmem [shape: f32[512,1], index: 7, kind: output, shape index: {}]  }
   0x1 LB: > { %s4077_s25 = sadd.s32 4294967295, %s4859_s24   ;;  %p4081_p0 = scmp.ge.s32.totalorder %s4859_s24, 1  ;;  %s4859_s24 = sphi %s4902_s24, %s17_s24  }
   0x2   : > { %p238_p1 = scmp.lt.s32.totalorder %s4859_s24, 3 }
   0x4   : > { %p239_p2 = pnand %p4081_p0, %p238_p1 }
   0x6   : > { %242 = sbr.rel (%p239_p2) target bundleno = 1970 (0x7b2), region = 48 }
   0xd   : > { %v4474_v0 = vld [vmem:[%s7149_s1 + $0x4] ss:$8 sps:$4 sm:$0xff]   ;;  %v4476_v1 = vld [vmem:[%s7149_s1] ss:$8 sps:$4 sm:$0xff]   ;;  %v4861_v2 = vmov 0   ;;  %s4082_s30 = sshll.u32 %s4077_s25, 5 }
   0xe   : > { %541 = vmatprep.mubr.bf16.mxu0 %v4861_v2  ;;  %509 = vmatprep.subr.bf16.mxu0 %v4474_v0  ;;  %v4477_v3 = vld [vmem:[%s7149_s1 + $0x14] ss:$8 sps:$4 sm:$0xff]   ;;  %p271_p3 = scmp.lt.s32.totalorder %s4082_s30, 63  ;;  %v4479_v4 = vld [vmem:[%s7149_s1 + $0x10] ss:$8 sps:$4 sm:$0xff]   ;;  %vm502_vm0 = vcmask 1045504  }
   0xf   : > { %510 = vmatpush1.bf16.msra.mxu0 %v4476_v1  ;;  %v4480_v5 = vld [vmem:[%s7149_s1 + $0x24] ss:$8 sps:$4 sm:$0xff]   ;;  %v4482_v6 = vld [vmem:[%s7149_s1 + $0x20] ss:$8 sps:$4 sm:$0xff]   ;;  %v4483_v7 = vld [vmem:[%s7149_s1 + $0x34] ss:$8 sps:$4 sm:$0xff]  }
  0x10   : > { %511 = vmatprep.subr.bf16.mxu0 %v4477_v3  ;;  %s7207_s30 = smov (!%p271_p3, %s4082_s30), 63  ;;  %v4486_v8 = vld [vmem:[%s7149_s1 + $0x44] ss:$8 sps:$4 sm:$0x3f]   ;;  %v4485_v10 = vld [vmem:[%s7149_s1 + $0x30] ss:$8 sps:$4 sm:$0xff]  }
  0x11   : > { %s4083_s16 = sshll.u32 %s7207_s30, 2  ;;  %v4488_v9 = vld [vmem:[%s7149_s1 + $0x40] ss:$8 sps:$4 sm:$0x3f]   ;;  %vm453_vm1 = vcmask 621568   ;;  %v4507_v3 = vld [vmem:[%s7150_s2 + $0x10] sm:$0xff]  }
  0x12   : > { %s4938_s21 = scalar_lea.vmem %s7148_s0, %s4083_s16  ;;  %v504_v11 = vsel %vm502_vm0, %v4488_v9, 0  ;;  %v4999_v28 = vld [vmem:[%s7154_s6] ss:$0 sm:$0xff]  ;;  %v4506_v61 = vld [vmem:[%s7150_s2 + $0x8] sm:$0xff]   ;;  %vm1509_vm2 = vcmask 424960   ;;  %vm2186_vm3 = vcmask 1041408  }
  0x13   : > { %512 = vmatpush1.bf16.msra.mxu0 %v4479_v4  ;;  %v4489_v12 = vld [vmem:[%s4938_s21] sm:$0xff]   ;;  %v4490_v13 = vld [vmem:[%s4938_s21 + $0x8] sm:$0xff]   ;;  %v4491_v14 = vld [vmem:[%s4938_s21 + $0x10] sm:$0xff]   ;;  %s4085_s27 = sshll.u32 %s7207_s30, 3  ;;  %vm3988_vm4 = vcmask 7168  }
  0x14   : > { %513 = vmatprep.subr.bf16.mxu0 %v4480_v5  ;;  %v4492_v15 = vld [vmem:[%s4938_s21 + $0x18] sm:$0xff]   ;;  %v4493_v16 = vld [vmem:[%s4938_s21 + $0x20] sm:$0xff]   ;;  %v4494_v17 = vld [vmem:[%s4938_s21 + $0x28] sm:$0xff]   ;;  %s7051_s8 = scalar_lea.vmem %s7155_s7, %s4085_s27 }
  0x15   : > { %v4495_v18 = vld [vmem:[%s4938_s21 + $0x30] sm:$0xff]   ;;  %v4496_v19 = vld [vmem:[%s4938_s21 + $0x38] sm:$0xff]   ;;  %v4497_v20 = vld [vmem:[%s4938_s21 + $0x40] sm:$0xff]  }
  0x16   : > { %v4498_v21 = vld [vmem:[%s4938_s21 + $0x48] sm:$0xff]   ;;  %v4499_v22 = vld [vmem:[%s4938_s21 + $0x50] sm:$0xff]   ;;  %v4500_v23 = vld [vmem:[%s4938_s21 + $0x58] sm:$0xff]  }
  0x17   : > { %514 = vmatpush1.bf16.msra.mxu0 %v4482_v6  ;;  %v4501_v24 = vld [vmem:[%s4938_s21 + $0x60] sm:$0xff]   ;;  %v4502_v25 = vld [vmem:[%s4938_s21 + $0x68] sm:$0xff]   ;;  %v4503_v26 = vld [vmem:[%s4938_s21 + $0x70] sm:$0xff]  }
  0x18   : > { %515 = vmatprep.subr.bf16.mxu0 %v4483_v7  ;;  %v4504_v27 = vld [vmem:[%s4938_s21 + $0x78] sm:$0xff]   ;;  %v4505_v57 = vld [vmem:[%s7150_s2] sm:$0xff]  }
  0x19   : > { %4280 = vmatprep.subr.bf16.mxu1 %v4505_v57  ;;  %v4508_v7 = vld [vmem:[%s7150_s2 + $0x18] sm:$0xff]  }
  0x1a   : > { %4281 = vmatpush3.bf16.msra.mxu1 %v4505_v57 }
  0x1b   : > { %516 = vmatpush1.bf16.msra.mxu0 %v4485_v10  ;;  %4282 = vmatprep.subr.bf16.mxu1 %v4506_v61 }
  0x1c   : > { %4112 = vmatprep.subr.msk.bf16.mxu0 %vm502_vm0, %v4486_v8 }
  0x1e   : > { %4283 = vmatpush3.bf16.msra.mxu1 %v4506_v61 }
  0x1f   : > { %518 = vmatpush1.bf16.msra.mxu0 %v504_v11  ;;  %4284 = vmatprep.subr.bf16.mxu1 %v4507_v3 }
  0x22   : > { %4113 = vmatmul.mubr.msk.bf16.vlgmr.msra.gmra.mrb[0].mxu0 %vm453_vm1, %v4489_v12  ;;  %4285 = vmatpush3.bf16.msra.mxu1 %v4507_v3 }
  0x23   : > { %551 = vmatprep.mubr.bf16.mxu0 %v4861_v2  ;;  %4286 = vmatprep.subr.bf16.mxu1 %v4508_v7 }
  0x26   : > { %4287 = vmatpush3.bf16.msra.mxu1 %v4508_v7 }
  0x2a   : > { %4114 = vmatmul.mubr.msk.bf16.gmra.mrb[4].mxu0 %vm453_vm1, %v4490_v13  ;;  %v4509_v13 = vld [vmem:[%s7150_s2 + $0x20] sm:$0xff]  }
  0x2b   : > { %561 = vmatprep.mubr.bf16.mxu0 %v4861_v2  ;;  %4288 = vmatprep.subr.bf16.mxu1 %v4509_v13 }
  0x2c   : > { %4289 = vmatpush3.bf16.msra.mxu1 %v4509_v13 }
  0x32   : > { %4115 = vmatmul.mubr.msk.bf16.gmra.mrb[8].mxu0 %vm453_vm1, %v4491_v14 }
  0x33   : > { %571 = vmatprep.mubr.bf16.mxu0 %v4861_v2 }
  0x3a   : > { %4116 = vmatmul.mubr.msk.bf16.gmra.mrb[12].mxu0 %vm453_vm1, %v4492_v15 }
  0x3b   : > { %581 = vmatprep.mubr.bf16.mxu0 %v4861_v2 }
  0x42   : > { %4117 = vmatmul.mubr.msk.bf16.gmra.mrb[16].mxu0 %vm453_vm1, %v4493_v16 }
  0x43   : > { %591 = vmatprep.mubr.bf16.mxu0 %v4861_v2 }
  0x4a   : > { %4118 = vmatmul.mubr.msk.bf16.gmra.mrb[20].mxu0 %vm453_vm1, %v4494_v17  ;;  %v4510_v17 = vld [vmem:[%s7150_s2 + $0x28] sm:$0xff]  }
  0x4b   : > { %601 = vmatprep.mubr.bf16.mxu0 %v4861_v2  ;;  %4290 = vmatprep.subr.bf16.mxu1 %v4510_v17 }
  0x4c   : > { %4291 = vmatpush3.bf16.msra.mxu1 %v4510_v17 }
  0x52   : > { %4119 = vmatmul.mubr.msk.bf16.gmra.mrb[24].mxu0 %vm453_vm1, %v4495_v18 }
  0x53   : > { %611 = vmatprep.mubr.bf16.mxu0 %v4861_v2 }
  0x5a   : > { %4120 = vmatmul.mubr.msk.bf16.gmra.mrb[28].mxu0 %vm453_vm1, %v4496_v19 }
  0x5b   : > { %621 = vmatprep.mubr.bf16.mxu0 %v4861_v2 }
  0x62   : > { %4121 = vmatmul.mubr.msk.bf16.gmra.mrb[32].mxu0 %vm453_vm1, %v4497_v20 }
  0x63   : > { %631 = vmatprep.mubr.bf16.mxu0 %v4861_v2 }
  0x6a   : > { %4122 = vmatmul.mubr.msk.bf16.gmra.mrb[36].mxu0 %vm453_vm1, %v4498_v21 }
  0x6b   : > { %641 = vmatprep.mubr.bf16.mxu0 %v4861_v2 }
  0x72   : > { %4123 = vmatmul.mubr.msk.bf16.gmra.mrb[40].mxu0 %vm453_vm1, %v4499_v22 }
  0x73   : > { %651 = vmatprep.mubr.bf16.mxu0 %v4861_v2 }
  0x7a   : > { %4124 = vmatmul.mubr.msk.bf16.gmra.mrb[44].mxu0 %vm453_vm1, %v4500_v23  ;;  %v4511_v23 = vld [vmem:[%s7150_s2 + $0x30] sm:$0xff]  }
  0x7b   : > { %661 = vmatprep.mubr.bf16.mxu0 %v4861_v2  ;;  %4292 = vmatprep.subr.bf16.mxu1 %v4511_v23 }
  0x7c   : > { %4293 = vmatpush3.bf16.msra.mxu1 %v4511_v23 }
  0x82   : > { %4125 = vmatmul.mubr.msk.bf16.gmra.mrb[48].mxu0 %vm453_vm1, %v4501_v24 }
  0x83   : > { %671 = vmatprep.mubr.bf16.mxu0 %v4861_v2 }
  0x8a   : > { %4126 = vmatmul.mubr.msk.bf16.gmra.mrb[52].mxu0 %vm453_vm1, %v4502_v25 }
  0x8b   : > { %681 = vmatprep.mubr.bf16.mxu0 %v4861_v2 }
  0x92   : > { %4127 = vmatmul.mubr.msk.bf16.gmra.mrb[56].mxu0 %vm453_vm1, %v4503_v26 }
  0x93   : > { %691 = vmatprep.mubr.bf16.mxu0 %v4861_v2 }
  0x9a   : > { %4128 = vmatmul.mubr.msk.bf16.gmra.mrb[60].mxu0 %vm453_vm1, %v4504_v27  ;;  %v4512_v27 = vld [vmem:[%s7150_s2 + $0x38] sm:$0xff]  }
  0x9b   : > { %4294 = vmatprep.subr.bf16.mxu1 %v4512_v27 }
  0x9c   : > { %4295 = vmatpush3.bf16.msra.mxu1 %v4512_v27 }
  0xf5   : > { %v543_v29 = vpop.f32.mrb[0].mxu0 }
  0xf6   : > { %v5002_v30 = vadd.f32 %v4999_v28, %v543_v29  ;;  %v5004_v31 = vpop.f32.mrb[1].mxu0 }
  0xf7   : > { %v547_v32 = vpop.f32.mrb[2].mxu0 }
  0xf8   : > { %v5007_v33 = vadd.f32 %v4999_v28, %v547_v32  ;;  %741 = vadd.xlane.f32.xlu0 %v5002_v30  ;;  %v5010_v34 = vpop.f32.mrb[3].mxu0  ;;  %v837_v39 = vmul.f32 %v5002_v30, %v5002_v30 }
  0xfa   : > { %v838_v35 = vmul.f32 %v5007_v33, %v5007_v33 }
  0xfc   : > { %743 = vadd.xlane.f32.xlu0 %v5007_v33  ;;  %871 = vadd.xlane.f32.xlu1 %v838_v35 }
  0xfd   : > { %v553_v36 = vpop.f32.mrb[4].mxu0 }
  0xfe   : > { %v5016_v37 = vadd.f32 %v4999_v28, %v553_v36  ;;  %v5018_v38 = vpop.f32.mrb[5].mxu0 }
  0xff   : > { %v557_v40 = vpop.f32.mrb[6].mxu0 }
 0x100   : > { %869 = vadd.xlane.f32.xlu0 %v837_v39  ;;  %745 = vadd.xlane.f32.xlu1 %v5016_v37  ;;  %v5023_v41 = vpop.f32.mrb[7].mxu0  ;;  %v5026_v42 = vadd.f32 %v4999_v28, %v557_v40  ;;  %v839_v43 = vmul.f32 %v5016_v37, %v5016_v37 }
 0x102   : > { %v840_v47 = vmul.f32 %v5026_v42, %v5026_v42 }
 0x104   : > { %873 = vadd.xlane.f32.xlu0 %v839_v43  ;;  %747 = vadd.xlane.f32.xlu1 %v5026_v42 }
 0x105   : > { %v563_v44 = vpop.f32.mrb[8].mxu0 }
 0x106   : > { %v5032_v45 = vadd.f32 %v4999_v28, %v563_v44  ;;  %v5034_v46 = vpop.f32.mrb[9].mxu0 }
 0x107   : > { %v567_v48 = vpop.f32.mrb[10].mxu0 }
 0x108   : > { %875 = vadd.xlane.f32.xlu1 %v840_v47  ;;  %749 = vadd.xlane.f32.xlu0 %v5032_v45  ;;  %v5039_v49 = vpop.f32.mrb[11].mxu0  ;;  %v841_v50 = vmul.f32 %v5032_v45, %v5032_v45  ;;  %v5044_v51 = vadd.f32 %v4999_v28, %v567_v48 }
 0x109   : > { %7156 = vst [vmem:[#allocation2_spill] sm:$0xff] %v5039_v49 }
 0x10a   : > { %v842_v55 = vmul.f32 %v5044_v51, %v5044_v51 }
 0x10c   : > { %877 = vadd.xlane.f32.xlu0 %v841_v50  ;;  %751 = vadd.xlane.f32.xlu1 %v5044_v51 }
 0x10d   : > { %v573_v52 = vpop.f32.mrb[12].mxu0 }
 0x10e   : > { %v5048_v53 = vadd.f32 %v4999_v28, %v573_v52  ;;  %v5050_v54 = vpop.f32.mrb[13].mxu0 }
 0x10f   : > { %v577_v56 = vpop.f32.mrb[14].mxu0 }
 0x110   : > { %879 = vadd.xlane.f32.xlu1 %v842_v55  ;;  %753 = vadd.xlane.f32.xlu0 %v5048_v53  ;;  %v5058_v58 = vpop.f32.mrb[15].mxu0  ;;  %v843_v59 = vmul.f32 %v5048_v53, %v5048_v53  ;;  %v5063_v60 = vadd.f32 %v4999_v28, %v577_v56 }
 0x112   : > { %v844_v1 = vmul.f32 %v5063_v60, %v5063_v60 }
 0x114   : > { %881 = vadd.xlane.f32.xlu0 %v843_v59  ;;  %755 = vadd.xlane.f32.xlu1 %v5063_v60 }
 0x115   : > { %v583_v62 = vpop.f32.mrb[16].mxu0 }
 0x116   : > { %v5070_v63 = vadd.f32 %v4999_v28, %v583_v62  ;;  %v5072_v0 = vpop.f32.mrb[17].mxu0 }
 0x117   : > { %7157 = vst [vmem:[#allocation3_spill] sm:$0xff] %v5072_v0  ;;  %v587_v2 = vpop.f32.mrb[18].mxu0 }
 0x118   : > { %883 = vadd.xlane.f32.xlu1 %v844_v1  ;;  %757 = vadd.xlane.f32.xlu0 %v5070_v63  ;;  %v5080_v4 = vpop.f32.mrb[19].mxu0  ;;  %v845_v5 = vmul.f32 %v5070_v63, %v5070_v63  ;;  %v5085_v6 = vadd.f32 %v4999_v28, %v587_v2 }
 0x119   : > { %7158 = vst [vmem:[#allocation4_spill] sm:$0xff] %v5080_v4 }
 0x11a   : > { %v846_v11 = vmul.f32 %v5085_v6, %v5085_v6 }
 0x11c   : > { %885 = vadd.xlane.f32.xlu0 %v845_v5  ;;  %759 = vadd.xlane.f32.xlu1 %v5085_v6 }
 0x11d   : > { %v593_v8 = vpop.f32.mrb[20].mxu0 }
 0x11e   : > { %v5092_v9 = vadd.f32 %v4999_v28, %v593_v8  ;;  %v5094_v10 = vpop.f32.mrb[21].mxu0 }
 0x11f   : > { %7159 = vst [vmem:[#allocation5_spill] sm:$0xff] %v5094_v10  ;;  %v597_v12 = vpop.f32.mrb[22].mxu0 }
 0x120   : > { %887 = vadd.xlane.f32.xlu1 %v846_v11  ;;  %761 = vadd.xlane.f32.xlu0 %v5092_v9  ;;  %v5102_v14 = vpop.f32.mrb[23].mxu0  ;;  %v847_v15 = vmul.f32 %v5092_v9, %v5092_v9  ;;  %v5107_v16 = vadd.f32 %v4999_v28, %v597_v12 }
 0x121   : > { %7160 = vst [vmem:[#allocation6_spill] sm:$0xff] %v5102_v14 }
 0x122   : > { %v848_v21 = vmul.f32 %v5107_v16, %v5107_v16 }
 0x124   : > { %889 = vadd.xlane.f32.xlu0 %v847_v15  ;;  %763 = vadd.xlane.f32.xlu1 %v5107_v16 }
 0x125   : > { %v603_v18 = vpop.f32.mrb[24].mxu0 }
 0x126   : > { %v5114_v19 = vadd.f32 %v4999_v28, %v603_v18  ;;  %v5116_v20 = vpop.f32.mrb[25].mxu0 }
 0x127   : > { %7161 = vst [vmem:[#allocation7_spill] sm:$0xff] %v5116_v20  ;;  %v607_v22 = vpop.f32.mrb[26].mxu0 }
 0x128   : > { %891 = vadd.xlane.f32.xlu1 %v848_v21  ;;  %765 = vadd.xlane.f32.xlu0 %v5114_v19  ;;  %v5124_v24 = vpop.f32.mrb[27].mxu0  ;;  %v849_v25 = vmul.f32 %v5114_v19, %v5114_v19  ;;  %v5129_v26 = vadd.f32 %v4999_v28, %v607_v22 }
 0x129   : > { %7162 = vst [vmem:[#allocation8_spill] sm:$0xff] %v5124_v24 }
 0x12a   : > { %v850_v36 = vmul.f32 %v5129_v26, %v5129_v26 }
 0x12c   : > { %893 = vadd.xlane.f32.xlu0 %v849_v25  ;;  %767 = vadd.xlane.f32.xlu1 %v5129_v26 }
 0x12d   : > { %v613_v29 = vpop.f32.mrb[28].mxu0 }
 0x12e   : > { %v5136_v32 = vadd.f32 %v4999_v28, %v613_v29  ;;  %v5138_v35 = vpop.f32.mrb[29].mxu0 }
 0x12f   : > { %7163 = vst [vmem:[#allocation9_spill] sm:$0xff] %v5138_v35  ;;  %v617_v39 = vpop.f32.mrb[30].mxu0 }
 0x130   : > { %895 = vadd.xlane.f32.xlu1 %v850_v36  ;;  %769 = vadd.xlane.f32.xlu0 %v5136_v32  ;;  %v5143_v40 = vpop.f32.mrb[31].mxu0  ;;  %v851_v43 = vmul.f32 %v5136_v32, %v5136_v32  ;;  %v5148_v44 = vadd.f32 %v4999_v28, %v617_v39 }
 0x131   : > { %7164 = vst [vmem:[#allocation10_spill] sm:$0xff] %v5143_v40 }
 0x132   : > { %v852_v52 = vmul.f32 %v5148_v44, %v5148_v44 }
 0x134   : > { %897 = vadd.xlane.f32.xlu0 %v851_v43  ;;  %771 = vadd.xlane.f32.xlu1 %v5148_v44 }
 0x135   : > { %v623_v47 = vpop.f32.mrb[32].mxu0 }
 0x136   : > { %v5152_v48 = vadd.f32 %v4999_v28, %v623_v47  ;;  %v5154_v50 = vpop.f32.mrb[33].mxu0 }
 0x137   : > { %7165 = vst [vmem:[#allocation11_spill] sm:$0xff] %v5154_v50  ;;  %v627_v55 = vpop.f32.mrb[34].mxu0 }
 0x138   : > { %899 = vadd.xlane.f32.xlu1 %v852_v52  ;;  %773 = vadd.xlane.f32.xlu0 %v5152_v48  ;;  %v5159_v56 = vpop.f32.mrb[35].mxu0  ;;  %v853_v57 = vmul.f32 %v5152_v48, %v5152_v48  ;;  %v5164_v59 = vadd.f32 %v4999_v28, %v627_v55 }
 0x139   : > { %7166 = vst [vmem:[#allocation12_spill] sm:$0xff] %v5159_v56 }
 0x13a   : > { %v854_v2 = vmul.f32 %v5164_v59, %v5164_v59 }
 0x13c   : > { %901 = vadd.xlane.f32.xlu0 %v853_v57  ;;  %775 = vadd.xlane.f32.xlu1 %v5164_v59 }
 0x13d   : > { %v633_v61 = vpop.f32.mrb[36].mxu0 }
 0x13e   : > { %v5168_v62 = vadd.f32 %v4999_v28, %v633_v61  ;;  %v5170_v1 = vpop.f32.mrb[37].mxu0 }
 0x13f   : > { %7167 = vst [vmem:[#allocation13_spill] sm:$0xff] %v5170_v1  ;;  %v637_v3 = vpop.f32.mrb[38].mxu0 }
 0x140   : > { %903 = vadd.xlane.f32.xlu1 %v854_v2  ;;  %777 = vadd.xlane.f32.xlu0 %v5168_v62  ;;  %v5175_v5 = vpop.f32.mrb[39].mxu0  ;;  %v855_v7 = vmul.f32 %v5168_v62, %v5168_v62  ;;  %v5180_v8 = vadd.f32 %v4999_v28, %v637_v3 }
 0x141   : > { %7168 = vst [vmem:[#allocation14_spill] sm:$0xff] %v5175_v5 }
 0x142   : > { %v856_v15 = vmul.f32 %v5180_v8, %v5180_v8 }
 0x144   : > { %905 = vadd.xlane.f32.xlu0 %v855_v7  ;;  %779 = vadd.xlane.f32.xlu1 %v5180_v8 }
 0x145   : > { %v643_v11 = vpop.f32.mrb[40].mxu0 }
 0x146   : > { %v5184_v12 = vadd.f32 %v4999_v28, %v643_v11  ;;  %v5186_v13 = vpop.f32.mrb[41].mxu0 }
 0x147   : > { %7169 = vst [vmem:[#allocation15_spill] sm:$0xff] %v5186_v13  ;;  %v647_v17 = vpop.f32.mrb[42].mxu0 }
 0x148   : > { %907 = vadd.xlane.f32.xlu1 %v856_v15  ;;  %781 = vadd.xlane.f32.xlu0 %v5184_v12  ;;  %v5191_v18 = vpop.f32.mrb[43].mxu0  ;;  %v857_v21 = vmul.f32 %v5184_v12, %v5184_v12  ;;  %v5196_v22 = vadd.f32 %v4999_v28, %v647_v17 }
 0x149   : > { %7170 = vst [vmem:[#allocation16_spill] sm:$0xff] %v5191_v18 }
 0x14a   : > { %v858_v29 = vmul.f32 %v5196_v22, %v5196_v22 }
 0x14c   : > { %909 = vadd.xlane.f32.xlu0 %v857_v21  ;;  %783 = vadd.xlane.f32.xlu1 %v5196_v22 }
 0x14d   : > { %v653_v23 = vpop.f32.mrb[44].mxu0 }
 0x14e   : > { %v5200_v25 = vadd.f32 %v4999_v28, %v653_v23  ;;  %v5202_v27 = vpop.f32.mrb[45].mxu0 }
 0x14f   : > { %7171 = vst [vmem:[#allocation17_spill] sm:$0xff] %v5202_v27  ;;  %v657_v36 = vpop.f32.mrb[46].mxu0 }
 0x150   : > { %911 = vadd.xlane.f32.xlu1 %v858_v29  ;;  %785 = vadd.xlane.f32.xlu0 %v5200_v25  ;;  %v5207_v39 = vpop.f32.mrb[47].mxu0  ;;  %v859_v43 = vmul.f32 %v5200_v25, %v5200_v25  ;;  %v5212_v47 = vadd.f32 %v4999_v28, %v657_v36 }
 0x151   : > { %7172 = vst [vmem:[#allocation18_spill] sm:$0xff] %v5207_v39 }
 0x152   : > { %v860_v61 = vmul.f32 %v5212_v47, %v5212_v47 }
 0x154   : > { %913 = vadd.xlane.f32.xlu0 %v859_v43  ;;  %787 = vadd.xlane.f32.xlu1 %v5212_v47 }
 0x155   : > { %v663_v52 = vpop.f32.mrb[48].mxu0 }
 0x156   : > { %v5216_v55 = vadd.f32 %v4999_v28, %v663_v52  ;;  %v5218_v57 = vpop.f32.mrb[49].mxu0 }
 0x157   : > { %7173 = vst [vmem:[#allocation19_spill] sm:$0xff] %v5218_v57  ;;  %v667_v2 = vpop.f32.mrb[50].mxu0 }
 0x158   : > { %915 = vadd.xlane.f32.xlu1 %v860_v61  ;;  %789 = vadd.xlane.f32.xlu0 %v5216_v55  ;;  %v5223_v3 = vpop.f32.mrb[51].mxu0  ;;  %v861_v7 = vmul.f32 %v5216_v55, %v5216_v55  ;;  %v5228_v11 = vadd.f32 %v4999_v28, %v667_v2 }
 0x159   : > { %7174 = vst [vmem:[#allocation20_spill] sm:$0xff] %v5223_v3 }
 0x15a   : > { %v862_v23 = vmul.f32 %v5228_v11, %v5228_v11 }
 0x15c   : > { %917 = vadd.xlane.f32.xlu0 %v861_v7  ;;  %791 = vadd.xlane.f32.xlu1 %v5228_v11 }
 0x15d   : > { %v673_v15 = vpop.f32.mrb[52].mxu0 }
 0x15e   : > { %v5232_v17 = vadd.f32 %v4999_v28, %v673_v15  ;;  %v5234_v21 = vpop.f32.mrb[53].mxu0 }
 0x15f   : > { %7175 = vst [vmem:[#allocation21_spill] sm:$0xff] %v5234_v21  ;;  %v677_v29 = vpop.f32.mrb[54].mxu0 }
 0x160   : > { %919 = vadd.xlane.f32.xlu1 %v862_v23  ;;  %793 = vadd.xlane.f32.xlu0 %v5232_v17  ;;  %v5239_v36 = vpop.f32.mrb[55].mxu0  ;;  %v863_v43 = vmul.f32 %v5232_v17, %v5232_v17  ;;  %v5244_v52 = vadd.f32 %v4999_v28, %v677_v29 }
 0x161   : > { %7176 = vst [vmem:[#allocation22_spill] sm:$0xff] %v5239_v36 }
 0x162   : > { %v864_v15 = vmul.f32 %v5244_v52, %v5244_v52 }
 0x164   : > { %921 = vadd.xlane.f32.xlu0 %v863_v43  ;;  %795 = vadd.xlane.f32.xlu1 %v5244_v52 }
 0x165   : > { %v683_v61 = vpop.f32.mrb[56].mxu0 }
 0x166   : > { %v5248_v2 = vadd.f32 %v4999_v28, %v683_v61  ;;  %v5250_v7 = vpop.f32.mrb[57].mxu0 }
 0x167   : > { %7177 = vst [vmem:[#allocation23_spill] sm:$0xff] %v5250_v7  ;;  %v687_v23 = vpop.f32.mrb[58].mxu0 }
 0x168   : > { %923 = vadd.xlane.f32.xlu1 %v864_v15  ;;  %797 = vadd.xlane.f32.xlu0 %v5248_v2  ;;  %v5256_v3 = vadd.f32 %v4999_v28, %v687_v23  ;;  %v5258_v29 = vpop.f32.mrb[59].mxu0  ;;  %v865_v43 = vmul.f32 %v5248_v2, %v5248_v2 }
 0x169   : > { %7178 = vst [vmem:[#allocation24_spill] sm:$0xff] %v5258_v29 }
 0x16a   : > { %v866_v15 = vmul.f32 %v5256_v3, %v5256_v3 }
 0x16c   : > { %925 = vadd.xlane.f32.xlu0 %v865_v43  ;;  %799 = vadd.xlane.f32.xlu1 %v5256_v3 }
 0x16d   : > { %v693_v61 = vpop.f32.mrb[60].mxu0 }
 0x16e   : > { %v5264_v7 = vadd.f32 %v4999_v28, %v693_v61  ;;  %v5266_v36 = vpop.f32.mrb[61].mxu0 }
 0x16f   : > { %7179 = vst [vmem:[#allocation25_spill] sm:$0xff] %v5266_v36  ;;  %v697_v57 = vpop.f32.mrb[62].mxu0 }
 0x170   : > { %927 = vadd.xlane.f32.xlu1 %v866_v15  ;;  %801 = vadd.xlane.f32.xlu0 %v5264_v7  ;;  %v5272_v23 = vadd.f32 %v4999_v28, %v697_v57  ;;  %v5274_v29 = vpop.f32.mrb[63].mxu0  ;;  %v867_v43 = vmul.f32 %v5264_v7, %v5264_v7 }
 0x171   : > { %7180 = vst [vmem:[#allocation26_spill] sm:$0xff] %v5274_v29 }
 0x172   : > { %v868_v61 = vmul.f32 %v5272_v23, %v5272_v23 }
 0x174   : > { %929 = vadd.xlane.f32.xlu0 %v867_v43  ;;  %803 = vadd.xlane.f32.xlu1 %v5272_v23 }
 0x178   : > { %931 = vadd.xlane.f32.xlu1 %v868_v61 }
 0x185   : > { %v742_v36 = vpop.xlane.xlu0 %741 }
 0x186   : > { %v805_v18 = vmul.f32 0.0078125, %v742_v36 }
 0x188   : > { %v965_v29 = vmul.f32 %v805_v18, %v805_v18 }
 0x189   : > { %v744_v21 = vpop.xlane.xlu0 %743  ;;  %v872_v15 = vpop.xlane.xlu1 %871 }
 0x18a   : > { %v806_v39 = vmul.f32 0.0078125, %v744_v21  ;;  %v934_v28 = vmul.f32 0.0078125, %v872_v15 }
 0x18c   : > { %v966_v13 = vmul.f32 %v806_v39, %v806_v39 }
 0x18d   : > { %v870_v57 = vpop.xlane.xlu0 %869  ;;  %v746_v27 = vpop.xlane.xlu1 %745 }
 0x18e   : > { %v998_v56 = vsub.f32 %v934_v28, %v966_v13  ;;  %v933_v5 = vmul.f32 0.0078125, %v870_v57  ;;  %v807_v50 = vmul.f32 0.0078125, %v746_v27 }
 0x190   : > { %v1030_v43 = vadd.f32 1e-05, %v998_v56  ;;  %v997_v1 = vsub.f32 %v933_v5, %v965_v29  ;;  %v967_v24 = vmul.f32 %v807_v50, %v807_v50 }
 0x191   : > { %v874_v40 = vpop.xlane.xlu0 %873  ;;  %v748_v20 = vpop.xlane.xlu1 %747 }
 0x192   : > { %4533 = vrsqrt.f32 %v1030_v43  ;;  %v1029_v61 = vadd.f32 1e-05, %v997_v1  ;;  %v935_v35 = vmul.f32 0.0078125, %v874_v40  ;;  %v5281_v4 = vmul.f32 0.0078125, %v748_v20 }
 0x194   : > { %4535 = vrsqrt.f32 %v1029_v61  ;;  %v999_v21 = vsub.f32 %v935_v35, %v967_v24  ;;  %v968_v13 = vmul.f32 %v5281_v4, %v5281_v4  ;;  %v1094_v24 = vsub.f32 %v5007_v33, %v806_v39  ;;  %v5295_v61 = vld [vmem:[%s7154_s6 + $0x1] ss:$0 sm:$0xff]  ;;  %v5305_v39 = vld [vmem:[%s7154_s6 + $0x2] ss:$0 sm:$0xff] }
 0x195   : > { %v876_v36 = vpop.xlane.xlu1 %875  ;;  %v750_v15 = vpop.xlane.xlu0 %749 }
 0x196   : > { %v1031_v14 = vadd.f32 1e-05, %v999_v21  ;;  %v936_v28 = vmul.f32 0.0078125, %v876_v36  ;;  %v5285_v27 = vmul.f32 0.0078125, %v750_v15 }
 0x198   : > { %4537 = vrsqrt.f32 %v1031_v14  ;;  %v1000_v56 = vsub.f32 %v936_v28, %v968_v13  ;;  %v969_v5 = vmul.f32 %v5285_v27, %v5285_v27  ;;  %v1093_v14 = vsub.f32 %v5002_v30, %v805_v18 }
 0x199   : > { %v878_v1 = vpop.xlane.xlu0 %877  ;;  %v752_v40 = vpop.xlane.xlu1 %751 }
 0x19a   : > { %v1032_v20 = vadd.f32 1e-05, %v1000_v56  ;;  %v937_v29 = vmul.f32 0.0078125, %v878_v1  ;;  %v5289_v57 = vmul.f32 0.0078125, %v752_v40 }
 0x19c   : > { %v4534_v35 = vpop.eup %4533  ;;  %4539 = vrsqrt.f32 %v1032_v20  ;;  %v1001_v43 = vsub.f32 %v937_v29, %v969_v5  ;;  %v970_v56 = vmul.f32 %v5289_v57, %v5289_v57  ;;  %v1095_v20 = vsub.f32 %v5016_v37, %v807_v50 }
 0x19d   : > { %v880_v21 = vpop.xlane.xlu1 %879  ;;  %v754_v36 = vpop.xlane.xlu0 %753  ;;  %v1126_v15 = vmul.f32 %v4534_v35, %v1094_v24 }
 0x19e   : > { %v4536_v13 = vpop.eup %4535  ;;  %v1033_v28 = vadd.f32 1e-05, %v1001_v43  ;;  %v938_v1 = vmul.f32 0.0078125, %v880_v21  ;;  %v5300_v33 = vmul.f32 0.0078125, %v754_v36 }
 0x19f   : > { %v1125_v5 = vmul.f32 %v4536_v13, %v1093_v14  ;;  %v1162_v40 = vmul.f32 %v5295_v61, %v1126_v15 }
 0x1a0   : > { %4541 = vrsqrt.f32 %v1033_v28  ;;  %v1002_v30 = vsub.f32 %v938_v1, %v970_v56  ;;  %v971_v18 = vmul.f32 %v5300_v33, %v5300_v33  ;;  %v1096_v28 = vsub.f32 %v5026_v42, %v5281_v4 }
 0x1a1   : > { %v882_v29 = vpop.xlane.xlu0 %881  ;;  %v756_v24 = vpop.xlane.xlu1 %755  ;;  %v1161_v35 = vmul.f32 %v5295_v61, %v1125_v5  ;;  %v1198_v43 = vadd.f32 %v5305_v39, %v1162_v40  ;;  %v1097_v4 = vsub.f32 %v5032_v45, %v5285_v27  ;;  %v1098_v45 = vsub.f32 %v5044_v51, %v5289_v57 }
 0x1a2   : > { %v4538_v21 = vpop.eup %4537  ;;  %v1034_v36 = vadd.f32 1e-05, %v1002_v30  ;;  %v939_v0 = vmul.f32 0.0078125, %v882_v29  ;;  %v5313_v10 = vmul.f32 0.0078125, %v756_v24  ;;  %v1099_v57 = vsub.f32 %v5048_v53, %v5300_v33 }
 0x1a3   : > { %v1197_v14 = vadd.f32 %v5305_v39, %v1161_v35  ;;  %v1127_v15 = vmul.f32 %v4538_v21, %v1095_v20  ;;  %v1230_v1 = vmax.f32 %v1198_v43, 0.0 }
 0x1a4   : > { %4543 = vrsqrt.f32 %v1034_v36  ;;  %v1003_v13 = vsub.f32 %v939_v0, %v971_v18  ;;  %v972_v30 = vmul.f32 %v5313_v10, %v5313_v10  ;;  %v1100_v53 = vsub.f32 %v5063_v60, %v5313_v10 }
 0x1a5   : > { %v884_v37 = vpop.xlane.xlu1 %883  ;;  %v758_v50 = vpop.xlane.xlu0 %757  ;;  %v1229_v56 = vmax.f32 %v1197_v14, 0.0  ;;  %v1163_v5 = vmul.f32 %v5295_v61, %v1127_v15 }
 0x1a6   : > { %v4540_v40 = vpop.eup %4539  ;;  %v1035_v49 = vadd.f32 1e-05, %v1003_v13  ;;  %v940_v29 = vmul.f32 0.0078125, %v884_v37  ;;  %v5321_v24 = vmul.f32 0.0078125, %v758_v50 }
 0x1a7   : > { %v1261_v20 = vpack.c.bf16 %v1230_v1, %v1229_v56  ;;  %v1128_v35 = vmul.f32 %v4540_v40, %v1096_v28  ;;  %v1199_v36 = vadd.f32 %v5305_v39, %v1163_v5 }
 0x1a8   : > { %4545 = vrsqrt.f32 %v1035_v49  ;;  %v1004_v0 = vsub.f32 %v940_v29, %v972_v30  ;;  %v973_v42 = vmul.f32 %v5321_v24, %v5321_v24  ;;  %v1101_v10 = vsub.f32 %v5070_v63, %v5321_v24 }
 0x1a9   : > { %4296 = vmatprep.mubr.bf16.mxu1 %v1261_v20  ;;  %v886_v18 = vpop.xlane.xlu0 %885  ;;  %v760_v43 = vpop.xlane.xlu1 %759  ;;  %v1164_v21 = vmul.f32 %v5295_v61, %v1128_v35  ;;  %v1231_v1 = vmax.f32 %v1199_v36, 0.0 }
 0x1aa   : > { %v4542_v14 = vpop.eup %4541  ;;  %v1036_v15 = vadd.f32 1e-05, %v1004_v0  ;;  %v941_v13 = vmul.f32 0.0078125, %v886_v18  ;;  %v5329_v37 = vmul.f32 0.0078125, %v760_v43 }
 0x1ab   : > { %v1200_v49 = vadd.f32 %v5305_v39, %v1164_v21  ;;  %v1129_v28 = vmul.f32 %v4542_v14, %v1097_v4 }
 0x1ac   : > { %4547 = vrsqrt.f32 %v1036_v15  ;;  %v1005_v50 = vsub.f32 %v941_v13, %v973_v42  ;;  %v974_v20 = vmul.f32 %v5329_v37, %v5329_v37  ;;  %v1102_v63 = vsub.f32 %v5085_v6, %v5329_v37 }
 0x1ad   : > { %v888_v27 = vpop.xlane.xlu1 %887  ;;  %v762_v56 = vpop.xlane.xlu0 %761  ;;  %v1232_v40 = vmax.f32 %v1200_v49, 0.0  ;;  %v1165_v30 = vmul.f32 %v5295_v61, %v1129_v28 }
 0x1ae   : > { %v4544_v5 = vpop.eup %4543  ;;  %v1037_v29 = vadd.f32 1e-05, %v1005_v50  ;;  %v942_v35 = vmul.f32 0.0078125, %v888_v27  ;;  %v5337_v0 = vmul.f32 0.0078125, %v762_v56 }
 0x1af   : > { %v1262_v4 = vpack.c.bf16 %v1232_v40, %v1231_v1  ;;  %v1130_v18 = vmul.f32 %v4544_v5, %v1098_v45  ;;  %v1201_v14 = vadd.f32 %v5305_v39, %v1165_v30 }
 0x1b0   : > { %4549 = vrsqrt.f32 %v1037_v29  ;;  %v1006_v42 = vsub.f32 %v942_v35, %v974_v20  ;;  %v975_v51 = vmul.f32 %v5337_v0, %v5337_v0  ;;  %v1103_v37 = vsub.f32 %v5092_v9, %v5337_v0 }
 0x1b1   : > { %4297 = vmatmul.mubr.bf16.vlgmr.msra.gmra.mrb[0].mxu1 %v1262_v4  ;;  %v890_v43 = vpop.xlane.xlu0 %889  ;;  %v764_v21 = vpop.xlane.xlu1 %763  ;;  %v1166_v36 = vmul.f32 %v5295_v61, %v1130_v18  ;;  %v1233_v1 = vmax.f32 %v1201_v14, 0.0 }
 0x1b2   : > { %v4546_v15 = vpop.eup %4545  ;;  %v1038_v13 = vadd.f32 1e-05, %v1006_v42  ;;  %v943_v49 = vmul.f32 0.0078125, %v890_v43  ;;  %v5345_v28 = vmul.f32 0.0078125, %v764_v21 }
 0x1b3   : > { %v1202_v50 = vadd.f32 %v5305_v39, %v1166_v36  ;;  %v1131_v45 = vmul.f32 %v4546_v15, %v1099_v57 }
 0x1b4   : > { %4551 = vrsqrt.f32 %v1038_v13  ;;  %v1007_v27 = vsub.f32 %v943_v49, %v975_v51  ;;  %v976_v20 = vmul.f32 %v5345_v28, %v5345_v28  ;;  %v1104_v9 = vsub.f32 %v5107_v16, %v5345_v28 }
 0x1b5   : > { %v892_v33 = vpop.xlane.xlu1 %891  ;;  %v766_v56 = vpop.xlane.xlu0 %765  ;;  %v1234_v40 = vmax.f32 %v1202_v50, 0.0  ;;  %v1167_v5 = vmul.f32 %v5295_v61, %v1131_v45 }
 0x1b6   : > { %v4548_v30 = vpop.eup %4547  ;;  %v1039_v29 = vadd.f32 1e-05, %v1007_v27  ;;  %v944_v35 = vmul.f32 0.0078125, %v892_v33  ;;  %v5353_v4 = vmul.f32 0.0078125, %v766_v56 }
 0x1b7   : > { %v1263_v18 = vpack.c.bf16 %v1234_v40, %v1233_v1  ;;  %v1132_v42 = vmul.f32 %v4548_v30, %v1100_v53  ;;  %v1203_v36 = vadd.f32 %v5305_v39, %v1167_v5 }
 0x1b8   : > { %4553 = vrsqrt.f32 %v1039_v29  ;;  %v1008_v51 = vsub.f32 %v944_v35, %v976_v20  ;;  %v977_v60 = vmul.f32 %v5353_v4, %v5353_v4  ;;  %v1105_v28 = vsub.f32 %v5114_v19, %v5353_v4 }
 0x1b9   : > { %4300 = vmatprep.mubr.bf16.mxu1 %v1263_v18  ;;  %v894_v57 = vpop.xlane.xlu0 %893  ;;  %v768_v43 = vpop.xlane.xlu1 %767  ;;  %v1168_v21 = vmul.f32 %v5295_v61, %v1132_v42  ;;  %v1235_v33 = vmax.f32 %v1203_v36, 0.0 }
 0x1ba   : > { %v4550_v14 = vpop.eup %4549  ;;  %v1040_v15 = vadd.f32 1e-05, %v1008_v51  ;;  %v945_v13 = vmul.f32 0.0078125, %v894_v57  ;;  %v5361_v49 = vmul.f32 0.0078125, %v768_v43 }
 0x1bb   : > { %v1204_v50 = vadd.f32 %v5305_v39, %v1168_v21  ;;  %v1133_v45 = vmul.f32 %v4550_v14, %v1101_v10 }
 0x1bc   : > { %4555 = vrsqrt.f32 %v1040_v15  ;;  %v1009_v27 = vsub.f32 %v945_v13, %v977_v60  ;;  %v978_v30 = vmul.f32 %v5361_v49, %v5361_v49  ;;  %v1106_v19 = vsub.f32 %v5129_v26, %v5361_v49 }
 0x1bd   : > { %v896_v24 = vpop.xlane.xlu1 %895  ;;  %v770_v53 = vpop.xlane.xlu0 %769  ;;  %v1236_v56 = vmax.f32 %v1204_v50, 0.0  ;;  %v1169_v1 = vmul.f32 %v5295_v61, %v1133_v45 }
 0x1be   : > { %v4552_v40 = vpop.eup %4551  ;;  %v1041_v5 = vadd.f32 1e-05, %v1009_v27  ;;  %v946_v29 = vmul.f32 0.0078125, %v896_v24  ;;  %v5369_v20 = vmul.f32 0.0078125, %v770_v53 }
 0x1bf   : > { %v1264_v35 = vpack.c.bf16 %v1236_v56, %v1235_v33  ;;  %v1134_v18 = vmul.f32 %v4552_v40, %v1102_v63  ;;  %v1205_v57 = vadd.f32 %v5305_v39, %v1169_v1 }
 0x1c0   : > { %4557 = vrsqrt.f32 %v1041_v5  ;;  %v1010_v42 = vsub.f32 %v946_v29, %v978_v30  ;;  %v979_v6 = vmul.f32 %v5369_v20, %v5369_v20  ;;  %v1107_v49 = vsub.f32 %v5136_v32, %v5369_v20 }
 0x1c1   : > { %4301 = vmatmul.mubr.bf16.gmra.mrb[4].mxu1 %v1264_v35  ;;  %v898_v51 = vpop.xlane.xlu0 %897  ;;  %v772_v60 = vpop.xlane.xlu1 %771  ;;  %v1170_v10 = vmul.f32 %v5295_v61, %v1134_v18  ;;  %v1237_v27 = vmax.f32 %v1205_v57, 0.0 }
 0x1c2   : > { %v4554_v43 = vpop.eup %4553  ;;  %v1042_v21 = vadd.f32 1e-05, %v1010_v42  ;;  %v947_v36 = vmul.f32 0.0078125, %v898_v51  ;;  %v5377_v14 = vmul.f32 0.0078125, %v772_v60 }
 0x1c3   : > { %v1206_v15 = vadd.f32 %v5305_v39, %v1170_v10  ;;  %v1135_v13 = vmul.f32 %v4554_v43, %v1103_v37 }
 0x1c4   : > { %4559 = vrsqrt.f32 %v1042_v21  ;;  %v1011_v50 = vsub.f32 %v947_v36, %v979_v6  ;;  %v980_v56 = vmul.f32 %v5377_v14, %v5377_v14  ;;  %v1108_v32 = vsub.f32 %v5148_v44, %v5377_v14 }
 0x1c5   : > { %v900_v0 = vpop.xlane.xlu1 %899  ;;  %v774_v45 = vpop.xlane.xlu0 %773  ;;  %v1238_v63 = vmax.f32 %v1206_v15, 0.0  ;;  %v1171_v24 = vmul.f32 %v5295_v61, %v1135_v13 }
 0x1c6   : > { %v4556_v53 = vpop.eup %4555  ;;  %v1043_v33 = vadd.f32 1e-05, %v1011_v50  ;;  %v948_v1 = vmul.f32 0.0078125, %v900_v0  ;;  %v5385_v40 = vmul.f32 0.0078125, %v774_v45 }
 0x1c7   : > { %v1265_v5 = vpack.c.bf16 %v1238_v63, %v1237_v27  ;;  %v1136_v30 = vmul.f32 %v4556_v53, %v1104_v9  ;;  %v1207_v6 = vadd.f32 %v5305_v39, %v1171_v24 }
 0x1c8   : > { %4561 = vrsqrt.f32 %v1043_v33  ;;  %v1012_v29 = vsub.f32 %v948_v1, %v980_v56  ;;  %v981_v16 = vmul.f32 %v5385_v40, %v5385_v40  ;;  %v1109_v14 = vsub.f32 %v5152_v48, %v5385_v40 }
 0x1c9   : > { %4304 = vmatprep.mubr.bf16.mxu1 %v1265_v5  ;;  %v902_v35 = vpop.xlane.xlu0 %901  ;;  %v776_v18 = vpop.xlane.xlu1 %775  ;;  %v1172_v42 = vmul.f32 %v5295_v61, %v1136_v30  ;;  %v1239_v15 = vmax.f32 %v1207_v6, 0.0 }
 0x1ca   : > { %v4558_v37 = vpop.eup %4557  ;;  %v1044_v51 = vadd.f32 1e-05, %v1012_v29  ;;  %v949_v60 = vmul.f32 0.0078125, %v902_v35  ;;  %v5393_v10 = vmul.f32 0.0078125, %v776_v18 }
 0x1cb   : > { %v1208_v57 = vadd.f32 %v5305_v39, %v1172_v42  ;;  %v1137_v43 = vmul.f32 %v4558_v37, %v1105_v28 }
 0x1cc   : > { %4563 = vrsqrt.f32 %v1044_v51  ;;  %v1013_v21 = vsub.f32 %v949_v60, %v981_v16  ;;  %v982_v45 = vmul.f32 %v5393_v10, %v5393_v10  ;;  %v1110_v48 = vsub.f32 %v5164_v59, %v5393_v10 }
 0x1cd   : > { %v904_v4 = vpop.xlane.xlu1 %903  ;;  %v778_v36 = vpop.xlane.xlu0 %777  ;;  %v1240_v13 = vmax.f32 %v1208_v57, 0.0  ;;  %v1173_v50 = vmul.f32 %v5295_v61, %v1137_v43 }
 0x1ce   : > { %v4560_v9 = vpop.eup %4559  ;;  %v1045_v0 = vadd.f32 1e-05, %v1013_v21  ;;  %v950_v27 = vmul.f32 0.0078125, %v904_v4  ;;  %v5401_v63 = vmul.f32 0.0078125, %v778_v36 }
 0x1cf   : > { %v1266_v24 = vpack.c.bf16 %v1240_v13, %v1239_v15  ;;  %v1138_v53 = vmul.f32 %v4560_v9, %v1106_v19  ;;  %v1209_v30 = vadd.f32 %v5305_v39, %v1173_v50 }
 0x1d0   : > { %4565 = vrsqrt.f32 %v1045_v0  ;;  %v1014_v33 = vsub.f32 %v950_v27, %v982_v45  ;;  %v983_v26 = vmul.f32 %v5401_v63, %v5401_v63  ;;  %v1111_v10 = vsub.f32 %v5168_v62, %v5401_v63 }
 0x1d1   : > { %4305 = vmatmul.mubr.bf16.gmra.mrb[8].mxu1 %v1266_v24  ;;  %v906_v56 = vpop.xlane.xlu0 %905  ;;  %v780_v1 = vpop.xlane.xlu1 %779  ;;  %v1174_v5 = vmul.f32 %v5295_v61, %v1138_v53  ;;  %v1241_v51 = vmax.f32 %v1209_v30, 0.0 }
 0x1d2   : > { %v4562_v29 = vpop.eup %4561  ;;  %v1046_v16 = vadd.f32 1e-05, %v1014_v33  ;;  %v951_v28 = vmul.f32 0.0078125, %v906_v56  ;;  %v5409_v35 = vmul.f32 0.0078125, %v780_v1 }
 0x1d3   : > { %v1210_v18 = vadd.f32 %v5305_v39, %v1174_v5  ;;  %v1139_v42 = vmul.f32 %v4562_v29, %v1107_v49 }
 0x1d4   : > { %4567 = vrsqrt.f32 %v1046_v16  ;;  %v1015_v6 = vsub.f32 %v951_v28, %v983_v26  ;;  %v984_v19 = vmul.f32 %v5409_v35, %v5409_v35  ;;  %v1112_v62 = vsub.f32 %v5180_v8, %v5409_v35 }
 0x1d5   : > { %v908_v20 = vpop.xlane.xlu1 %907  ;;  %v782_v37 = vpop.xlane.xlu0 %781  ;;  %v1242_v60 = vmax.f32 %v1210_v18, 0.0  ;;  %v1175_v57 = vmul.f32 %v5295_v61, %v1139_v42 }
 0x1d6   : > { %v4564_v43 = vpop.eup %4563  ;;  %v1047_v21 = vadd.f32 1e-05, %v1015_v6  ;;  %v952_v4 = vmul.f32 0.0078125, %v908_v20  ;;  %v5417_v36 = vmul.f32 0.0078125, %v782_v37 }
 0x1d7   : > { %v1267_v15 = vpack.c.bf16 %v1242_v60, %v1241_v51  ;;  %v1140_v13 = vmul.f32 %v4564_v43, %v1108_v32  ;;  %v1211_v27 = vadd.f32 %v5305_v39, %v1175_v57 }
 0x1d8   : > { %4569 = vrsqrt.f32 %v1047_v21  ;;  %v1016_v50 = vsub.f32 %v952_v4, %v984_v19  ;;  %v985_v44 = vmul.f32 %v5417_v36, %v5417_v36  ;;  %v1113_v35 = vsub.f32 %v5184_v12, %v5417_v36 }
 0x1d9   : > { %4308 = vmatprep.mubr.bf16.mxu1 %v1267_v15  ;;  %v910_v9 = vpop.xlane.xlu0 %909  ;;  %v784_v0 = vpop.xlane.xlu1 %783  ;;  %v1176_v45 = vmul.f32 %v5295_v61, %v1140_v13  ;;  %v1243_v30 = vmax.f32 %v1211_v27, 0.0 }
 0x1da   : > { %v4566_v24 = vpop.eup %4565  ;;  %v1048_v53 = vadd.f32 1e-05, %v1016_v50  ;;  %v953_v33 = vmul.f32 0.0078125, %v910_v9  ;;  %v5425_v26 = vmul.f32 0.0078125, %v784_v0 }
 0x1db   : > { %v1212_v49 = vadd.f32 %v5305_v39, %v1176_v45  ;;  %v1141_v56 = vmul.f32 %v4566_v24, %v1109_v14 }
 0x1dc   : > { %4571 = vrsqrt.f32 %v1048_v53  ;;  %v1017_v1 = vsub.f32 %v953_v33, %v985_v44  ;;  %v986_v42 = vmul.f32 %v5425_v26, %v5425_v26  ;;  %v1114_v12 = vsub.f32 %v5196_v22, %v5425_v26 }
 0x1dd   : > { %v912_v40 = vpop.xlane.xlu1 %911  ;;  %v786_v5 = vpop.xlane.xlu0 %785  ;;  %v1244_v29 = vmax.f32 %v1212_v49, 0.0  ;;  %v1177_v16 = vmul.f32 %v5295_v61, %v1141_v56 }
 0x1de   : > { %v4568_v28 = vpop.eup %4567  ;;  %v1049_v18 = vadd.f32 1e-05, %v1017_v1  ;;  %v954_v6 = vmul.f32 0.0078125, %v912_v40  ;;  %v5433_v32 = vmul.f32 0.0078125, %v786_v5 }
 0x1df   : > { %v1268_v20 = vpack.c.bf16 %v1244_v29, %v1243_v30  ;;  %v1142_v37 = vmul.f32 %v4568_v28, %v1110_v48  ;;  %v1213_v21 = vadd.f32 %v5305_v39, %v1177_v16 }
 0x1e0   : > { %4573 = vrsqrt.f32 %v1049_v18  ;;  %v1018_v51 = vsub.f32 %v954_v6, %v986_v42  ;;  %v987_v59 = vmul.f32 %v5433_v32, %v5433_v32  ;;  %v1115_v26 = vsub.f32 %v5200_v25, %v5433_v32 }
 0x1e1   : > { %4309 = vmatmul.mubr.bf16.gmra.mrb[12].mxu1 %v1268_v20  ;;  %v914_v60 = vpop.xlane.xlu0 %913  ;;  %v788_v57 = vpop.xlane.xlu1 %787  ;;  %v1178_v43 = vmul.f32 %v5295_v61, %v1142_v37  ;;  %v1245_v0 = vmax.f32 %v1213_v21, 0.0 }
 0x1e2   : > { %v4570_v19 = vpop.eup %4569  ;;  %v1050_v4 = vadd.f32 1e-05, %v1018_v51  ;;  %v955_v15 = vmul.f32 0.0078125, %v914_v60  ;;  %v5441_v13 = vmul.f32 0.0078125, %v788_v57 }
 0x1e3   : > { %v1214_v50 = vadd.f32 %v5305_v39, %v1178_v43  ;;  %v1143_v44 = vmul.f32 %v4570_v19, %v1111_v10 }
 0x1e4   : > { %4575 = vrsqrt.f32 %v1050_v4  ;;  %v1019_v14 = vsub.f32 %v955_v15, %v987_v59  ;;  %v988_v33 = vmul.f32 %v5441_v13, %v5441_v13  ;;  %v1116_v25 = vsub.f32 %v5212_v47, %v5441_v13 }
 0x1e5   : > { %v916_v63 = vpop.xlane.xlu1 %915  ;;  %v790_v9 = vpop.xlane.xlu0 %789  ;;  %v1246_v45 = vmax.f32 %v1214_v50, 0.0  ;;  %v1179_v27 = vmul.f32 %v5295_v61, %v1143_v44 }
 0x1e6   : > { %v4572_v24 = vpop.eup %4571  ;;  %v1051_v53 = vadd.f32 1e-05, %v1019_v14  ;;  %v956_v49 = vmul.f32 0.0078125, %v916_v63  ;;  %v5449_v56 = vmul.f32 0.0078125, %v790_v9 }
 0x1e7   : > { %v1269_v1 = vpack.c.bf16 %v1246_v45, %v1245_v0  ;;  %v1144_v48 = vmul.f32 %v4572_v24, %v1112_v62  ;;  %v1215_v16 = vadd.f32 %v5305_v39, %v1179_v27 }
 0x1e8   : > { %4577 = vrsqrt.f32 %v1051_v53  ;;  %v1020_v40 = vsub.f32 %v956_v49, %v988_v33  ;;  %v989_v8 = vmul.f32 %v5449_v56, %v5449_v56  ;;  %v1117_v13 = vsub.f32 %v5216_v55, %v5449_v56 }
 0x1e9   : > { %4312 = vmatprep.mubr.bf16.mxu1 %v1269_v1  ;;  %v918_v5 = vpop.xlane.xlu0 %917  ;;  %v792_v30 = vpop.xlane.xlu1 %791  ;;  %v1180_v29 = vmul.f32 %v5295_v61, %v1144_v48  ;;  %v1247_v10 = vmax.f32 %v1215_v16, 0.0 }
 0x1ea   : > { %v4574_v28 = vpop.eup %4573  ;;  %v1052_v18 = vadd.f32 1e-05, %v1020_v40  ;;  %v957_v42 = vmul.f32 0.0078125, %v918_v5  ;;  %v5457_v6 = vmul.f32 0.0078125, %v792_v30 }
 0x1eb   : > { %v1216_v20 = vadd.f32 %v5305_v39, %v1180_v29  ;;  %v1145_v37 = vmul.f32 %v4574_v28, %v1113_v35 }
 0x1ec   : > { %4579 = vrsqrt.f32 %v1052_v18  ;;  %v1021_v51 = vsub.f32 %v957_v42, %v989_v8  ;;  %v990_v19 = vmul.f32 %v5457_v6, %v5457_v6  ;;  %v1118_v55 = vsub.f32 %v5228_v11, %v5457_v6 }
 0x1ed   : > { %v920_v36 = vpop.xlane.xlu1 %919  ;;  %v794_v59 = vpop.xlane.xlu0 %793  ;;  %v1248_v60 = vmax.f32 %v1216_v20, 0.0  ;;  %v1181_v57 = vmul.f32 %v5295_v61, %v1145_v37 }
 0x1ee   : > { %v4576_v43 = vpop.eup %4575  ;;  %v1053_v21 = vadd.f32 1e-05, %v1021_v51  ;;  %v958_v4 = vmul.f32 0.0078125, %v920_v36  ;;  %v5465_v15 = vmul.f32 0.0078125, %v794_v59 }
 0x1ef   : > { %v1270_v50 = vpack.c.bf16 %v1248_v60, %v1247_v10  ;;  %v1146_v44 = vmul.f32 %v4576_v43, %v1114_v12  ;;  %v1217_v0 = vadd.f32 %v5305_v39, %v1181_v57 }
 0x1f0   : > { %4581 = vrsqrt.f32 %v1053_v21  ;;  %v1022_v14 = vsub.f32 %v958_v4, %v990_v19  ;;  %v991_v22 = vmul.f32 %v5465_v15, %v5465_v15  ;;  %v1119_v11 = vsub.f32 %v5232_v17, %v5465_v15 }
 0x1f1   : > { %4313 = vmatmul.mubr.bf16.gmra.mrb[16].mxu1 %v1270_v50  ;;  %v922_v62 = vpop.xlane.xlu0 %921  ;;  %v796_v63 = vpop.xlane.xlu1 %795  ;;  %v1182_v9 = vmul.f32 %v5295_v61, %v1146_v44  ;;  %v1249_v40 = vmax.f32 %v1217_v0, 0.0 }
 0x1f2   : > { %v4578_v45 = vpop.eup %4577  ;;  %v1054_v27 = vadd.f32 1e-05, %v1022_v14  ;;  %v959_v24 = vmul.f32 0.0078125, %v922_v62  ;;  %v5473_v53 = vmul.f32 0.0078125, %v796_v63 }
 0x1f3   : > { %v1218_v33 = vadd.f32 %v5305_v39, %v1182_v9  ;;  %v1147_v49 = vmul.f32 %v4578_v45, %v1115_v26 }
 0x1f4   : > { %4583 = vrsqrt.f32 %v1054_v27  ;;  %v1023_v1 = vsub.f32 %v959_v24, %v991_v22  ;;  %v992_v29 = vmul.f32 %v5473_v53, %v5473_v53 }
 0x1f5   : > { %v924_v32 = vpop.xlane.xlu1 %923  ;;  %v798_v48 = vpop.xlane.xlu0 %797  ;;  %v1250_v8 = vmax.f32 %v1218_v33, 0.0  ;;  %v1183_v35 = vmul.f32 %v5295_v61, %v1147_v49 }
 0x1f6   : > { %v4580_v5 = vpop.eup %4579  ;;  %v1055_v30 = vadd.f32 1e-05, %v1023_v1  ;;  %v960_v16 = vmul.f32 0.0078125, %v924_v32  ;;  %v5481_v28 = vmul.f32 0.0078125, %v798_v48 }
 0x1f7   : > { %v1271_v18 = vpack.c.bf16 %v1250_v8, %v1249_v40  ;;  %v1148_v42 = vmul.f32 %v4580_v5, %v1116_v25  ;;  %v1219_v36 = vadd.f32 %v5305_v39, %v1183_v35 }
 0x1f8   : > { %4585 = vrsqrt.f32 %v1055_v30  ;;  %v1024_v20 = vsub.f32 %v960_v16, %v992_v29  ;;  %v993_v47 = vmul.f32 %v5481_v28, %v5481_v28  ;;  %v1120_v30 = vsub.f32 %v5244_v52, %v5473_v53 }
 0x1f9   : > { %4316 = vmatprep.mubr.bf16.mxu1 %v1271_v18  ;;  %v926_v37 = vpop.xlane.xlu0 %925  ;;  %v800_v51 = vpop.xlane.xlu1 %799  ;;  %v1184_v12 = vmul.f32 %v5295_v61, %v1148_v42  ;;  %v1251_v50 = vmax.f32 %v1219_v36, 0.0 }
 0x1fa   : > { %v4582_v59 = vpop.eup %4581  ;;  %v1056_v10 = vadd.f32 1e-05, %v1024_v20  ;;  %v961_v60 = vmul.f32 0.0078125, %v926_v37  ;;  %v5489_v57 = vmul.f32 0.0078125, %v800_v51 }
 0x1fb   : > { %v1220_v43 = vadd.f32 %v5305_v39, %v1184_v12  ;;  %v1149_v21 = vmul.f32 %v4582_v59, %v1117_v13  ;;  %v1121_v12 = vsub.f32 %v5248_v2, %v5481_v28 }
 0x1fc   : > { %4587 = vrsqrt.f32 %v1056_v10  ;;  %v1025_v19 = vsub.f32 %v961_v60, %v993_v47  ;;  %v994_v62 = vmul.f32 %v5489_v57, %v5489_v57 }
 0x1fd   : > { %v928_v56 = vpop.xlane.xlu1 %927  ;;  %v802_v4 = vpop.xlane.xlu0 %801  ;;  %v1252_v44 = vmax.f32 %v1220_v43, 0.0  ;;  %v1185_v14 = vmul.f32 %v5295_v61, %v1149_v21  ;;  %v1122_v43 = vsub.f32 %v5256_v3, %v5489_v57 }
 0x1fe   : > { %v4584_v22 = vpop.eup %4583  ;;  %v1057_v26 = vadd.f32 1e-05, %v1025_v19  ;;  %v962_v63 = vmul.f32 0.0078125, %v928_v56  ;;  %v835_v9 = vmul.f32 0.0078125, %v802_v4 }
 0x1ff   : > { %v1272_v0 = vpack.c.bf16 %v1252_v44, %v1251_v50  ;;  %v1150_v45 = vmul.f32 %v4584_v22, %v1118_v55  ;;  %v1221_v1 = vadd.f32 %v5305_v39, %v1185_v14 }
 0x200   : > { %4589 = vrsqrt.f32 %v1057_v26  ;;  %v1026_v27 = vsub.f32 %v962_v63, %v994_v62  ;;  %v995_v24 = vmul.f32 %v835_v9, %v835_v9  ;;  %v1123_v4 = vsub.f32 %v5264_v7, %v835_v9 }
 0x201   : > { %4317 = vmatmul.mubr.bf16.gmra.mrb[20].mxu1 %v1272_v0  ;;  %v930_v6 = vpop.xlane.xlu0 %929  ;;  %v804_v33 = vpop.xlane.xlu1 %803  ;;  %v1186_v49 = vmul.f32 %v5295_v61, %v1150_v45  ;;  %v1253_v15 = vmax.f32 %v1221_v1, 0.0 }
 0x202   : > { %v4586_v25 = vpop.eup %4585  ;;  %v1058_v32 = vadd.f32 1e-05, %v1026_v27  ;;  %v963_v48 = vmul.f32 0.0078125, %v930_v6  ;;  %v836_v40 = vmul.f32 0.0078125, %v804_v33 }
 0x203   : > { %v1222_v8 = vadd.f32 %v5305_v39, %v1186_v49  ;;  %v1151_v35 = vmul.f32 %v4586_v25, %v1119_v11  ;;  %v5528_v49 = vld [vmem:[%s7154_s6 + $0x3] ss:$0 sm:$0xff] }
 0x204   : > { %4591 = vrsqrt.f32 %v1058_v32  ;;  %v1027_v5 = vsub.f32 %v963_v48, %v995_v24  ;;  %v996_v20 = vmul.f32 %v836_v40, %v836_v40  ;;  %v1124_v3 = vsub.f32 %v5272_v23, %v836_v40  ;;  %v4513_v23 = vld [vmem:[%s7151_s3] sm:$0xff]   ;;  %v4514_v32 = vld [vmem:[%s7151_s3 + $0x8] sm:$0xff]  }
 0x205   : > { %v932_v17 = vpop.xlane.xlu1 %931  ;;  %v1254_v29 = vmax.f32 %v1222_v8, 0.0  ;;  %v1187_v16 = vmul.f32 %v5295_v61, %v1151_v35  ;;  %4328 = vmatprep.subr.bf16.mxu1 %v4513_v23 }
 0x206   : > { %v4588_v18 = vpop.eup %4587  ;;  %v1059_v42 = vadd.f32 1e-05, %v1027_v5  ;;  %v964_v47 = vmul.f32 0.0078125, %v932_v17  ;;  %4329 = vmatpush3.bf16.msra.mxu1 %v4513_v23 }
 0x207   : > { %v1273_v13 = vpack.c.bf16 %v1254_v29, %v1253_v15  ;;  %v1152_v37 = vmul.f32 %v4588_v18, %v1120_v30  ;;  %v1223_v52 = vadd.f32 %v5305_v39, %v1187_v16  ;;  %4330 = vmatprep.subr.bf16.mxu1 %v4514_v32 }
 0x208   : > { %4593 = vrsqrt.f32 %v1059_v42  ;;  %v1028_v51 = vsub.f32 %v964_v47, %v996_v20 }
 0x209   : > { %4320 = vmatprep.mubr.bf16.mxu1 %v1273_v13  ;;  %v1188_v36 = vmul.f32 %v5295_v61, %v1152_v37  ;;  %v1255_v21 = vmax.f32 %v1223_v52, 0.0 }
 0x20a   : > { %v4590_v53 = vpop.eup %4589  ;;  %v1060_v59 = vadd.f32 1e-05, %v1028_v51  ;;  %4331 = vmatpush3.bf16.msra.mxu1 %v4514_v32 }
 0x20b   : > { %v1224_v10 = vadd.f32 %v5305_v39, %v1188_v36  ;;  %v1153_v60 = vmul.f32 %v4590_v53, %v1121_v12 }
 0x20c   : > { %4595 = vrsqrt.f32 %v1060_v59 }
 0x20d   : > { %v1256_v19 = vmax.f32 %v1224_v10, 0.0  ;;  %v1189_v55 = vmul.f32 %v5295_v61, %v1153_v60 }
 0x20e   : > { %v4592_v56 = vpop.eup %4591 }
 0x20f   : > { %v1274_v2 = vpack.c.bf16 %v1256_v19, %v1255_v21  ;;  %v1154_v28 = vmul.f32 %v4592_v56, %v1122_v43  ;;  %v1225_v44 = vadd.f32 %v5305_v39, %v1189_v55 }
 0x211   : > { %4321 = vmatmul.mubr.bf16.gmra.mrb[24].mxu1 %v1274_v2  ;;  %v1190_v50 = vmul.f32 %v5295_v61, %v1154_v28  ;;  %v1257_v57 = vmax.f32 %v1225_v44, 0.0 }
 0x212   : > { %v4594_v14 = vpop.eup %4593 }
 0x213   : > { %v1226_v22 = vadd.f32 %v5305_v39, %v1190_v50  ;;  %v1155_v26 = vmul.f32 %v4594_v14, %v1123_v4 }
 0x215   : > { %v1258_v62 = vmax.f32 %v1226_v22, 0.0  ;;  %v1191_v63 = vmul.f32 %v5295_v61, %v1155_v26 }
 0x216   : > { %v4596_v0 = vpop.eup %4595 }
 0x217   : > { %v1275_v45 = vpack.c.bf16 %v1258_v62, %v1257_v57  ;;  %v1156_v27 = vmul.f32 %v4596_v0, %v1124_v3  ;;  %v1227_v9 = vadd.f32 %v5305_v39, %v1191_v63 }
 0x219   : > { %4324 = vmatprep.mubr.bf16.mxu1 %v1275_v45  ;;  %v1192_v7 = vmul.f32 %v5295_v61, %v1156_v27  ;;  %v1259_v11 = vmax.f32 %v1227_v9, 0.0 }
 0x21b   : > { %v1228_v24 = vadd.f32 %v5305_v39, %v1192_v7 }
 0x21d   : > { %v1260_v6 = vmax.f32 %v1228_v24, 0.0 }
 0x21f   : > { %v1276_v33 = vpack.c.bf16 %v1260_v6, %v1259_v11 }
 0x221   : > { %4325 = vmatmul.mubr.bf16.gmra.mrb[28].mxu1 %v1276_v33 }
 0x284   : > { %v4298_v61 = vpop.f32.mrb[0].mxu1 }
 0x285   : > { %v5531_v1 = vadd.f32 %v4298_v61, %v5528_v49  ;;  %v1380_v39 = vpop.f32.mrb[1].mxu1 }
 0x286   : > { %v4299_v25 = vpop.f32.mrb[2].mxu1  ;;  %v5537_v48 = vadd.f32 %v5528_v49, %v1380_v39 }
 0x287   : > { %v5540_v40 = vadd.f32 %v4299_v25, %v5528_v49  ;;  %v1383_v8 = vpop.f32.mrb[3].mxu1  ;;  %v1516_v35 = vsel %vm1509_vm2, %v5531_v1, 0.0  ;;  %v1640_v15 = vmul.f32 %v5531_v1, %v5531_v1 }
 0x288   : > { %1517 = vadd.xlane.f32.xlu0 %v1516_v35  ;;  %v5545_v5 = vadd.f32 %v5528_v49, %v1383_v8  ;;  %v1510_v17 = vsel %vm1509_vm2, %v5537_v48, 0.0  ;;  %v1638_v42 = vmul.f32 %v5537_v48, %v5537_v48  ;;  %v4515_v8 = vld [vmem:[%s7151_s3 + $0x10] sm:$0xff]  }
 0x289   : > { %v1519_v30 = vsel %vm1509_vm2, %v5540_v40, 0.0  ;;  %v1641_v16 = vmul.f32 %v5540_v40, %v5540_v40  ;;  %v1676_v18 = vsel %vm1509_vm2, %v1640_v15, 0.0  ;;  %4332 = vmatprep.subr.bf16.mxu1 %v4515_v8 }
 0x28a   : > { %1520 = vadd.xlane.f32.xlu1 %v1519_v30  ;;  %v1513_v29 = vsel %vm1509_vm2, %v5545_v5, 0.0  ;;  %v1639_v47 = vmul.f32 %v5545_v5, %v5545_v5  ;;  %v1670_v13 = vsel %vm1509_vm2, %v1638_v42, 0.0  ;;  %4333 = vmatpush3.bf16.msra.mxu1 %v4515_v8 }
 0x28b   : > { %v1679_v20 = vsel %vm1509_vm2, %v1641_v16, 0.0 }
 0x28c   : > { %1511 = vadd.xlane.f32.xlu0 %v1510_v17  ;;  %v1673_v36 = vsel %vm1509_vm2, %v1639_v47, 0.0 }
 0x28e   : > { %1514 = vadd.xlane.f32.xlu1 %v1513_v29  ;;  %v4516_v29 = vld [vmem:[%s7151_s3 + $0x18] ss:$0 sps:$4 sm:$0x33]  }
 0x28f   : > { %4464 = vmatprep.subr.msk.bf16.mxu1 %vm2186_vm3, %v4516_v29 }
 0x290   : > { %1677 = vadd.xlane.f32.xlu0 %v1676_v18 }
 0x292   : > { %1680 = vadd.xlane.f32.xlu1 %v1679_v20 }
 0x294   : > { %v4302_v37 = vpop.f32.mrb[4].mxu1  ;;  %1671 = vadd.xlane.f32.xlu0 %v1670_v13  ;;  %v2188_v13 = vsel %vm2186_vm3, %v4516_v29, 0 }
 0x295   : > { %v5565_v51 = vadd.f32 %v4302_v37, %v5528_v49  ;;  %v1396_v12 = vpop.f32.mrb[5].mxu1  ;;  %4335 = vmatpush3.bf16.msra.mxu1 %v2188_v13 }
 0x296   : > { %v4303_v52 = vpop.f32.mrb[6].mxu1  ;;  %1674 = vadd.xlane.f32.xlu1 %v1673_v36  ;;  %v5569_v53 = vadd.f32 %v5528_v49, %v1396_v12 }
 0x297   : > { %v5572_v59 = vadd.f32 %v4303_v52, %v5528_v49  ;;  %v1399_v10 = vpop.f32.mrb[7].mxu1  ;;  %v1528_v60 = vsel %vm1509_vm2, %v5565_v51, 0.0  ;;  %v1644_v55 = vmul.f32 %v5565_v51, %v5565_v51 }
 0x298   : > { %1529 = vadd.xlane.f32.xlu0 %v1528_v60  ;;  %v5577_v43 = vadd.f32 %v5528_v49, %v1399_v10  ;;  %v1522_v19 = vsel %vm1509_vm2, %v5569_v53, 0.0  ;;  %v1642_v4 = vmul.f32 %v5569_v53, %v5569_v53 }
 0x299   : > { %v1531_v21 = vsel %vm1509_vm2, %v5572_v59, 0.0  ;;  %v1645_v2 = vmul.f32 %v5572_v59, %v5572_v59  ;;  %v1688_v28 = vsel %vm1509_vm2, %v1644_v55, 0.0 }
 0x29a   : > { %1532 = vadd.xlane.f32.xlu1 %v1531_v21  ;;  %v1525_v56 = vsel %vm1509_vm2, %v5577_v43, 0.0  ;;  %v1643_v44 = vmul.f32 %v5577_v43, %v5577_v43  ;;  %v1682_v14 = vsel %vm1509_vm2, %v1642_v4, 0.0 }
 0x29b   : > { %v1691_v50 = vsel %vm1509_vm2, %v1645_v2, 0.0 }
 0x29c   : > { %1523 = vadd.xlane.f32.xlu0 %v1522_v19  ;;  %v1685_v57 = vsel %vm1509_vm2, %v1643_v44, 0.0 }
 0x29e   : > { %1526 = vadd.xlane.f32.xlu1 %v1525_v56 }
 0x2a0   : > { %1689 = vadd.xlane.f32.xlu0 %v1688_v28 }
 0x2a2   : > { %1692 = vadd.xlane.f32.xlu1 %v1691_v50 }
 0x2a4   : > { %v4306_v22 = vpop.f32.mrb[8].mxu1  ;;  %1683 = vadd.xlane.f32.xlu0 %v1682_v14 }
 0x2a5   : > { %v5597_v26 = vadd.f32 %v4306_v22, %v5528_v49  ;;  %v1412_v3 = vpop.f32.mrb[9].mxu1 }
 0x2a6   : > { %v4307_v62 = vpop.f32.mrb[10].mxu1  ;;  %1686 = vadd.xlane.f32.xlu1 %v1685_v57  ;;  %v5601_v63 = vadd.f32 %v5528_v49, %v1412_v3 }
 0x2a7   : > { %v5604_v0 = vadd.f32 %v4307_v62, %v5528_v49  ;;  %v1415_v45 = vpop.f32.mrb[11].mxu1  ;;  %v1540_v27 = vsel %vm1509_vm2, %v5597_v26, 0.0  ;;  %v1648_v11 = vmul.f32 %v5597_v26, %v5597_v26 }
 0x2a8   : > { %1541 = vadd.xlane.f32.xlu0 %v1540_v27  ;;  %v5609_v7 = vadd.f32 %v5528_v49, %v1415_v45  ;;  %v1534_v24 = vsel %vm1509_vm2, %v5601_v63, 0.0  ;;  %v1646_v61 = vmul.f32 %v5601_v63, %v5601_v63 }
 0x2a9   : > { %v1543_v9 = vsel %vm1509_vm2, %v5604_v0, 0.0  ;;  %v1649_v33 = vmul.f32 %v5604_v0, %v5604_v0  ;;  %v1700_v23 = vsel %vm1509_vm2, %v1648_v11, 0.0 }
 0x2aa   : > { %1544 = vadd.xlane.f32.xlu1 %v1543_v9  ;;  %v1537_v6 = vsel %vm1509_vm2, %v5609_v7, 0.0  ;;  %v1647_v25 = vmul.f32 %v5609_v7, %v5609_v7  ;;  %v1694_v32 = vsel %vm1509_vm2, %v1646_v61, 0.0 }
 0x2ab   : > { %v1703_v39 = vsel %vm1509_vm2, %v1649_v33, 0.0 }
 0x2ac   : > { %1535 = vadd.xlane.f32.xlu0 %v1534_v24  ;;  %v1697_v15 = vsel %vm1509_vm2, %v1647_v25, 0.0 }
 0x2ae   : > { %1538 = vadd.xlane.f32.xlu1 %v1537_v6 }
 0x2b0   : > { %1701 = vadd.xlane.f32.xlu0 %v1700_v23 }
 0x2b2   : > { %1704 = vadd.xlane.f32.xlu1 %v1703_v39 }
 0x2b4   : > { %v4310_v35 = vpop.f32.mrb[12].mxu1  ;;  %1695 = vadd.xlane.f32.xlu0 %v1694_v32 }
 0x2b5   : > { %v5632_v30 = vadd.f32 %v4310_v35, %v5528_v49  ;;  %v1428_v17 = vpop.f32.mrb[13].mxu1 }
 0x2b6   : > { %v4311_v16 = vpop.f32.mrb[14].mxu1  ;;  %1698 = vadd.xlane.f32.xlu1 %v1697_v15  ;;  %v5639_v18 = vadd.f32 %v5528_v49, %v1428_v17 }
 0x2b7   : > { %v5642_v42 = vadd.f32 %v4311_v16, %v5528_v49  ;;  %v1431_v20 = vpop.f32.mrb[15].mxu1  ;;  %v1552_v47 = vsel %vm1509_vm2, %v5632_v30, 0.0  ;;  %v1652_v52 = vmul.f32 %v5632_v30, %v5632_v30 }
 0x2b8   : > { %1553 = vadd.xlane.f32.xlu0 %v1552_v47  ;;  %v5647_v37 = vadd.f32 %v5528_v49, %v1431_v20  ;;  %v1546_v36 = vsel %vm1509_vm2, %v5639_v18, 0.0  ;;  %v1650_v19 = vmul.f32 %v5639_v18, %v5639_v18 }
 0x2b9   : > { %v1555_v12 = vsel %vm1509_vm2, %v5642_v42, 0.0  ;;  %v1653_v60 = vmul.f32 %v5642_v42, %v5642_v42  ;;  %v1712_v21 = vsel %vm1509_vm2, %v1652_v52, 0.0 }
 0x2ba   : > { %1556 = vadd.xlane.f32.xlu1 %v1555_v12  ;;  %v1549_v10 = vsel %vm1509_vm2, %v5647_v37, 0.0  ;;  %v1651_v56 = vmul.f32 %v5647_v37, %v5647_v37  ;;  %v1706_v2 = vsel %vm1509_vm2, %v1650_v19, 0.0 }
 0x2bb   : > { %v1715_v55 = vsel %vm1509_vm2, %v1653_v60, 0.0 }
 0x2bc   : > { %1547 = vadd.xlane.f32.xlu0 %v1546_v36  ;;  %v1709_v44 = vsel %vm1509_vm2, %v1651_v56, 0.0 }
 0x2be   : > { %1550 = vadd.xlane.f32.xlu1 %v1549_v10 }
 0x2c0   : > { %1713 = vadd.xlane.f32.xlu0 %v1712_v21 }
 0x2c2   : > { %1716 = vadd.xlane.f32.xlu1 %v1715_v55 }
 0x2c4   : > { %v4314_v28 = vpop.f32.mrb[16].mxu1  ;;  %1707 = vadd.xlane.f32.xlu0 %v1706_v2 }
 0x2c5   : > { %v5667_v4 = vadd.f32 %v4314_v28, %v5528_v49  ;;  %v1444_v50 = vpop.f32.mrb[17].mxu1 }
 0x2c6   : > { %v4315_v14 = vpop.f32.mrb[18].mxu1  ;;  %1710 = vadd.xlane.f32.xlu1 %v1709_v44  ;;  %v5671_v22 = vadd.f32 %v5528_v49, %v1444_v50 }
 0x2c7   : > { %v5674_v3 = vadd.f32 %v4315_v14, %v5528_v49  ;;  %v1447_v57 = vpop.f32.mrb[19].mxu1  ;;  %v1564_v62 = vsel %vm1509_vm2, %v5667_v4, 0.0  ;;  %v1656_v24 = vmul.f32 %v5667_v4, %v5667_v4 }
 0x2c8   : > { %1565 = vadd.xlane.f32.xlu0 %v1564_v62  ;;  %v5679_v45 = vadd.f32 %v5528_v49, %v1447_v57  ;;  %v1558_v9 = vsel %vm1509_vm2, %v5671_v22, 0.0  ;;  %v1654_v23 = vmul.f32 %v5671_v22, %v5671_v22 }
 0x2c9   : > { %v1567_v27 = vsel %vm1509_vm2, %v5674_v3, 0.0  ;;  %v1657_v6 = vmul.f32 %v5674_v3, %v5674_v3  ;;  %v1724_v33 = vsel %vm1509_vm2, %v1656_v24, 0.0 }
 0x2ca   : > { %1568 = vadd.xlane.f32.xlu1 %v1567_v27  ;;  %v1561_v11 = vsel %vm1509_vm2, %v5679_v45, 0.0  ;;  %v1655_v39 = vmul.f32 %v5679_v45, %v5679_v45  ;;  %v1718_v25 = vsel %vm1509_vm2, %v1654_v23, 0.0 }
 0x2cb   : > { %v1727_v61 = vsel %vm1509_vm2, %v1657_v6, 0.0 }
 0x2cc   : > { %1559 = vadd.xlane.f32.xlu0 %v1558_v9  ;;  %v1721_v17 = vsel %vm1509_vm2, %v1655_v39, 0.0 }
 0x2ce   : > { %1562 = vadd.xlane.f32.xlu1 %v1561_v11 }
 0x2d0   : > { %1725 = vadd.xlane.f32.xlu0 %v1724_v33 }
 0x2d2   : > { %1728 = vadd.xlane.f32.xlu1 %v1727_v61 }
 0x2d4   : > { %v4318_v32 = vpop.f32.mrb[20].mxu1  ;;  %1719 = vadd.xlane.f32.xlu0 %v1718_v25 }
 0x2d5   : > { %v5699_v8 = vadd.f32 %v4318_v32, %v5528_v49  ;;  %v1460_v35 = vpop.f32.mrb[21].mxu1 }
 0x2d6   : > { %v4319_v15 = vpop.f32.mrb[22].mxu1  ;;  %1722 = vadd.xlane.f32.xlu1 %v1721_v17  ;;  %v5703_v29 = vadd.f32 %v5528_v49, %v1460_v35 }
 0x2d7   : > { %v5706_v16 = vadd.f32 %v4319_v15, %v5528_v49  ;;  %v1463_v20 = vpop.f32.mrb[23].mxu1  ;;  %v1576_v47 = vsel %vm1509_vm2, %v5699_v8, 0.0  ;;  %v1660_v52 = vmul.f32 %v5699_v8, %v5699_v8 }
 0x2d8   : > { %1577 = vadd.xlane.f32.xlu0 %v1576_v47  ;;  %v5711_v13 = vadd.f32 %v5528_v49, %v1463_v20  ;;  %v1570_v36 = vsel %vm1509_vm2, %v5703_v29, 0.0  ;;  %v1658_v19 = vmul.f32 %v5703_v29, %v5703_v29 }
 0x2d9   : > { %v1579_v12 = vsel %vm1509_vm2, %v5706_v16, 0.0  ;;  %v1661_v60 = vmul.f32 %v5706_v16, %v5706_v16  ;;  %v1736_v21 = vsel %vm1509_vm2, %v1660_v52, 0.0 }
 0x2da   : > { %1580 = vadd.xlane.f32.xlu1 %v1579_v12  ;;  %v1573_v10 = vsel %vm1509_vm2, %v5711_v13, 0.0  ;;  %v1659_v56 = vmul.f32 %v5711_v13, %v5711_v13  ;;  %v1730_v2 = vsel %vm1509_vm2, %v1658_v19, 0.0 }
 0x2db   : > { %v1739_v55 = vsel %vm1509_vm2, %v1661_v60, 0.0 }
 0x2dc   : > { %1571 = vadd.xlane.f32.xlu0 %v1570_v36  ;;  %v1733_v14 = vsel %vm1509_vm2, %v1659_v56, 0.0 }
 0x2de   : > { %1574 = vadd.xlane.f32.xlu1 %v1573_v10 }
 0x2e0   : > { %1737 = vadd.xlane.f32.xlu0 %v1736_v21 }
 0x2e2   : > { %1740 = vadd.xlane.f32.xlu1 %v1739_v55 }
 0x2e4   : > { %v4322_v28 = vpop.f32.mrb[24].mxu1  ;;  %1731 = vadd.xlane.f32.xlu0 %v1730_v2 }
 0x2e5   : > { %v5731_v50 = vadd.f32 %v4322_v28, %v5528_v49  ;;  %v1476_v44 = vpop.f32.mrb[25].mxu1 }
 0x2e6   : > { %v4323_v57 = vpop.f32.mrb[26].mxu1  ;;  %1734 = vadd.xlane.f32.xlu1 %v1733_v14  ;;  %v5735_v62 = vadd.f32 %v5528_v49, %v1476_v44 }
 0x2e7   : > { %v5738_v27 = vadd.f32 %v4323_v57, %v5528_v49  ;;  %v1479_v9 = vpop.f32.mrb[27].mxu1  ;;  %v1588_v24 = vsel %vm1509_vm2, %v5731_v50, 0.0  ;;  %v1664_v23 = vmul.f32 %v5731_v50, %v5731_v50 }
 0x2e8   : > { %1589 = vadd.xlane.f32.xlu0 %v1588_v24  ;;  %v5743_v11 = vadd.f32 %v5528_v49, %v1479_v9  ;;  %v1582_v33 = vsel %vm1509_vm2, %v5735_v62, 0.0  ;;  %v1662_v32 = vmul.f32 %v5735_v62, %v5735_v62 }
 0x2e9   : > { %v1591_v6 = vsel %vm1509_vm2, %v5738_v27, 0.0  ;;  %v1665_v39 = vmul.f32 %v5738_v27, %v5738_v27  ;;  %v1748_v25 = vsel %vm1509_vm2, %v1664_v23, 0.0 }
 0x2ea   : > { %1592 = vadd.xlane.f32.xlu1 %v1591_v6  ;;  %v1585_v61 = vsel %vm1509_vm2, %v5743_v11, 0.0  ;;  %v1663_v17 = vmul.f32 %v5743_v11, %v5743_v11  ;;  %v1742_v15 = vsel %vm1509_vm2, %v1662_v32, 0.0 }
 0x2eb   : > { %v1751_v35 = vsel %vm1509_vm2, %v1665_v39, 0.0 }
 0x2ec   : > { %1583 = vadd.xlane.f32.xlu0 %v1582_v33  ;;  %v1745_v36 = vsel %vm1509_vm2, %v1663_v17, 0.0 }
 0x2ee   : > { %1586 = vadd.xlane.f32.xlu1 %v1585_v61 }
 0x2f0   : > { %1749 = vadd.xlane.f32.xlu0 %v1748_v25 }
 0x2f2   : > { %1752 = vadd.xlane.f32.xlu1 %v1751_v35 }
 0x2f4   : > { %1743 = vadd.xlane.f32.xlu0 %v1742_v15  ;;  %v4326_v20 = vpop.f32.mrb[28].mxu1 }
 0x2f5   : > { %v5763_v47 = vadd.f32 %v4326_v20, %v5528_v49  ;;  %v1492_v12 = vpop.f32.mrb[29].mxu1 }
 0x2f6   : > { %1746 = vadd.xlane.f32.xlu1 %v1745_v36  ;;  %v4327_v52 = vpop.f32.mrb[30].mxu1  ;;  %v5767_v10 = vadd.f32 %v5528_v49, %v1492_v12 }
 0x2f7   : > { %v5770_v60 = vadd.f32 %v4327_v52, %v5528_v49  ;;  %v1495_v21 = vpop.f32.mrb[31].mxu1  ;;  %v1600_v19 = vsel %vm1509_vm2, %v5763_v47, 0.0  ;;  %v1668_v57 = vmul.f32 %v5763_v47, %v5763_v47 }
 0x2f8   : > { %1601 = vadd.xlane.f32.xlu0 %v1600_v19  ;;  %v5775_v55 = vadd.f32 %v5528_v49, %v1495_v21  ;;  %v1594_v2 = vsel %vm1509_vm2, %v5767_v10, 0.0  ;;  %v1666_v28 = vmul.f32 %v5767_v10, %v5767_v10 }
 0x2f9   : > { %v1603_v56 = vsel %vm1509_vm2, %v5770_v60, 0.0  ;;  %v1669_v24 = vmul.f32 %v5770_v60, %v5770_v60  ;;  %v1760_v6 = vsel %vm1509_vm2, %v1668_v57, 0.0 }
 0x2fa   : > { %1604 = vadd.xlane.f32.xlu1 %v1603_v56  ;;  %v1597_v44 = vsel %vm1509_vm2, %v5775_v55, 0.0  ;;  %v1667_v14 = vmul.f32 %v5775_v55, %v5775_v55  ;;  %v1754_v49 = vsel %vm1509_vm2, %v1666_v28, 0.0 }
 0x2fb   : > { %v1763_v33 = vsel %vm1509_vm2, %v1669_v24, 0.0 }
 0x2fc   : > { %1595 = vadd.xlane.f32.xlu0 %v1594_v2  ;;  %v1757_v9 = vsel %vm1509_vm2, %v1667_v14, 0.0 }
 0x2fe   : > { %1598 = vadd.xlane.f32.xlu1 %v1597_v44 }
 0x300   : > { %1755 = vadd.xlane.f32.xlu0 %v1754_v49 }
 0x302   : > { %1758 = vadd.xlane.f32.xlu1 %v1757_v9 }
 0x304   : > { %1761 = vadd.xlane.f32.xlu0 %v1760_v6 }
 0x306   : > { %1764 = vadd.xlane.f32.xlu1 %v1763_v33 }
 0x315   : > { %v1518_v23 = vpop.xlane.xlu0 %1517 }
 0x316   : > { %v1608_v25 = vmul.f32 0.01923077, %v1518_v23 }
 0x317   : > { %v1521_v61 = vpop.xlane.xlu1 %1520 }
 0x318   : > { %v1609_v35 = vmul.f32 0.01923077, %v1521_v61  ;;  %v1800_v15 = vmul.f32 %v1608_v25, %v1608_v25 }
 0x319   : > { %v1512_v39 = vpop.xlane.xlu0 %1511 }
 0x31a   : > { %v1606_v20 = vmul.f32 0.01923077, %v1512_v39  ;;  %v1801_v21 = vmul.f32 %v1609_v35, %v1609_v35 }
 0x31b   : > { %v1515_v32 = vpop.xlane.xlu1 %1514 }
 0x31c   : > { %v5795_v36 = vmul.f32 0.01923077, %v1515_v32  ;;  %v1798_v28 = vmul.f32 %v1606_v20, %v1606_v20 }
 0x31d   : > { %v1678_v17 = vpop.xlane.xlu0 %1677 }
 0x31e   : > { %v1768_v12 = vmul.f32 0.01923077, %v1678_v17  ;;  %v1799_v57 = vmul.f32 %v5795_v36, %v5795_v36 }
 0x31f   : > { %v1681_v52 = vpop.xlane.xlu1 %1680 }
 0x320   : > { %v1832_v19 = vsub.f32 %v1768_v12, %v1800_v15  ;;  %v1769_v56 = vmul.f32 0.01923077, %v1681_v52 }
 0x321   : > { %v1672_v2 = vpop.xlane.xlu0 %1671 }
 0x322   : > { %v1864_v44 = vadd.f32 1e-05, %v1832_v19  ;;  %v1833_v14 = vsub.f32 %v1769_v56, %v1801_v21  ;;  %v1766_v49 = vmul.f32 0.01923077, %v1672_v2  ;;  %v1928_v19 = vsub.f32 %v5531_v1, %v1608_v25 }
 0x323   : > { %v1675_v9 = vpop.xlane.xlu1 %1674 }
 0x324   : > { %4597 = vrsqrt.f32 %v1864_v44  ;;  %v1865_v24 = vadd.f32 1e-05, %v1833_v14  ;;  %v1830_v6 = vsub.f32 %v1766_v49, %v1798_v28  ;;  %v1767_v33 = vmul.f32 0.01923077, %v1675_v9 }
 0x325   : > { %v1530_v23 = vpop.xlane.xlu0 %1529  ;;  %v1929_v49 = vsub.f32 %v5540_v40, %v1609_v35  ;;  %v1927_v40 = vsub.f32 %v5545_v5, %v5795_v36 }
 0x326   : > { %4599 = vrsqrt.f32 %v1865_v24  ;;  %v1862_v61 = vadd.f32 1e-05, %v1830_v6  ;;  %v1831_v39 = vsub.f32 %v1767_v33, %v1799_v57  ;;  %v5799_v12 = vmul.f32 0.01923077, %v1530_v23  ;;  %v5814_v33 = vld [vmem:[%s7154_s6 + $0x4] ss:$0 sm:$0xff] }
 0x327   : > { %v1533_v32 = vpop.xlane.xlu1 %1532 }
 0x328   : > { %4601 = vrsqrt.f32 %v1862_v61  ;;  %v1863_v17 = vadd.f32 1e-05, %v1831_v39  ;;  %v5801_v21 = vmul.f32 0.01923077, %v1533_v32  ;;  %v1804_v28 = vmul.f32 %v5799_v12, %v5799_v12 }
 0x329   : > { %v1524_v15 = vpop.xlane.xlu0 %1523  ;;  %v1926_v61 = vsub.f32 %v5537_v48, %v1606_v20 }
 0x32a   : > { %4603 = vrsqrt.f32 %v1863_v17  ;;  %v5806_v44 = vmul.f32 0.01923077, %v1524_v15  ;;  %v1805_v1 = vmul.f32 %v5801_v21, %v5801_v21 }
 0x32b   : > { %v1527_v52 = vpop.xlane.xlu1 %1526 }
 0x32c   : > { %v5809_v9 = vmul.f32 0.01923077, %v1527_v52  ;;  %v1802_v17 = vmul.f32 %v5806_v44, %v5806_v44 }
 0x32d   : > { %v1690_v56 = vpop.xlane.xlu0 %1689 }
 0x32e   : > { %v4598_v2 = vpop.eup %4597  ;;  %v1772_v14 = vmul.f32 0.01923077, %v1690_v56 }
 0x32f   : > { %v1960_v57 = vmul.f32 %v4598_v2, %v1928_v19  ;;  %v1693_v24 = vpop.xlane.xlu1 %1692 }
 0x330   : > { %v4600_v6 = vpop.eup %4599  ;;  %v1836_v25 = vsub.f32 %v1772_v14, %v1804_v28  ;;  %v1773_v23 = vmul.f32 0.01923077, %v1693_v24  ;;  %v1803_v28 = vmul.f32 %v5809_v9, %v5809_v9  ;;  %v5830_v24 = vld [vmem:[%s7154_s6 + $0x5] ss:$0 sm:$0xff] }
 0x331   : > { %v1961_v35 = vmul.f32 %v4600_v6, %v1929_v49  ;;  %v1684_v39 = vpop.xlane.xlu0 %1683  ;;  %v1996_v56 = vmul.f32 %v5814_v33, %v1960_v57 }
 0x332   : > { %v4602_v32 = vpop.eup %4601  ;;  %v1868_v15 = vadd.f32 1e-05, %v1836_v25  ;;  %v1837_v52 = vsub.f32 %v1773_v23, %v1805_v1  ;;  %v1770_v19 = vmul.f32 0.01923077, %v1684_v39 }
 0x333   : > { %v1997_v2 = vmul.f32 %v5814_v33, %v1961_v35  ;;  %v1687_v48 = vpop.xlane.xlu1 %1686  ;;  %v1958_v20 = vmul.f32 %v4602_v32, %v1926_v61 }
 0x334   : > { %v4604_v14 = vpop.eup %4603  ;;  %4605 = vrsqrt.f32 %v1868_v15  ;;  %v1869_v5 = vadd.f32 1e-05, %v1837_v52  ;;  %v1834_v36 = vsub.f32 %v1770_v19, %v1802_v17  ;;  %v1771_v49 = vmul.f32 0.01923077, %v1687_v48 }
 0x335   : > { %v1542_v6 = vpop.xlane.xlu0 %1541  ;;  %v1959_v1 = vmul.f32 %v4604_v14, %v1927_v40  ;;  %v1994_v57 = vmul.f32 %v5814_v33, %v1958_v20  ;;  %v2033_v25 = vadd.f32 %v5830_v24, %v1997_v2  ;;  %v2032_v17 = vadd.f32 %v5830_v24, %v1996_v56 }
 0x336   : > { %4607 = vrsqrt.f32 %v1869_v5  ;;  %v1866_v23 = vadd.f32 1e-05, %v1834_v36  ;;  %v1835_v35 = vsub.f32 %v1771_v49, %v1803_v28  ;;  %v5838_v40 = vmul.f32 0.01923077, %v1542_v6 }
 0x337   : > { %v1545_v61 = vpop.xlane.xlu1 %1544  ;;  %v1995_v39 = vmul.f32 %v5814_v33, %v1959_v1  ;;  %v2030_v32 = vadd.f32 %v5830_v24, %v1994_v57  ;;  %v2065_v48 = vmax.f32 %v2033_v25, 0.0  ;;  %v2064_v5 = vmax.f32 %v2032_v17, 0.0 }
 0x338   : > { %4609 = vrsqrt.f32 %v1866_v23  ;;  %v1867_v15 = vadd.f32 1e-05, %v1835_v35  ;;  %v5840_v28 = vmul.f32 0.01923077, %v1545_v61  ;;  %v1932_v36 = vsub.f32 %v5565_v51, %v5799_v12 }
 0x339   : > { %v1536_v52 = vpop.xlane.xlu0 %1535  ;;  %v2031_v19 = vadd.f32 %v5830_v24, %v1995_v39  ;;  %v2062_v20 = vmax.f32 %v2030_v32, 0.0  ;;  %v1808_v57 = vmul.f32 %v5838_v40, %v5838_v40  ;;  %v2095_v35 = vpack.c.bf16 %v2065_v48, %v2064_v5 }
 0x33a   : > { %4611 = vrsqrt.f32 %v1867_v15  ;;  %v5846_v23 = vmul.f32 0.01923077, %v1536_v52  ;;  %v1933_v25 = vsub.f32 %v5572_v59, %v5801_v21  ;;  %v1809_v12 = vmul.f32 %v5840_v28, %v5840_v28 }
 0x33b   : > { %v1539_v2 = vpop.xlane.xlu1 %1538  ;;  %v2063_v14 = vmax.f32 %v2031_v19, 0.0  ;;  %v1930_v52 = vsub.f32 %v5569_v53, %v5806_v44  ;;  %v1931_v59 = vsub.f32 %v5577_v43, %v5809_v9 }
 0x33c   : > { %v5850_v39 = vmul.f32 0.01923077, %v1539_v2  ;;  %v1806_v2 = vmul.f32 %v5846_v23, %v5846_v23 }
 0x33d   : > { %v1702_v49 = vpop.xlane.xlu0 %1701  ;;  %v2094_v56 = vpack.c.bf16 %v2063_v14, %v2062_v20 }
 0x33e   : > { %v4606_v1 = vpop.eup %4605  ;;  %v1776_v6 = vmul.f32 0.01923077, %v1702_v49 }
 0x33f   : > { %4336 = vmatprep.mubr.msk.bf16.mxu1 %vm1509_vm2, %v2094_v56  ;;  %v1705_v61 = vpop.xlane.xlu1 %1704  ;;  %v1964_v32 = vmul.f32 %v4606_v1, %v1932_v36  ;;  %v1807_v36 = vmul.f32 %v5850_v39, %v5850_v39 }
 0x340   : > { %v4608_v51 = vpop.eup %4607  ;;  %v1840_v17 = vsub.f32 %v1776_v6, %v1808_v57  ;;  %v1777_v15 = vmul.f32 0.01923077, %v1705_v61  ;;  %4337 = vmatmul.mubr.msk.bf16.vlgmr.msra.gmra.mrb[32].mxu1 %vm1509_vm2, %v2095_v35 }
 0x341   : > { %v1696_v21 = vpop.xlane.xlu0 %1695  ;;  %v1965_v19 = vmul.f32 %v4608_v51, %v1933_v25  ;;  %v2000_v1 = vmul.f32 %v5814_v33, %v1964_v32 }
 0x342   : > { %v4610_v48 = vpop.eup %4609  ;;  %v1872_v20 = vadd.f32 1e-05, %v1840_v17  ;;  %v1841_v14 = vsub.f32 %v1777_v15, %v1809_v12  ;;  %v1774_v5 = vmul.f32 0.01923077, %v1696_v21 }
 0x343   : > { %v1699_v49 = vpop.xlane.xlu1 %1698  ;;  %v1962_v56 = vmul.f32 %v4610_v48, %v1930_v52  ;;  %v2001_v53 = vmul.f32 %v5814_v33, %v1965_v19  ;;  %v2036_v21 = vadd.f32 %v5830_v24, %v2000_v1 }
 0x344   : > { %v4612_v44 = vpop.eup %4611  ;;  %4613 = vrsqrt.f32 %v1872_v20  ;;  %v1873_v43 = vadd.f32 1e-05, %v1841_v14  ;;  %v1838_v9 = vsub.f32 %v1774_v5, %v1806_v2  ;;  %v1775_v57 = vmul.f32 0.01923077, %v1699_v49 }
 0x345   : > { %v1554_v6 = vpop.xlane.xlu0 %1553  ;;  %v1963_v35 = vmul.f32 %v4612_v44, %v1931_v59  ;;  %v1998_v25 = vmul.f32 %v5814_v33, %v1962_v56  ;;  %v2037_v12 = vadd.f32 %v5830_v24, %v2001_v53  ;;  %v2068_v49 = vmax.f32 %v2036_v21, 0.0 }
 0x346   : > { %4615 = vrsqrt.f32 %v1873_v43  ;;  %v1870_v61 = vadd.f32 1e-05, %v1838_v9  ;;  %v1839_v51 = vsub.f32 %v1775_v57, %v1807_v36  ;;  %v5872_v59 = vmul.f32 0.01923077, %v1554_v6 }
 0x347   : > { %v1557_v17 = vpop.xlane.xlu1 %1556  ;;  %v1999_v15 = vmul.f32 %v5814_v33, %v1963_v35  ;;  %v2034_v32 = vadd.f32 %v5830_v24, %v1998_v25  ;;  %v2069_v2 = vmax.f32 %v2037_v12, 0.0  ;;  %v1936_v56 = vsub.f32 %v5597_v26, %v5838_v40 }
 0x348   : > { %4617 = vrsqrt.f32 %v1870_v61  ;;  %v1871_v52 = vadd.f32 1e-05, %v1839_v51  ;;  %v5874_v36 = vmul.f32 0.01923077, %v1557_v17  ;;  %v1812_v1 = vmul.f32 %v5872_v59, %v5872_v59 }
 0x349   : > { %v1548_v19 = vpop.xlane.xlu0 %1547  ;;  %v2035_v48 = vadd.f32 %v5830_v24, %v1999_v15  ;;  %v2066_v14 = vmax.f32 %v2034_v32, 0.0  ;;  %v2097_v6 = vpack.c.bf16 %v2069_v2, %v2068_v49  ;;  %v1937_v35 = vsub.f32 %v5604_v0, %v5840_v28 }
 0x34a   : > { %4619 = vrsqrt.f32 %v1871_v52  ;;  %v5880_v9 = vmul.f32 0.01923077, %v1548_v19  ;;  %v1813_v40 = vmul.f32 %v5874_v36, %v5874_v36  ;;  %v1934_v15 = vsub.f32 %v5601_v63, %v5846_v23 }
 0x34b   : > { %v1551_v20 = vpop.xlane.xlu1 %1550  ;;  %v2067_v5 = vmax.f32 %v2035_v48, 0.0  ;;  %v1935_v0 = vsub.f32 %v5609_v7, %v5850_v39 }
 0x34c   : > { %v5884_v25 = vmul.f32 0.01923077, %v1551_v20  ;;  %v1810_v21 = vmul.f32 %v5880_v9, %v5880_v9 }
 0x34d   : > { %v1714_v53 = vpop.xlane.xlu0 %1713  ;;  %v2096_v44 = vpack.c.bf16 %v2067_v5, %v2066_v14 }
 0x34e   : > { %v4614_v43 = vpop.eup %4613  ;;  %v1780_v57 = vmul.f32 0.01923077, %v1714_v53  ;;  %v1811_v20 = vmul.f32 %v5884_v25, %v5884_v25 }
 0x34f   : > { %4340 = vmatprep.mubr.msk.bf16.mxu1 %vm1509_vm2, %v2096_v44  ;;  %v1717_v61 = vpop.xlane.xlu1 %1716  ;;  %v1968_v51 = vmul.f32 %v4614_v43, %v1936_v56 }
 0x350   : > { %v4616_v26 = vpop.eup %4615  ;;  %v1844_v12 = vsub.f32 %v1780_v57, %v1812_v1  ;;  %v1781_v17 = vmul.f32 0.01923077, %v1717_v61  ;;  %4341 = vmatmul.mubr.msk.bf16.gmra.mrb[36].mxu1 %vm1509_vm2, %v2097_v6 }
 0x351   : > { %v1708_v28 = vpop.xlane.xlu0 %1707  ;;  %v1969_v32 = vmul.f32 %v4616_v26, %v1937_v35  ;;  %v2004_v49 = vmul.f32 %v5814_v33, %v1968_v51 }
 0x352   : > { %v4618_v52 = vpop.eup %4617  ;;  %v1876_v19 = vadd.f32 1e-05, %v1844_v12  ;;  %v1845_v48 = vsub.f32 %v1781_v17, %v1813_v40  ;;  %v1778_v2 = vmul.f32 0.01923077, %v1708_v28 }
 0x353   : > { %v1711_v14 = vpop.xlane.xlu1 %1710  ;;  %v1966_v5 = vmul.f32 %v4618_v52, %v1934_v15  ;;  %v2005_v63 = vmul.f32 %v5814_v33, %v1969_v32  ;;  %v2040_v40 = vadd.f32 %v5830_v24, %v2004_v49 }
 0x354   : > { %v4620_v23 = vpop.eup %4619  ;;  %4621 = vrsqrt.f32 %v1876_v19  ;;  %v1877_v7 = vadd.f32 1e-05, %v1845_v48  ;;  %v1842_v39 = vsub.f32 %v1778_v2, %v1810_v21  ;;  %v1779_v56 = vmul.f32 0.01923077, %v1711_v14 }
 0x355   : > { %v1566_v53 = vpop.xlane.xlu0 %1565  ;;  %v1967_v44 = vmul.f32 %v4620_v23, %v1935_v0  ;;  %v2002_v43 = vmul.f32 %v5814_v33, %v1966_v5  ;;  %v2041_v6 = vadd.f32 %v5830_v24, %v2005_v63  ;;  %v2072_v19 = vmax.f32 %v2040_v40, 0.0 }
 0x356   : > { %4623 = vrsqrt.f32 %v1877_v7  ;;  %v1874_v1 = vadd.f32 1e-05, %v1842_v39  ;;  %v1843_v57 = vsub.f32 %v1779_v56, %v1811_v20  ;;  %v5906_v15 = vmul.f32 0.01923077, %v1566_v53 }
 0x357   : > { %v1569_v35 = vpop.xlane.xlu1 %1568  ;;  %v2003_v61 = vmul.f32 %v5814_v33, %v1967_v44  ;;  %v2038_v51 = vadd.f32 %v5830_v24, %v2002_v43  ;;  %v2073_v0 = vmax.f32 %v2041_v6, 0.0  ;;  %v1940_v48 = vsub.f32 %v5632_v30, %v5872_v59 }
 0x358   : > { %4625 = vrsqrt.f32 %v1874_v1  ;;  %v1875_v26 = vadd.f32 1e-05, %v1843_v57  ;;  %v5908_v21 = vmul.f32 0.01923077, %v1569_v35  ;;  %v1816_v5 = vmul.f32 %v5906_v15, %v5906_v15 }
 0x359   : > { %v1560_v12 = vpop.xlane.xlu0 %1559  ;;  %v2039_v17 = vadd.f32 %v5830_v24, %v2003_v61  ;;  %v2070_v32 = vmax.f32 %v2038_v51, 0.0  ;;  %v2099_v23 = vpack.c.bf16 %v2073_v0, %v2072_v19  ;;  %v1941_v7 = vsub.f32 %v5642_v42, %v5874_v36 }
 0x35a   : > { %4627 = vrsqrt.f32 %v1875_v26  ;;  %v5914_v49 = vmul.f32 0.01923077, %v1560_v12  ;;  %v1817_v59 = vmul.f32 %v5908_v21, %v5908_v21  ;;  %v1938_v1 = vsub.f32 %v5639_v18, %v5880_v9 }
 0x35b   : > { %v1563_v28 = vpop.xlane.xlu1 %1562  ;;  %v2071_v52 = vmax.f32 %v2039_v17, 0.0  ;;  %v1939_v42 = vsub.f32 %v5647_v37, %v5884_v25 }
 0x35c   : > { %v5918_v39 = vmul.f32 0.01923077, %v1563_v28  ;;  %v1814_v35 = vmul.f32 %v5914_v49, %v5914_v49 }
 0x35d   : > { %v1726_v2 = vpop.xlane.xlu0 %1725  ;;  %v2098_v20 = vpack.c.bf16 %v2071_v52, %v2070_v32 }
 0x35e   : > { %v4622_v14 = vpop.eup %4621  ;;  %v1784_v63 = vmul.f32 0.01923077, %v1726_v2  ;;  %v1815_v40 = vmul.f32 %v5918_v39, %v5918_v39 }
 0x35f   : > { %4344 = vmatprep.mubr.msk.bf16.mxu1 %vm1509_vm2, %v2098_v20  ;;  %v1729_v56 = vpop.xlane.xlu1 %1728  ;;  %v1972_v53 = vmul.f32 %v4622_v14, %v1940_v48 }
 0x360   : > { %v4624_v30 = vpop.eup %4623  ;;  %v1848_v44 = vsub.f32 %v1784_v63, %v1816_v5  ;;  %v1785_v43 = vmul.f32 0.01923077, %v1729_v56  ;;  %4345 = vmatmul.mubr.msk.bf16.gmra.mrb[40].mxu1 %vm1509_vm2, %v2099_v23 }
 0x361   : > { %v1720_v36 = vpop.xlane.xlu0 %1719  ;;  %v1973_v57 = vmul.f32 %v4624_v30, %v1941_v7  ;;  %v2008_v0 = vmul.f32 %v5814_v33, %v1972_v53 }
 0x362   : > { %v4626_v6 = vpop.eup %4625  ;;  %v1880_v61 = vadd.f32 1e-05, %v1848_v44  ;;  %v1849_v51 = vsub.f32 %v1785_v43, %v1817_v59  ;;  %v1782_v26 = vmul.f32 0.01923077, %v1720_v36 }
 0x363   : > { %v1723_v12 = vpop.xlane.xlu1 %1722  ;;  %v1970_v17 = vmul.f32 %v4626_v6, %v1938_v1  ;;  %v2009_v18 = vmul.f32 %v5814_v33, %v1973_v57  ;;  %v2044_v7 = vadd.f32 %v5830_v24, %v2008_v0  ;;  %v1944_v57 = vsub.f32 %v5667_v4, %v5906_v15 }
 0x364   : > { %v4628_v9 = vpop.eup %4627  ;;  %4629 = vrsqrt.f32 %v1880_v61  ;;  %v1881_v37 = vadd.f32 1e-05, %v1849_v51  ;;  %v1846_v25 = vsub.f32 %v1782_v26, %v1814_v35  ;;  %v1783_v28 = vmul.f32 0.01923077, %v1723_v12 }
 0x365   : > { %v1578_v32 = vpop.xlane.xlu0 %1577  ;;  %v1971_v52 = vmul.f32 %v4628_v9, %v1939_v42  ;;  %v2006_v19 = vmul.f32 %v5814_v33, %v1970_v17  ;;  %v2045_v20 = vadd.f32 %v5830_v24, %v2009_v18  ;;  %v2076_v36 = vmax.f32 %v2044_v7, 0.0 }
 0x366   : > { %4631 = vrsqrt.f32 %v1881_v37  ;;  %v1878_v48 = vadd.f32 1e-05, %v1846_v25  ;;  %v1847_v2 = vsub.f32 %v1783_v28, %v1815_v40  ;;  %v5940_v30 = vmul.f32 0.01923077, %v1578_v32 }
 0x367   : > { %v1581_v14 = vpop.xlane.xlu1 %1580  ;;  %v2007_v5 = vmul.f32 %v5814_v33, %v1971_v52  ;;  %v2042_v63 = vadd.f32 %v5830_v24, %v2006_v19  ;;  %v2077_v59 = vmax.f32 %v2045_v20, 0.0  ;;  %v1945_v17 = vsub.f32 %v5674_v3, %v5908_v21 }
 0x368   : > { %4633 = vrsqrt.f32 %v1878_v48  ;;  %v1879_v23 = vadd.f32 1e-05, %v1847_v2  ;;  %v5942_v42 = vmul.f32 0.01923077, %v1581_v14  ;;  %v1820_v51 = vmul.f32 %v5940_v30, %v5940_v30 }
 0x369   : > { %v1572_v56 = vpop.xlane.xlu0 %1571  ;;  %v2043_v53 = vadd.f32 %v5830_v24, %v2007_v5  ;;  %v2074_v43 = vmax.f32 %v2042_v63, 0.0  ;;  %v2101_v12 = vpack.c.bf16 %v2077_v59, %v2076_v36  ;;  %v1942_v28 = vsub.f32 %v5671_v22, %v5914_v49 }
 0x36a   : > { %4635 = vrsqrt.f32 %v1879_v23  ;;  %v5948_v26 = vmul.f32 0.01923077, %v1572_v56  ;;  %v1821_v15 = vmul.f32 %v5942_v42, %v5942_v42  ;;  %v1943_v3 = vsub.f32 %v5679_v45, %v5918_v39 }
 0x36b   : > { %v1575_v44 = vpop.xlane.xlu1 %1574  ;;  %v2075_v1 = vmax.f32 %v2043_v53, 0.0 }
 0x36c   : > { %v5952_v0 = vmul.f32 0.01923077, %v1575_v44  ;;  %v1818_v19 = vmul.f32 %v5948_v26, %v5948_v26 }
 0x36d   : > { %v1738_v6 = vpop.xlane.xlu0 %1737  ;;  %v2100_v35 = vpack.c.bf16 %v2075_v1, %v2074_v43 }
 0x36e   : > { %v4630_v61 = vpop.eup %4629  ;;  %v1788_v40 = vmul.f32 0.01923077, %v1738_v6  ;;  %v1819_v14 = vmul.f32 %v5952_v0, %v5952_v0 }
 0x36f   : > { %4348 = vmatprep.mubr.msk.bf16.mxu1 %vm1509_vm2, %v2100_v35  ;;  %v1741_v18 = vpop.xlane.xlu1 %1740  ;;  %v1976_v9 = vmul.f32 %v4630_v61, %v1944_v57 }
 0x370   : > { %v4632_v4 = vpop.eup %4631  ;;  %v1852_v37 = vsub.f32 %v1788_v40, %v1820_v51  ;;  %v1789_v25 = vmul.f32 0.01923077, %v1741_v18  ;;  %4349 = vmatmul.mubr.msk.bf16.gmra.mrb[44].mxu1 %vm1509_vm2, %v2101_v12 }
 0x371   : > { %v1732_v21 = vpop.xlane.xlu0 %1731  ;;  %v1977_v32 = vmul.f32 %v4632_v4, %v1945_v17  ;;  %v2012_v23 = vmul.f32 %v5814_v33, %v1976_v9 }
 0x372   : > { %v4634_v52 = vpop.eup %4633  ;;  %v1884_v48 = vadd.f32 1e-05, %v1852_v37  ;;  %v1853_v2 = vsub.f32 %v1789_v25, %v1821_v15  ;;  %v1786_v20 = vmul.f32 0.01923077, %v1732_v21  ;;  %v1948_v25 = vsub.f32 %v5699_v8, %v5940_v30 }
 0x373   : > { %v1735_v5 = vpop.xlane.xlu1 %1734  ;;  %v1974_v63 = vmul.f32 %v4634_v52, %v1942_v28  ;;  %v2013_v22 = vmul.f32 %v5814_v33, %v1977_v32  ;;  %v2048_v61 = vadd.f32 %v5830_v24, %v2012_v23 }
 0x374   : > { %v4636_v49 = vpop.eup %4635  ;;  %4637 = vrsqrt.f32 %v1884_v48  ;;  %v1885_v45 = vadd.f32 1e-05, %v1853_v2  ;;  %v1850_v39 = vsub.f32 %v1786_v20, %v1818_v19  ;;  %v1787_v7 = vmul.f32 0.01923077, %v1735_v5 }
 0x375   : > { %v1590_v56 = vpop.xlane.xlu0 %1589  ;;  %v1975_v53 = vmul.f32 %v4636_v49, %v1943_v3  ;;  %v2010_v59 = vmul.f32 %v5814_v33, %v1974_v63  ;;  %v2049_v1 = vadd.f32 %v5830_v24, %v2013_v22  ;;  %v2080_v37 = vmax.f32 %v2048_v61, 0.0 }
 0x376   : > { %4639 = vrsqrt.f32 %v1885_v45  ;;  %v1882_v44 = vadd.f32 1e-05, %v1850_v39  ;;  %v1851_v43 = vsub.f32 %v1787_v7, %v1819_v14  ;;  %v5974_v12 = vmul.f32 0.01923077, %v1590_v56 }
 0x377   : > { %v1593_v36 = vpop.xlane.xlu1 %1592  ;;  %v2011_v57 = vmul.f32 %v5814_v33, %v1975_v53  ;;  %v2046_v6 = vadd.f32 %v5830_v24, %v2010_v59  ;;  %v2081_v17 = vmax.f32 %v2049_v1, 0.0  ;;  %v1949_v2 = vsub.f32 %v5706_v16, %v5942_v42 }
 0x378   : > { %4641 = vrsqrt.f32 %v1882_v44  ;;  %v1883_v35 = vadd.f32 1e-05, %v1851_v43  ;;  %v5976_v15 = vmul.f32 0.01923077, %v1593_v36  ;;  %v1824_v32 = vmul.f32 %v5974_v12, %v5974_v12 }
 0x379   : > { %v1584_v51 = vpop.xlane.xlu0 %1583  ;;  %v2047_v40 = vadd.f32 %v5830_v24, %v2011_v57  ;;  %v2078_v9 = vmax.f32 %v2046_v6, 0.0  ;;  %v2103_v48 = vpack.c.bf16 %v2081_v17, %v2080_v37  ;;  %v1946_v22 = vsub.f32 %v5703_v29, %v5948_v26 }
 0x37a   : > { %4643 = vrsqrt.f32 %v1883_v35  ;;  %v5982_v52 = vmul.f32 0.01923077, %v1584_v51  ;;  %v1825_v30 = vmul.f32 %v5976_v15, %v5976_v15  ;;  %v1947_v16 = vsub.f32 %v5711_v13, %v5952_v0 }
 0x37b   : > { %v1587_v18 = vpop.xlane.xlu1 %1586  ;;  %v2079_v4 = vmax.f32 %v2047_v40, 0.0 }
 0x37c   : > { %v5986_v20 = vmul.f32 0.01923077, %v1587_v18  ;;  %v1822_v39 = vmul.f32 %v5982_v52, %v5982_v52 }
 0x37d   : > { %v1750_v28 = vpop.xlane.xlu0 %1749  ;;  %v2102_v3 = vpack.c.bf16 %v2079_v4, %v2078_v9 }
 0x37e   : > { %v4638_v21 = vpop.eup %4637  ;;  %v1792_v19 = vmul.f32 0.01923077, %v1750_v28  ;;  %v1823_v59 = vmul.f32 %v5986_v20, %v5986_v20 }
 0x37f   : > { %4352 = vmatprep.mubr.msk.bf16.mxu1 %vm1509_vm2, %v2102_v3  ;;  %v1753_v14 = vpop.xlane.xlu1 %1752  ;;  %v1980_v5 = vmul.f32 %v4638_v21, %v1948_v25 }
 0x380   : > { %v4640_v8 = vpop.eup %4639  ;;  %v1856_v63 = vsub.f32 %v1792_v19, %v1824_v32  ;;  %v1793_v23 = vmul.f32 0.01923077, %v1753_v14  ;;  %4353 = vmatmul.mubr.msk.bf16.gmra.mrb[48].mxu1 %vm1509_vm2, %v2103_v48 }
 0x381   : > { %v1744_v42 = vpop.xlane.xlu0 %1743  ;;  %v1981_v49 = vmul.f32 %v4640_v8, %v1949_v2  ;;  %v2016_v1 = vmul.f32 %v5814_v33, %v1980_v5  ;;  %v1952_v5 = vsub.f32 %v5731_v50, %v5974_v12 }
 0x382   : > { %v4642_v45 = vpop.eup %4641  ;;  %v1888_v7 = vadd.f32 1e-05, %v1856_v63  ;;  %v1857_v56 = vsub.f32 %v1793_v23, %v1825_v30  ;;  %v1790_v53 = vmul.f32 0.01923077, %v1744_v42 }
 0x383   : > { %v1747_v44 = vpop.xlane.xlu1 %1746  ;;  %v1978_v43 = vmul.f32 %v4642_v45, %v1946_v22  ;;  %v2017_v29 = vmul.f32 %v5814_v33, %v1981_v49  ;;  %v2052_v37 = vadd.f32 %v5830_v24, %v2016_v1  ;;  %v1953_v49 = vsub.f32 %v5738_v27, %v5976_v15 }
 0x384   : > { %v4644_v26 = vpop.eup %4643  ;;  %4645 = vrsqrt.f32 %v1888_v7  ;;  %v1889_v13 = vadd.f32 1e-05, %v1857_v56  ;;  %v1854_v0 = vsub.f32 %v1790_v53, %v1822_v39  ;;  %v1791_v36 = vmul.f32 0.01923077, %v1747_v44 }
 0x385   : > { %v1602_v57 = vpop.xlane.xlu0 %1601  ;;  %v1979_v6 = vmul.f32 %v4644_v26, %v1947_v16  ;;  %v2014_v35 = vmul.f32 %v5814_v33, %v1978_v43  ;;  %v2053_v40 = vadd.f32 %v5830_v24, %v2017_v29  ;;  %v2084_v14 = vmax.f32 %v2052_v37, 0.0 }
 0x386   : > { %4647 = vrsqrt.f32 %v1889_v13  ;;  %v1886_v61 = vadd.f32 1e-05, %v1854_v0  ;;  %v1855_v51 = vsub.f32 %v1791_v36, %v1823_v59  ;;  %v6014_v23 = vmul.f32 0.01923077, %v1602_v57 }
 0x387   : > { %v1605_v17 = vpop.xlane.xlu1 %1604  ;;  %v2015_v18 = vmul.f32 %v5814_v33, %v1979_v6  ;;  %v2050_v9 = vadd.f32 %v5830_v24, %v2014_v35  ;;  %v2085_v21 = vmax.f32 %v2053_v40, 0.0  ;;  %v1950_v59 = vsub.f32 %v5735_v62, %v5982_v52 }
 0x388   : > { %4649 = vrsqrt.f32 %v1886_v61  ;;  %v1887_v4 = vadd.f32 1e-05, %v1855_v51  ;;  %v6020_v45 = vmul.f32 0.01923077, %v1605_v17  ;;  %v1951_v27 = vsub.f32 %v5743_v11, %v5986_v20 }
 0x389   : > { %v1596_v25 = vpop.xlane.xlu0 %1595  ;;  %v2051_v28 = vadd.f32 %v5830_v24, %v2015_v18  ;;  %v2082_v19 = vmax.f32 %v2050_v9, 0.0  ;;  %v2105_v42 = vpack.c.bf16 %v2085_v21, %v2084_v14  ;;  %v1828_v1 = vmul.f32 %v6014_v23, %v6014_v23 }
 0x38a   : > { %4651 = vrsqrt.f32 %v1887_v4  ;;  %v6008_v3 = vmul.f32 0.01923077, %v1596_v25  ;;  %v1829_v0 = vmul.f32 %v6020_v45, %v6020_v45 }
 0x38b   : > { %v1599_v32 = vpop.xlane.xlu1 %1598  ;;  %v2083_v48 = vmax.f32 %v2051_v28, 0.0 }
 0x38c   : > { %v6010_v2 = vmul.f32 0.01923077, %v1599_v32  ;;  %v1826_v22 = vmul.f32 %v6008_v3, %v6008_v3  ;;  %v1954_v14 = vsub.f32 %v5767_v10, %v6008_v3  ;;  %v1957_v10 = vsub.f32 %v5770_v60, %v6020_v45 }
 0x38d   : > { %v1756_v8 = vpop.xlane.xlu0 %1755  ;;  %v2104_v30 = vpack.c.bf16 %v2083_v48, %v2082_v19 }
 0x38e   : > { %v4646_v63 = vpop.eup %4645  ;;  %v1794_v16 = vmul.f32 0.01923077, %v1756_v8  ;;  %v1827_v12 = vmul.f32 %v6010_v2, %v6010_v2 }
 0x38f   : > { %4356 = vmatprep.mubr.msk.bf16.mxu1 %vm1509_vm2, %v2104_v30  ;;  %v1759_v39 = vpop.xlane.xlu1 %1758  ;;  %v1984_v7 = vmul.f32 %v4646_v63, %v1952_v5  ;;  %v1955_v63 = vsub.f32 %v5775_v55, %v6010_v2 }
 0x390   : > { %v4648_v50 = vpop.eup %4647  ;;  %v1858_v56 = vsub.f32 %v1794_v16, %v1826_v22  ;;  %v1795_v53 = vmul.f32 0.01923077, %v1759_v39  ;;  %4357 = vmatmul.mubr.msk.bf16.gmra.mrb[52].mxu1 %vm1509_vm2, %v2105_v42  ;;  %v1956_v42 = vsub.f32 %v5763_v47, %v6014_v23 }
 0x391   : > { %v1762_v15 = vpop.xlane.xlu0 %1761  ;;  %v1985_v44 = vmul.f32 %v4648_v50, %v1953_v49  ;;  %v2020_v6 = vmul.f32 %v5814_v33, %v1984_v7 }
 0x392   : > { %v4650_v43 = vpop.eup %4649  ;;  %v1890_v29 = vadd.f32 1e-05, %v1858_v56  ;;  %v1859_v26 = vsub.f32 %v1795_v53, %v1827_v12  ;;  %v1796_v13 = vmul.f32 0.01923077, %v1762_v15 }
 0x393   : > { %v1765_v36 = vpop.xlane.xlu1 %1764  ;;  %v1982_v57 = vmul.f32 %v4650_v43, %v1950_v59  ;;  %v2021_v62 = vmul.f32 %v5814_v33, %v1985_v44  ;;  %v2056_v25 = vadd.f32 %v5830_v24, %v2020_v6 }
 0x394   : > { %v4652_v52 = vpop.eup %4651  ;;  %4653 = vrsqrt.f32 %v1890_v29  ;;  %v1891_v11 = vadd.f32 1e-05, %v1859_v26  ;;  %v1860_v20 = vsub.f32 %v1796_v13, %v1828_v1  ;;  %v1797_v35 = vmul.f32 0.01923077, %v1765_v36  ;;  %v4517_v1 = vld [vmem:[%s7152_s4] sm:$0xff]   ;;  %v4520_v29 = vld [vmem:[%s7152_s4 + $0x18] sm:$0xff]  }
 0x395   : > { %v1983_v61 = vmul.f32 %v4652_v52, %v1951_v27  ;;  %v2018_v51 = vmul.f32 %v5814_v33, %v1982_v57  ;;  %v2057_v18 = vadd.f32 %v5830_v24, %v2021_v62  ;;  %v2088_v48 = vmax.f32 %v2056_v25, 0.0  ;;  %4368 = vmatprep.subr.bf16.mxu0 %v4517_v1  ;;  %v4521_v26 = vld [vmem:[%s7152_s4 + $0x20] sm:$0xff]  }
 0x396   : > { %4655 = vrsqrt.f32 %v1891_v11  ;;  %v1892_v40 = vadd.f32 1e-05, %v1860_v20  ;;  %v1861_v17 = vsub.f32 %v1797_v35, %v1829_v0  ;;  %4369 = vmatpush3.bf16.msra.mxu0 %v4517_v1  ;;  %v6080_v0 = vld [vmem:[%s7154_s6 + $0x6] ss:$0 sm:$0xff]  ;;  %v4522_v35 = vld [vmem:[%s7152_s4 + $0x28] sm:$0xff]  }
 0x397   : > { %v2019_v9 = vmul.f32 %v5814_v33, %v1983_v61  ;;  %v2054_v4 = vadd.f32 %v5830_v24, %v2018_v51  ;;  %v2089_v21 = vmax.f32 %v2057_v18, 0.0 }
 0x398   : > { %4657 = vrsqrt.f32 %v1892_v40  ;;  %v1893_v37 = vadd.f32 1e-05, %v1861_v17 }
 0x399   : > { %v2055_v28 = vadd.f32 %v5830_v24, %v2019_v9  ;;  %v2086_v32 = vmax.f32 %v2054_v4, 0.0  ;;  %v2107_v30 = vpack.c.bf16 %v2089_v21, %v2088_v48 }
 0x39a   : > { %4659 = vrsqrt.f32 %v1893_v37 }
 0x39b   : > { %v2087_v19 = vmax.f32 %v2055_v28, 0.0 }
 0x39d   : > { %v2106_v5 = vpack.c.bf16 %v2087_v19, %v2086_v32  ;;  %v7181_v19 = vld [vmem:[#allocation2_spill] sm:$0xff] }
 0x39e   : > { %v4654_v8 = vpop.eup %4653 }
 0x39f   : > { %4360 = vmatprep.mubr.msk.bf16.mxu1 %vm1509_vm2, %v2106_v5  ;;  %v1986_v22 = vmul.f32 %v4654_v8, %v1954_v14 }
 0x3a0   : > { %v4656_v16 = vpop.eup %4655  ;;  %4361 = vmatmul.mubr.msk.bf16.gmra.mrb[56].mxu1 %vm1509_vm2, %v2107_v30 }
 0x3a1   : > { %v1987_v49 = vmul.f32 %v4656_v16, %v1955_v63  ;;  %v2022_v39 = vmul.f32 %v5814_v33, %v1986_v22  ;;  %v7182_v63 = vld [vmem:[#allocation5_spill] sm:$0xff] }
 0x3a2   : > { %v4658_v7 = vpop.eup %4657 }
 0x3a3   : > { %v2023_v3 = vmul.f32 %v5814_v33, %v1987_v49  ;;  %v2058_v55 = vadd.f32 %v5830_v24, %v2022_v39  ;;  %v1988_v2 = vmul.f32 %v4658_v7, %v1956_v42  ;;  %v7183_v49 = vld [vmem:[#allocation3_spill] sm:$0xff] }
 0x3a4   : > { %v4660_v50 = vpop.eup %4659 }
 0x3a5   : > { %v2059_v12 = vadd.f32 %v5830_v24, %v2023_v3  ;;  %v1989_v56 = vmul.f32 %v4660_v50, %v1957_v10  ;;  %v2024_v53 = vmul.f32 %v5814_v33, %v1988_v2  ;;  %v2090_v59 = vmax.f32 %v2058_v55, 0.0  ;;  %v7184_v3 = vld [vmem:[#allocation6_spill] sm:$0xff]  ;;  %v7185_v50 = vld [vmem:[#allocation4_spill] sm:$0xff] }
 0x3a7   : > { %v2091_v47 = vmax.f32 %v2059_v12, 0.0  ;;  %v2025_v23 = vmul.f32 %v5814_v33, %v1989_v56  ;;  %v2060_v27 = vadd.f32 %v5830_v24, %v2024_v53  ;;  %v4518_v33 = vld [vmem:[%s7152_s4 + $0x8] sm:$0xff]  }
 0x3a8   : > { %4370 = vmatprep.subr.bf16.mxu0 %v4518_v33 }
 0x3a9   : > { %v2108_v15 = vpack.c.bf16 %v2091_v47, %v2090_v59  ;;  %v2061_v60 = vadd.f32 %v5830_v24, %v2025_v23  ;;  %v2092_v45 = vmax.f32 %v2060_v27, 0.0  ;;  %4371 = vmatpush3.bf16.msra.mxu0 %v4518_v33  ;;  %v4519_v24 = vld [vmem:[%s7152_s4 + $0x10] sm:$0xff]   ;;  %v4524_v33 = vld [vmem:[%s7152_s4 + $0x38] sm:$0xff]  }
 0x3aa   : > { %4372 = vmatprep.subr.bf16.mxu0 %v4519_v24  ;;  %v4523_v23 = vld [vmem:[%s7152_s4 + $0x30] sm:$0xff]  }
 0x3ab   : > { %4364 = vmatprep.mubr.msk.bf16.mxu1 %vm1509_vm2, %v2108_v15  ;;  %v2093_v44 = vmax.f32 %v2061_v60, 0.0 }
 0x3ad   : > { %v2109_v43 = vpack.c.bf16 %v2093_v44, %v2092_v45  ;;  %4373 = vmatpush3.bf16.msra.mxu0 %v4519_v24  ;;  %v7186_v45 = vld [vmem:[#allocation9_spill] sm:$0xff]  ;;  %v7187_v24 = vld [vmem:[#allocation7_spill] sm:$0xff] }
 0x3ae   : > { %4374 = vmatprep.subr.bf16.mxu0 %v4520_v29 }
 0x3af   : > { %4365 = vmatmul.mubr.msk.bf16.gmra.mrb[60].mxu1 %vm1509_vm2, %v2109_v43 }
 0x3b1   : > { %4375 = vmatpush3.bf16.msra.mxu0 %v4520_v29 }
 0x3b2   : > { %4376 = vmatprep.subr.bf16.mxu0 %v4521_v26 }
 0x3b5   : > { %4377 = vmatpush3.bf16.msra.mxu0 %v4521_v26 }
 0x3b6   : > { %4378 = vmatprep.subr.bf16.mxu0 %v4522_v35 }
 0x3b9   : > { %4379 = vmatpush3.bf16.msra.mxu0 %v4522_v35 }
 0x3ba   : > { %4380 = vmatprep.subr.bf16.mxu0 %v4523_v23 }
 0x3bd   : > { %4381 = vmatpush3.bf16.msra.mxu0 %v4523_v23 }
 0x3be   : > { %4382 = vmatprep.subr.bf16.mxu0 %v4524_v33 }
 0x3c1   : > { %4383 = vmatpush3.bf16.msra.mxu0 %v4524_v33 }
 0x413   : > { %v4338_v13 = vpop.f32.mrb[32].mxu1 }
 0x414   : > { %v2233_v36 = vadd.f32 %v4338_v13, %v5018_v38  ;;  %v2224_v57 = vpop.f32.mrb[33].mxu1 }
 0x415   : > { %v2225_v6 = vadd.f32 %v2224_v57, %v5004_v31  ;;  %v4339_v62 = vpop.f32.mrb[34].mxu1 }
 0x416   : > { %v6085_v52 = vadd.f32 %v6080_v0, %v2233_v36  ;;  %v2236_v11 = vadd.f32 %v4339_v62, %v5023_v41  ;;  %v2227_v20 = vpop.f32.mrb[35].mxu1  ;;  %v7188_v36 = vld [vmem:[#allocation10_spill] sm:$0xff]  ;;  %v7189_v62 = vld [vmem:[#allocation8_spill] sm:$0xff] }
 0x417   : > { %v2228_v61 = vadd.f32 %v2227_v20, %v5010_v34  ;;  %v6097_v31 = vadd.f32 %v6080_v0, %v2225_v6 }
 0x418   : > { %v6093_v51 = vadd.f32 %v6080_v0, %v2236_v11  ;;  %2394 = vadd.xlane.f32.xlu0 %v6085_v52  ;;  %v2488_v34 = vmul.f32 %v6085_v52, %v6085_v52 }
 0x419   : > { %v6101_v38 = vadd.f32 %v6080_v0, %v2228_v61  ;;  %v2486_v40 = vmul.f32 %v6097_v31, %v6097_v31 }
 0x41a   : > { %2396 = vadd.xlane.f32.xlu1 %v6093_v51  ;;  %v2489_v41 = vmul.f32 %v6093_v51, %v6093_v51 }
 0x41b   : > { %v2487_v4 = vmul.f32 %v6101_v38, %v6101_v38 }
 0x41c   : > { %2390 = vadd.xlane.f32.xlu0 %v6097_v31 }
 0x41e   : > { %2392 = vadd.xlane.f32.xlu1 %v6101_v38 }
 0x420   : > { %2522 = vadd.xlane.f32.xlu0 %v2488_v34 }
 0x422   : > { %2524 = vadd.xlane.f32.xlu1 %v2489_v41 }
 0x423   : > { %v4342_v17 = vpop.f32.mrb[36].mxu1 }
 0x424   : > { %v2249_v18 = vadd.f32 %v4342_v17, %v5050_v54  ;;  %2518 = vadd.xlane.f32.xlu0 %v2486_v40  ;;  %v2240_v9 = vpop.f32.mrb[37].mxu1 }
 0x425   : > { %v2241_v37 = vadd.f32 %v2240_v9, %v5034_v46  ;;  %v4343_v25 = vpop.f32.mrb[38].mxu1 }
 0x426   : > { %v6116_v28 = vadd.f32 %v6080_v0, %v2249_v18  ;;  %v2252_v21 = vadd.f32 %v4343_v25, %v5058_v58  ;;  %2520 = vadd.xlane.f32.xlu1 %v2487_v4  ;;  %v2243_v32 = vpop.f32.mrb[39].mxu1  ;;  %v7190_v18 = vld [vmem:[#allocation13_spill] sm:$0xff]  ;;  %v7191_v25 = vld [vmem:[#allocation11_spill] sm:$0xff] }
 0x427   : > { %v2244_v48 = vadd.f32 %v2243_v32, %v7181_v19  ;;  %v6125_v54 = vadd.f32 %v6080_v0, %v2241_v37 }
 0x428   : > { %v6121_v14 = vadd.f32 %v6080_v0, %v2252_v21  ;;  %2402 = vadd.xlane.f32.xlu0 %v6116_v28  ;;  %v2492_v58 = vmul.f32 %v6116_v28, %v6116_v28 }
 0x429   : > { %v6129_v46 = vadd.f32 %v6080_v0, %v2244_v48  ;;  %v2490_v8 = vmul.f32 %v6125_v54, %v6125_v54  ;;  %v7192_v48 = vld [vmem:[#allocation14_spill] sm:$0xff] }
 0x42a   : > { %2404 = vadd.xlane.f32.xlu1 %v6121_v14  ;;  %v2493_v5 = vmul.f32 %v6121_v14, %v6121_v14 }
 0x42b   : > { %v2491_v42 = vmul.f32 %v6129_v46, %v6129_v46 }
 0x42c   : > { %2398 = vadd.xlane.f32.xlu0 %v6125_v54 }
 0x42e   : > { %2400 = vadd.xlane.f32.xlu1 %v6129_v46 }
 0x430   : > { %2530 = vadd.xlane.f32.xlu0 %v2492_v58 }
 0x432   : > { %2532 = vadd.xlane.f32.xlu1 %v2493_v5 }
 0x433   : > { %v4346_v30 = vpop.f32.mrb[40].mxu1 }
 0x434   : > { %v2265_v22 = vadd.f32 %v4346_v30, %v7182_v63  ;;  %2526 = vadd.xlane.f32.xlu0 %v2490_v8  ;;  %v2256_v16 = vpop.f32.mrb[41].mxu1  ;;  %v7193_v8 = vld [vmem:[#allocation12_spill] sm:$0xff] }
 0x435   : > { %v2257_v39 = vadd.f32 %v2256_v16, %v7183_v49  ;;  %v4347_v7 = vpop.f32.mrb[42].mxu1 }
 0x436   : > { %v6144_v10 = vadd.f32 %v6080_v0, %v2265_v22  ;;  %v2268_v55 = vadd.f32 %v4347_v7, %v7184_v3  ;;  %2528 = vadd.xlane.f32.xlu1 %v2491_v42  ;;  %v2259_v2 = vpop.f32.mrb[43].mxu1  ;;  %v7194_v3 = vld [vmem:[#allocation17_spill] sm:$0xff] }
 0x437   : > { %v2260_v12 = vadd.f32 %v2259_v2, %v7185_v50  ;;  %v6153_v53 = vadd.f32 %v6080_v0, %v2257_v39 }
 0x438   : > { %v6149_v56 = vadd.f32 %v6080_v0, %v2268_v55  ;;  %2410 = vadd.xlane.f32.xlu0 %v6144_v10  ;;  %v2496_v47 = vmul.f32 %v6144_v10, %v6144_v10 }
 0x439   : > { %v6157_v59 = vadd.f32 %v6080_v0, %v2260_v12  ;;  %v2494_v15 = vmul.f32 %v6153_v53, %v6153_v53  ;;  %v7195_v12 = vld [vmem:[#allocation15_spill] sm:$0xff] }
 0x43a   : > { %2412 = vadd.xlane.f32.xlu1 %v6149_v56  ;;  %v2497_v27 = vmul.f32 %v6149_v56, %v6149_v56 }
 0x43b   : > { %v2495_v1 = vmul.f32 %v6157_v59, %v6157_v59 }
 0x43c   : > { %2406 = vadd.xlane.f32.xlu0 %v6153_v53 }
 0x43e   : > { %2408 = vadd.xlane.f32.xlu1 %v6157_v59 }
 0x440   : > { %2538 = vadd.xlane.f32.xlu0 %v2496_v47 }
 0x442   : > { %2540 = vadd.xlane.f32.xlu1 %v2497_v27 }
 0x443   : > { %v4350_v60 = vpop.f32.mrb[44].mxu1 }
 0x444   : > { %v2281_v44 = vadd.f32 %v4350_v60, %v7186_v45  ;;  %2534 = vadd.xlane.f32.xlu0 %v2494_v15  ;;  %v2272_v43 = vpop.f32.mrb[45].mxu1  ;;  %v7196_v15 = vld [vmem:[#allocation18_spill] sm:$0xff] }
 0x445   : > { %v2273_v29 = vadd.f32 %v2272_v43, %v7187_v24  ;;  %v4351_v26 = vpop.f32.mrb[46].mxu1 }
 0x446   : > { %v6178_v13 = vadd.f32 %v6080_v0, %v2281_v44  ;;  %v2284_v57 = vadd.f32 %v4351_v26, %v7188_v36  ;;  %2536 = vadd.xlane.f32.xlu1 %v2495_v1  ;;  %v2275_v6 = vpop.f32.mrb[47].mxu1  ;;  %v7197_v44 = vld [vmem:[#allocation16_spill] sm:$0xff] }
 0x447   : > { %v2276_v11 = vadd.f32 %v2275_v6, %v7189_v62  ;;  %v6187_v35 = vadd.f32 %v6080_v0, %v2273_v29  ;;  %v7198_v6 = vld [vmem:[#allocation21_spill] sm:$0xff] }
 0x448   : > { %v6183_v20 = vadd.f32 %v6080_v0, %v2284_v57  ;;  %2418 = vadd.xlane.f32.xlu0 %v6178_v13  ;;  %v2500_v34 = vmul.f32 %v6178_v13, %v6178_v13 }
 0x449   : > { %v6191_v61 = vadd.f32 %v6080_v0, %v2276_v11  ;;  %v2498_v40 = vmul.f32 %v6187_v35, %v6187_v35 }
 0x44a   : > { %2420 = vadd.xlane.f32.xlu1 %v6183_v20  ;;  %v2501_v41 = vmul.f32 %v6183_v20, %v6183_v20 }
 0x44b   : > { %v2499_v37 = vmul.f32 %v6191_v61, %v6191_v61 }
 0x44c   : > { %2414 = vadd.xlane.f32.xlu0 %v6187_v35 }
 0x44e   : > { %2416 = vadd.xlane.f32.xlu1 %v6191_v61 }
 0x450   : > { %2546 = vadd.xlane.f32.xlu0 %v2500_v34 }
 0x452   : > { %2548 = vadd.xlane.f32.xlu1 %v2501_v41  ;;  %v7199_v41 = vld [vmem:[#allocation19_spill] sm:$0xff] }
 0x453   : > { %v4354_v17 = vpop.f32.mrb[48].mxu1 }
 0x454   : > { %v2297_v9 = vadd.f32 %v4354_v17, %v7190_v18  ;;  %2542 = vadd.xlane.f32.xlu0 %v2498_v40  ;;  %v2288_v4 = vpop.f32.mrb[49].mxu1 }
 0x455   : > { %v2289_v21 = vadd.f32 %v2288_v4, %v7191_v25  ;;  %v4355_v32 = vpop.f32.mrb[50].mxu1  ;;  %v7201_v25 = vld [vmem:[#allocation20_spill] sm:$0xff] }
 0x456   : > { %v6206_v19 = vadd.f32 %v6080_v0, %v2297_v9  ;;  %v2300_v58 = vadd.f32 %v4355_v32, %v7192_v48  ;;  %2544 = vadd.xlane.f32.xlu1 %v2499_v37  ;;  %v2291_v5 = vpop.f32.mrb[51].mxu1  ;;  %v7200_v9 = vld [vmem:[#allocation22_spill] sm:$0xff] }
 0x457   : > { %v2292_v30 = vadd.f32 %v2291_v5, %v7193_v8  ;;  %v6215_v22 = vadd.f32 %v6080_v0, %v2289_v21 }
 0x458   : > { %v6211_v63 = vadd.f32 %v6080_v0, %v2300_v58  ;;  %2426 = vadd.xlane.f32.xlu0 %v6206_v19  ;;  %v2504_v42 = vmul.f32 %v6206_v19, %v6206_v19 }
 0x459   : > { %v6219_v16 = vadd.f32 %v6080_v0, %v2292_v30  ;;  %v2502_v39 = vmul.f32 %v6215_v22, %v6215_v22 }
 0x45a   : > { %2428 = vadd.xlane.f32.xlu1 %v6211_v63  ;;  %v2505_v49 = vmul.f32 %v6211_v63, %v6211_v63 }
 0x45b   : > { %v2503_v50 = vmul.f32 %v6219_v16, %v6219_v16 }
 0x45c   : > { %2422 = vadd.xlane.f32.xlu0 %v6215_v22 }
 0x45e   : > { %2424 = vadd.xlane.f32.xlu1 %v6219_v16 }
 0x460   : > { %2554 = vadd.xlane.f32.xlu0 %v2504_v42 }
 0x462   : > { %2556 = vadd.xlane.f32.xlu1 %v2505_v49  ;;  %v7202_v49 = vld [vmem:[#allocation25_spill] sm:$0xff] }
 0x463   : > { %v4358_v7 = vpop.f32.mrb[52].mxu1 }
 0x464   : > { %v2313_v55 = vadd.f32 %v4358_v7, %v7194_v3  ;;  %2550 = vadd.xlane.f32.xlu0 %v2502_v39  ;;  %v2304_v2 = vpop.f32.mrb[53].mxu1  ;;  %v7203_v3 = vld [vmem:[#allocation23_spill] sm:$0xff] }
 0x465   : > { %v2305_v47 = vadd.f32 %v2304_v2, %v7195_v12  ;;  %v4359_v23 = vpop.f32.mrb[54].mxu1 }
 0x466   : > { %v6234_v27 = vadd.f32 %v6080_v0, %v2313_v55  ;;  %v2316_v60 = vadd.f32 %v4359_v23, %v7196_v15  ;;  %2552 = vadd.xlane.f32.xlu1 %v2503_v50  ;;  %v2307_v45 = vpop.f32.mrb[55].mxu1 }
 0x467   : > { %v2308_v43 = vadd.f32 %v2307_v45, %v7197_v44  ;;  %v6243_v33 = vadd.f32 %v6080_v0, %v2305_v47  ;;  %v7204_v47 = vld [vmem:[#allocation26_spill] sm:$0xff] }
 0x468   : > { %v6239_v1 = vadd.f32 %v6080_v0, %v2316_v60  ;;  %2434 = vadd.xlane.f32.xlu0 %v6234_v27  ;;  %v2508_v29 = vmul.f32 %v6234_v27, %v6234_v27  ;;  %v7205_v60 = vld [vmem:[#allocation24_spill] sm:$0xff] }
 0x469   : > { %v6247_v24 = vadd.f32 %v6080_v0, %v2308_v43  ;;  %v2506_v36 = vmul.f32 %v6243_v33, %v6243_v33 }
 0x46a   : > { %2436 = vadd.xlane.f32.xlu1 %v6239_v1  ;;  %v2509_v26 = vmul.f32 %v6239_v1, %v6239_v1 }
 0x46b   : > { %v2507_v34 = vmul.f32 %v6247_v24, %v6247_v24 }
 0x46c   : > { %2430 = vadd.xlane.f32.xlu0 %v6243_v33 }
 0x46e   : > { %2432 = vadd.xlane.f32.xlu1 %v6247_v24 }
 0x470   : > { %2562 = vadd.xlane.f32.xlu0 %v2508_v29 }
 0x472   : > { %2564 = vadd.xlane.f32.xlu1 %v2509_v26 }
 0x473   : > { %v4362_v57 = vpop.f32.mrb[56].mxu1 }
 0x474   : > { %v2329_v62 = vadd.f32 %v4362_v57, %v7198_v6  ;;  %2558 = vadd.xlane.f32.xlu0 %v2506_v36  ;;  %v2320_v11 = vpop.f32.mrb[57].mxu1 }
 0x475   : > { %v2321_v40 = vadd.f32 %v2320_v11, %v7199_v41  ;;  %v4363_v17 = vpop.f32.mrb[58].mxu1 }
 0x476   : > { %v6262_v18 = vadd.f32 %v6080_v0, %v2329_v62  ;;  %v2332_v4 = vadd.f32 %v4363_v17, %v7200_v9  ;;  %2560 = vadd.xlane.f32.xlu1 %v2507_v34  ;;  %v2323_v37 = vpop.f32.mrb[59].mxu1 }
 0x477   : > { %v2324_v21 = vadd.f32 %v2323_v37, %v7201_v25  ;;  %v6271_v48 = vadd.f32 %v6080_v0, %v2321_v40 }
 0x478   : > { %v6267_v32 = vadd.f32 %v6080_v0, %v2332_v4  ;;  %2442 = vadd.xlane.f32.xlu0 %v6262_v18  ;;  %v2512_v5 = vmul.f32 %v6262_v18, %v6262_v18 }
 0x479   : > { %v6275_v58 = vadd.f32 %v6080_v0, %v2324_v21  ;;  %v2510_v42 = vmul.f32 %v6271_v48, %v6271_v48 }
 0x47a   : > { %2444 = vadd.xlane.f32.xlu1 %v6267_v32  ;;  %v2513_v8 = vmul.f32 %v6267_v32, %v6267_v32 }
 0x47b   : > { %v2511_v50 = vmul.f32 %v6275_v58, %v6275_v58 }
 0x47c   : > { %2438 = vadd.xlane.f32.xlu0 %v6271_v48 }
 0x47e   : > { %2440 = vadd.xlane.f32.xlu1 %v6275_v58 }
 0x480   : > { %2570 = vadd.xlane.f32.xlu0 %v2512_v5 }
 0x482   : > { %2572 = vadd.xlane.f32.xlu1 %v2513_v8  ;;  %v4366_v30 = vpop.f32.mrb[60].mxu1 }
 0x483   : > { %v2345_v39 = vadd.f32 %v4366_v30, %v7202_v49  ;;  %v2336_v7 = vpop.f32.mrb[61].mxu1 }
 0x484   : > { %v2337_v55 = vadd.f32 %v2336_v7, %v7203_v3  ;;  %2566 = vadd.xlane.f32.xlu0 %v2510_v42  ;;  %v4367_v2 = vpop.f32.mrb[62].mxu1 }
 0x485   : > { %v6290_v12 = vadd.f32 %v6080_v0, %v2345_v39  ;;  %v2348_v23 = vadd.f32 %v4367_v2, %v7204_v47  ;;  %v2339_v15 = vpop.f32.mrb[63].mxu1 }
 0x486   : > { %v2340_v45 = vadd.f32 %v2339_v15, %v7205_v60  ;;  %2568 = vadd.xlane.f32.xlu1 %v2511_v50  ;;  %v6299_v43 = vadd.f32 %v6080_v0, %v2337_v55 }
 0x487   : > { %v6295_v44 = vadd.f32 %v6080_v0, %v2348_v23  ;;  %v2516_v57 = vmul.f32 %v6290_v12, %v6290_v12 }
 0x488   : > { %2450 = vadd.xlane.f32.xlu0 %v6290_v12  ;;  %v6303_v29 = vadd.f32 %v6080_v0, %v2340_v45  ;;  %v2514_v26 = vmul.f32 %v6299_v43, %v6299_v43 }
 0x489   : > { %v2517_v0 = vmul.f32 %v6295_v44, %v6295_v44 }
 0x48a   : > { %2452 = vadd.xlane.f32.xlu1 %v6295_v44  ;;  %v2515_v36 = vmul.f32 %v6303_v29, %v6303_v29 }
 0x48c   : > { %2446 = vadd.xlane.f32.xlu0 %v6299_v43 }
 0x48e   : > { %2448 = vadd.xlane.f32.xlu1 %v6303_v29 }
 0x490   : > { %2574 = vadd.xlane.f32.xlu0 %v2514_v26 }
 0x492   : > { %2576 = vadd.xlane.f32.xlu1 %v2515_v36 }
 0x494   : > { %2578 = vadd.xlane.f32.xlu0 %v2516_v57 }
 0x496   : > { %2580 = vadd.xlane.f32.xlu1 %v2517_v0 }
 0x4a5   : > { %v2395_v6 = vpop.xlane.xlu0 %2394 }
 0x4a6   : > { %v2456_v34 = vmul.f32 0.0078125, %v2395_v6 }
 0x4a7   : > { %v2397_v62 = vpop.xlane.xlu1 %2396 }
 0x4a8   : > { %v2457_v40 = vmul.f32 0.0078125, %v2397_v62  ;;  %v2616_v9 = vmul.f32 %v2456_v34, %v2456_v34 }
 0x4a9   : > { %v2391_v11 = vpop.xlane.xlu0 %2390 }
 0x4aa   : > { %v2454_v4 = vmul.f32 0.0078125, %v2391_v11  ;;  %v2617_v5 = vmul.f32 %v2457_v40, %v2457_v40  ;;  %v2744_v11 = vsub.f32 %v6085_v52, %v2456_v34  ;;  %v6336_v34 = vld [vmem:[%s7154_s6 + $0x7] ss:$0 sm:$0xff] }
 0x4ab   : > { %v2393_v41 = vpop.xlane.xlu1 %2392 }
 0x4ac   : > { %v6315_v25 = vmul.f32 0.0078125, %v2393_v41  ;;  %v2614_v49 = vmul.f32 %v2454_v4, %v2454_v4 }
 0x4ad   : > { %v2523_v17 = vpop.xlane.xlu0 %2522 }
 0x4ae   : > { %v2584_v37 = vmul.f32 0.0078125, %v2523_v17  ;;  %v2615_v55 = vmul.f32 %v6315_v25, %v6315_v25 }
 0x4af   : > { %v2525_v21 = vpop.xlane.xlu1 %2524 }
 0x4b0   : > { %v2648_v8 = vsub.f32 %v2584_v37, %v2616_v9  ;;  %v2585_v30 = vmul.f32 0.0078125, %v2525_v21 }
 0x4b1   : > { %v2519_v42 = vpop.xlane.xlu0 %2518 }
 0x4b2   : > { %v2680_v39 = vadd.f32 1e-05, %v2648_v8  ;;  %v2649_v7 = vsub.f32 %v2585_v30, %v2617_v5  ;;  %v2582_v3 = vmul.f32 0.0078125, %v2519_v42  ;;  %v2745_v5 = vsub.f32 %v6093_v51, %v2457_v40 }
 0x4b3   : > { %v2521_v2 = vpop.xlane.xlu1 %2520  ;;  %v2743_v51 = vsub.f32 %v6101_v38, %v6315_v25 }
 0x4b4   : > { %4661 = vrsqrt.f32 %v2680_v39  ;;  %v2681_v50 = vadd.f32 1e-05, %v2649_v7  ;;  %v2646_v47 = vsub.f32 %v2582_v3, %v2614_v49  ;;  %v2583_v23 = vmul.f32 0.0078125, %v2521_v2 }
 0x4b5   : > { %v2403_v15 = vpop.xlane.xlu0 %2402  ;;  %v2742_v3 = vsub.f32 %v6097_v31, %v2454_v4 }
 0x4b6   : > { %4663 = vrsqrt.f32 %v2681_v50  ;;  %v2678_v60 = vadd.f32 1e-05, %v2646_v47  ;;  %v2647_v45 = vsub.f32 %v2583_v23, %v2615_v55  ;;  %v6319_v0 = vmul.f32 0.0078125, %v2403_v15 }
 0x4b7   : > { %v2405_v26 = vpop.xlane.xlu1 %2404 }
 0x4b8   : > { %4665 = vrsqrt.f32 %v2678_v60  ;;  %v2679_v36 = vadd.f32 1e-05, %v2647_v45  ;;  %v6321_v62 = vmul.f32 0.0078125, %v2405_v26  ;;  %v2620_v9 = vmul.f32 %v6319_v0, %v6319_v0 }
 0x4b9   : > { %v2399_v57 = vpop.xlane.xlu0 %2398 }
 0x4ba   : > { %4667 = vrsqrt.f32 %v2679_v36  ;;  %v6326_v37 = vmul.f32 0.0078125, %v2399_v57  ;;  %v2621_v39 = vmul.f32 %v6321_v62, %v6321_v62 }
 0x4bb   : > { %v2401_v6 = vpop.xlane.xlu1 %2400 }
 0x4bc   : > { %v6329_v30 = vmul.f32 0.0078125, %v2401_v6  ;;  %v2618_v50 = vmul.f32 %v6326_v37, %v6326_v37 }
 0x4bd   : > { %v2531_v41 = vpop.xlane.xlu0 %2530 }
 0x4be   : > { %v4662_v17 = vpop.eup %4661  ;;  %v2588_v21 = vmul.f32 0.0078125, %v2531_v41  ;;  %v2619_v60 = vmul.f32 %v6329_v30, %v6329_v30 }
 0x4bf   : > { %v2776_v8 = vmul.f32 %v4662_v17, %v2744_v11  ;;  %v2533_v42 = vpop.xlane.xlu1 %2532  ;;  %v6350_v11 = vld [vmem:[%s7154_s6 + $0x8] ss:$0 sm:$0xff] }
 0x4c0   : > { %v4664_v49 = vpop.eup %4663  ;;  %v2652_v7 = vsub.f32 %v2588_v21, %v2620_v9  ;;  %v2589_v52 = vmul.f32 0.0078125, %v2533_v42 }
 0x4c1   : > { %v2777_v40 = vmul.f32 %v4664_v49, %v2745_v5  ;;  %v2527_v55 = vpop.xlane.xlu0 %2526  ;;  %v2812_v36 = vmul.f32 %v6336_v34, %v2776_v8 }
 0x4c2   : > { %v4666_v2 = vpop.eup %4665  ;;  %v2684_v47 = vadd.f32 1e-05, %v2652_v7  ;;  %v2653_v23 = vsub.f32 %v2589_v52, %v2621_v39  ;;  %v2586_v15 = vmul.f32 0.0078125, %v2527_v55 }
 0x4c3   : > { %v2529_v45 = vpop.xlane.xlu1 %2528  ;;  %v2774_v26 = vmul.f32 %v4666_v2, %v2742_v3  ;;  %v2813_v31 = vmul.f32 %v6336_v34, %v2777_v40  ;;  %v2848_v7 = vadd.f32 %v6350_v11, %v2812_v36 }
 0x4c4   : > { %v4668_v4 = vpop.eup %4667  ;;  %4669 = vrsqrt.f32 %v2684_v47  ;;  %v2685_v38 = vadd.f32 1e-05, %v2653_v23  ;;  %v2650_v25 = vsub.f32 %v2586_v15, %v2618_v50  ;;  %v2587_v57 = vmul.f32 0.0078125, %v2529_v45 }
 0x4c5   : > { %v2411_v6 = vpop.xlane.xlu0 %2410  ;;  %v2775_v41 = vmul.f32 %v4668_v4, %v2743_v51  ;;  %v2810_v17 = vmul.f32 %v6336_v34, %v2774_v26  ;;  %v2849_v5 = vadd.f32 %v6350_v11, %v2813_v31  ;;  %v2880_v23 = vmax.f32 %v2848_v7, 0.0 }
 0x4c6   : > { %4671 = vrsqrt.f32 %v2685_v38  ;;  %v2682_v9 = vadd.f32 1e-05, %v2650_v25  ;;  %v2651_v21 = vsub.f32 %v2587_v57, %v2619_v60  ;;  %v6358_v51 = vmul.f32 0.0078125, %v2411_v6 }
 0x4c7   : > { %v2413_v8 = vpop.xlane.xlu1 %2412  ;;  %v2811_v42 = vmul.f32 %v6336_v34, %v2775_v41  ;;  %v2846_v49 = vadd.f32 %v6350_v11, %v2810_v17  ;;  %v2881_v40 = vmax.f32 %v2849_v5, 0.0  ;;  %v2748_v15 = vsub.f32 %v6116_v28, %v6319_v0 }
 0x4c8   : > { %4673 = vrsqrt.f32 %v2682_v9  ;;  %v2683_v39 = vadd.f32 1e-05, %v2651_v21  ;;  %v6360_v47 = vmul.f32 0.0078125, %v2413_v8  ;;  %v2624_v36 = vmul.f32 %v6358_v51, %v6358_v51 }
 0x4c9   : > { %v2407_v52 = vpop.xlane.xlu0 %2406  ;;  %v2847_v3 = vadd.f32 %v6350_v11, %v2811_v42  ;;  %v2878_v2 = vmax.f32 %v2846_v49, 0.0  ;;  %v2911_v38 = vpack.c.bf16 %v2881_v40, %v2880_v23  ;;  %v2749_v25 = vsub.f32 %v6121_v14, %v6321_v62 }
 0x4ca   : > { %4675 = vrsqrt.f32 %v2683_v39  ;;  %v6366_v31 = vmul.f32 0.0078125, %v2407_v52  ;;  %v2625_v28 = vmul.f32 %v6360_v47, %v6360_v47  ;;  %v2746_v21 = vsub.f32 %v6125_v54, %v6326_v37 }
 0x4cb   : > { %v2409_v55 = vpop.xlane.xlu1 %2408  ;;  %v2879_v50 = vmax.f32 %v2847_v3, 0.0  ;;  %v2747_v5 = vsub.f32 %v6129_v46, %v6329_v30 }
 0x4cc   : > { %v6370_v57 = vmul.f32 0.0078125, %v2409_v55  ;;  %v2622_v42 = vmul.f32 %v6366_v31, %v6366_v31 }
 0x4cd   : > { %v2539_v60 = vpop.xlane.xlu0 %2538  ;;  %v2910_v45 = vpack.c.bf16 %v2879_v50, %v2878_v2 }
 0x4ce   : > { %v4670_v26 = vpop.eup %4669  ;;  %v2592_v4 = vmul.f32 0.0078125, %v2539_v60  ;;  %v2623_v52 = vmul.f32 %v6370_v57, %v6370_v57 }
 0x4cf   : > { %4384 = vmatprep.mubr.bf16.mxu0 %v2910_v45  ;;  %v2541_v6 = vpop.xlane.xlu1 %2540  ;;  %v2780_v41 = vmul.f32 %v4670_v26, %v2748_v15 }
 0x4d0   : > { %v4672_v17 = vpop.eup %4671  ;;  %v2656_v0 = vsub.f32 %v2592_v4, %v2624_v36  ;;  %v2593_v9 = vmul.f32 0.0078125, %v2541_v6  ;;  %4385 = vmatmul.mubr.bf16.vlgmr.msra.gmra.mrb[64].mxu0 %v2911_v38 }
 0x4d1   : > { %v2535_v8 = vpop.xlane.xlu0 %2534  ;;  %v2781_v14 = vmul.f32 %v4672_v17, %v2749_v25  ;;  %v2816_v55 = vmul.f32 %v6336_v34, %v2780_v41 }
 0x4d2   : > { %v4674_v62 = vpop.eup %4673  ;;  %v2688_v49 = vadd.f32 1e-05, %v2656_v0  ;;  %v2657_v39 = vsub.f32 %v2593_v9, %v2625_v28  ;;  %v2590_v7 = vmul.f32 0.0078125, %v2535_v8 }
 0x4d3   : > { %v2537_v3 = vpop.xlane.xlu1 %2536  ;;  %v2778_v40 = vmul.f32 %v4674_v62, %v2746_v21  ;;  %v2817_v54 = vmul.f32 %v6336_v34, %v2781_v14  ;;  %v2852_v6 = vadd.f32 %v6350_v11, %v2816_v55  ;;  %v2752_v62 = vsub.f32 %v6144_v10, %v6358_v51 }
 0x4d4   : > { %v4676_v37 = vpop.eup %4675  ;;  %4677 = vrsqrt.f32 %v2688_v49  ;;  %v2689_v46 = vadd.f32 1e-05, %v2657_v39  ;;  %v2654_v30 = vsub.f32 %v2590_v7, %v2622_v42  ;;  %v2591_v2 = vmul.f32 0.0078125, %v2537_v3 }
 0x4d5   : > { %v2419_v50 = vpop.xlane.xlu0 %2418  ;;  %v2779_v23 = vmul.f32 %v4676_v37, %v2747_v5  ;;  %v2814_v15 = vmul.f32 %v6336_v34, %v2778_v40  ;;  %v2853_v26 = vadd.f32 %v6350_v11, %v2817_v54  ;;  %v2884_v14 = vmax.f32 %v2852_v6, 0.0 }
 0x4d6   : > { %4679 = vrsqrt.f32 %v2689_v46  ;;  %v2686_v60 = vadd.f32 1e-05, %v2654_v30  ;;  %v2655_v45 = vsub.f32 %v2591_v2, %v2623_v52  ;;  %v6390_v28 = vmul.f32 0.0078125, %v2419_v50 }
 0x4d7   : > { %v2421_v36 = vpop.xlane.xlu1 %2420  ;;  %v2815_v4 = vmul.f32 %v6336_v34, %v2779_v23  ;;  %v2850_v38 = vadd.f32 %v6350_v11, %v2814_v15  ;;  %v2885_v0 = vmax.f32 %v2853_v26, 0.0  ;;  %v2753_v55 = vsub.f32 %v6149_v56, %v6360_v47 }
 0x4d8   : > { %4681 = vrsqrt.f32 %v2686_v60  ;;  %v2687_v25 = vadd.f32 1e-05, %v2655_v45  ;;  %v6392_v8 = vmul.f32 0.0078125, %v2421_v36  ;;  %v2628_v7 = vmul.f32 %v6390_v28, %v6390_v28 }
 0x4d9   : > { %v2415_v41 = vpop.xlane.xlu0 %2414  ;;  %v2851_v17 = vadd.f32 %v6350_v11, %v2815_v4  ;;  %v2882_v21 = vmax.f32 %v2850_v38, 0.0  ;;  %v2913_v40 = vpack.c.bf16 %v2885_v0, %v2884_v14  ;;  %v2750_v50 = vsub.f32 %v6153_v53, %v6366_v31 }
 0x4da   : > { %4683 = vrsqrt.f32 %v2687_v25  ;;  %v6398_v52 = vmul.f32 0.0078125, %v2415_v41  ;;  %v2629_v10 = vmul.f32 %v6392_v8, %v6392_v8  ;;  %v2751_v23 = vsub.f32 %v6157_v59, %v6370_v57 }
 0x4db   : > { %v2417_v9 = vpop.xlane.xlu1 %2416  ;;  %v2883_v5 = vmax.f32 %v2851_v17, 0.0 }
 0x4dc   : > { %v6402_v54 = vmul.f32 0.0078125, %v2417_v9  ;;  %v2626_v60 = vmul.f32 %v6398_v52, %v6398_v52 }
 0x4dd   : > { %v2547_v42 = vpop.xlane.xlu0 %2546  ;;  %v2912_v49 = vpack.c.bf16 %v2883_v5, %v2882_v21 }
 0x4de   : > { %v4678_v39 = vpop.eup %4677  ;;  %v2596_v3 = vmul.f32 0.0078125, %v2547_v42  ;;  %v2627_v4 = vmul.f32 %v6402_v54, %v6402_v54 }
 0x4df   : > { %4388 = vmatprep.mubr.bf16.mxu0 %v2912_v49  ;;  %v2549_v37 = vpop.xlane.xlu1 %2548  ;;  %v2784_v46 = vmul.f32 %v4678_v39, %v2752_v62 }
 0x4e0   : > { %v4680_v30 = vpop.eup %4679  ;;  %v2660_v51 = vsub.f32 %v2596_v3, %v2628_v7  ;;  %v2597_v2 = vmul.f32 0.0078125, %v2549_v37  ;;  %4389 = vmatmul.mubr.bf16.gmra.mrb[68].mxu0 %v2913_v40 }
 0x4e1   : > { %v2543_v15 = vpop.xlane.xlu0 %2542  ;;  %v2785_v56 = vmul.f32 %v4680_v30, %v2753_v55  ;;  %v2820_v6 = vmul.f32 %v6336_v34, %v2784_v46 }
 0x4e2   : > { %v4682_v47 = vpop.eup %4681  ;;  %v2692_v45 = vadd.f32 1e-05, %v2660_v51  ;;  %v2661_v26 = vsub.f32 %v2597_v2, %v2629_v10  ;;  %v2594_v36 = vmul.f32 0.0078125, %v2543_v15 }
 0x4e3   : > { %v2545_v38 = vpop.xlane.xlu1 %2544  ;;  %v2782_v25 = vmul.f32 %v4682_v47, %v2750_v50  ;;  %v2821_v53 = vmul.f32 %v6336_v34, %v2785_v56  ;;  %v2856_v7 = vadd.f32 %v6350_v11, %v2820_v6  ;;  %v2756_v50 = vsub.f32 %v6178_v13, %v6390_v28 }
 0x4e4   : > { %v4684_v31 = vpop.eup %4683  ;;  %4685 = vrsqrt.f32 %v2692_v45  ;;  %v2693_v59 = vadd.f32 1e-05, %v2661_v26  ;;  %v2658_v57 = vsub.f32 %v2594_v36, %v2626_v60  ;;  %v2595_v41 = vmul.f32 0.0078125, %v2545_v38 }
 0x4e5   : > { %v2427_v17 = vpop.xlane.xlu0 %2426  ;;  %v2783_v0 = vmul.f32 %v4684_v31, %v2751_v23  ;;  %v2818_v9 = vmul.f32 %v6336_v34, %v2782_v25  ;;  %v2857_v14 = vadd.f32 %v6350_v11, %v2821_v53  ;;  %v2888_v2 = vmax.f32 %v2856_v7, 0.0 }
 0x4e6   : > { %4687 = vrsqrt.f32 %v2693_v59  ;;  %v2690_v21 = vadd.f32 1e-05, %v2658_v57  ;;  %v2659_v5 = vsub.f32 %v2595_v41, %v2627_v4  ;;  %v6422_v55 = vmul.f32 0.0078125, %v2427_v17 }
 0x4e7   : > { %v2429_v62 = vpop.xlane.xlu1 %2428  ;;  %v2819_v42 = vmul.f32 %v6336_v34, %v2783_v0  ;;  %v2854_v49 = vadd.f32 %v6350_v11, %v2818_v9  ;;  %v2889_v37 = vmax.f32 %v2857_v14, 0.0  ;;  %v2757_v36 = vsub.f32 %v6183_v20, %v6392_v8 }
 0x4e8   : > { %4689 = vrsqrt.f32 %v2690_v21  ;;  %v2691_v39 = vadd.f32 1e-05, %v2659_v5  ;;  %v6424_v51 = vmul.f32 0.0078125, %v2429_v62  ;;  %v2632_v47 = vmul.f32 %v6422_v55, %v6422_v55 }
 0x4e9   : > { %v2423_v3 = vpop.xlane.xlu0 %2422  ;;  %v2855_v40 = vadd.f32 %v6350_v11, %v2819_v42  ;;  %v2886_v30 = vmax.f32 %v2854_v49, 0.0  ;;  %v2915_v26 = vpack.c.bf16 %v2889_v37, %v2888_v2  ;;  %v2754_v31 = vsub.f32 %v6187_v35, %v6398_v52 }
 0x4ea   : > { %4691 = vrsqrt.f32 %v2691_v39  ;;  %v6430_v60 = vmul.f32 0.0078125, %v2423_v3  ;;  %v2633_v13 = vmul.f32 %v6424_v51, %v6424_v51  ;;  %v2755_v59 = vsub.f32 %v6191_v61, %v6402_v54 }
 0x4eb   : > { %v2425_v46 = vpop.xlane.xlu1 %2424  ;;  %v2887_v10 = vmax.f32 %v2855_v40, 0.0 }
 0x4ec   : > { %v6434_v4 = vmul.f32 0.0078125, %v2425_v46  ;;  %v2630_v41 = vmul.f32 %v6430_v60, %v6430_v60 }
 0x4ed   : > { %v2555_v23 = vpop.xlane.xlu0 %2554  ;;  %v2914_v15 = vpack.c.bf16 %v2887_v10, %v2886_v30 }
 0x4ee   : > { %v4686_v56 = vpop.eup %4685  ;;  %v2600_v45 = vmul.f32 0.0078125, %v2555_v23  ;;  %v2631_v21 = vmul.f32 %v6434_v4, %v6434_v4 }
 0x4ef   : > { %4392 = vmatprep.mubr.bf16.mxu0 %v2914_v15  ;;  %v2557_v38 = vpop.xlane.xlu1 %2556  ;;  %v2788_v25 = vmul.f32 %v4686_v56, %v2756_v50 }
 0x4f0   : > { %v4688_v6 = vpop.eup %4687  ;;  %v2664_v28 = vsub.f32 %v2600_v45, %v2632_v47  ;;  %v2601_v53 = vmul.f32 0.0078125, %v2557_v38  ;;  %4393 = vmatmul.mubr.bf16.gmra.mrb[72].mxu0 %v2915_v26 }
 0x4f1   : > { %v2551_v57 = vpop.xlane.xlu0 %2550  ;;  %v2789_v20 = vmul.f32 %v4688_v6, %v2757_v36  ;;  %v2824_v62 = vmul.f32 %v6336_v34, %v2788_v25  ;;  %v2760_v6 = vsub.f32 %v6206_v19, %v6422_v55 }
 0x4f2   : > { %v4690_v8 = vpop.eup %4689  ;;  %v2696_v17 = vadd.f32 1e-05, %v2664_v28  ;;  %v2665_v0 = vsub.f32 %v2601_v53, %v2633_v13  ;;  %v2598_v9 = vmul.f32 0.0078125, %v2551_v57 }
 0x4f3   : > { %v2553_v5 = vpop.xlane.xlu1 %2552  ;;  %v2786_v14 = vmul.f32 %v4690_v8, %v2754_v31  ;;  %v2825_v35 = vmul.f32 %v6336_v34, %v2789_v20  ;;  %v2860_v50 = vadd.f32 %v6350_v11, %v2824_v62  ;;  %v2761_v8 = vsub.f32 %v6211_v63, %v6424_v51 }
 0x4f4   : > { %v4692_v52 = vpop.eup %4691  ;;  %4693 = vrsqrt.f32 %v2696_v17  ;;  %v2697_v61 = vadd.f32 1e-05, %v2665_v0  ;;  %v2662_v54 = vsub.f32 %v2598_v9, %v2630_v41  ;;  %v2599_v42 = vmul.f32 0.0078125, %v2553_v5 }
 0x4f5   : > { %v2435_v49 = vpop.xlane.xlu0 %2434  ;;  %v2787_v39 = vmul.f32 %v4692_v52, %v2755_v59  ;;  %v2822_v7 = vmul.f32 %v6336_v34, %v2786_v14  ;;  %v2861_v37 = vadd.f32 %v6350_v11, %v2825_v35  ;;  %v2892_v25 = vmax.f32 %v2860_v50, 0.0 }
 0x4f6   : > { %4695 = vrsqrt.f32 %v2697_v61  ;;  %v2694_v3 = vadd.f32 1e-05, %v2662_v54  ;;  %v2663_v40 = vsub.f32 %v2599_v42, %v2631_v21  ;;  %v6454_v56 = vmul.f32 0.0078125, %v2435_v49 }
 0x4f7   : > { %v2437_v46 = vpop.xlane.xlu1 %2436  ;;  %v2823_v30 = vmul.f32 %v6336_v34, %v2787_v39  ;;  %v2858_v10 = vadd.f32 %v6350_v11, %v2822_v7  ;;  %v2893_v47 = vmax.f32 %v2861_v37, 0.0  ;;  %v2758_v5 = vsub.f32 %v6215_v22, %v6430_v60 }
 0x4f8   : > { %4697 = vrsqrt.f32 %v2694_v3  ;;  %v2695_v2 = vadd.f32 1e-05, %v2663_v40  ;;  %v6456_v38 = vmul.f32 0.0078125, %v2437_v46  ;;  %v2636_v31 = vmul.f32 %v6454_v56, %v6454_v56 }
 0x4f9   : > { %v2431_v23 = vpop.xlane.xlu0 %2430  ;;  %v2859_v15 = vadd.f32 %v6350_v11, %v2823_v30  ;;  %v2890_v26 = vmax.f32 %v2858_v10, 0.0  ;;  %v2917_v20 = vpack.c.bf16 %v2893_v47, %v2892_v25  ;;  %v2759_v14 = vsub.f32 %v6219_v16, %v6434_v4 }
 0x4fa   : > { %4699 = vrsqrt.f32 %v2695_v2  ;;  %v6462_v59 = vmul.f32 0.0078125, %v2431_v23  ;;  %v2637_v19 = vmul.f32 %v6456_v38, %v6456_v38 }
 0x4fb   : > { %v2433_v45 = vpop.xlane.xlu1 %2432  ;;  %v2891_v36 = vmax.f32 %v2859_v15, 0.0 }
 0x4fc   : > { %v6466_v41 = vmul.f32 0.0078125, %v2433_v45  ;;  %v2634_v35 = vmul.f32 %v6462_v59, %v6462_v59 }
 0x4fd   : > { %v2563_v13 = vpop.xlane.xlu0 %2562  ;;  %v2916_v28 = vpack.c.bf16 %v2891_v36, %v2890_v26 }
 0x4fe   : > { %v4694_v53 = vpop.eup %4693  ;;  %v2604_v57 = vmul.f32 0.0078125, %v2563_v13  ;;  %v2635_v42 = vmul.f32 %v6466_v41, %v6466_v41 }
 0x4ff   : > { %4396 = vmatprep.mubr.bf16.mxu0 %v2916_v28  ;;  %v2565_v17 = vpop.xlane.xlu1 %2564  ;;  %v2792_v0 = vmul.f32 %v4694_v53, %v2760_v6 }
 0x500   : > { %v4696_v9 = vpop.eup %4695  ;;  %v2668_v55 = vsub.f32 %v2604_v57, %v2636_v31  ;;  %v2605_v21 = vmul.f32 0.0078125, %v2565_v17  ;;  %4397 = vmatmul.mubr.bf16.gmra.mrb[76].mxu0 %v2917_v20  ;;  %v2764_v20 = vsub.f32 %v6234_v27, %v6454_v56 }
 0x501   : > { %v2559_v62 = vpop.xlane.xlu0 %2558  ;;  %v2793_v63 = vmul.f32 %v4696_v9, %v2761_v8  ;;  %v2828_v7 = vmul.f32 %v6336_v34, %v2792_v0 }
 0x502   : > { %v4698_v51 = vpop.eup %4697  ;;  %v2700_v52 = vadd.f32 1e-05, %v2668_v55  ;;  %v2669_v61 = vsub.f32 %v2605_v21, %v2637_v19  ;;  %v2602_v54 = vmul.f32 0.0078125, %v2559_v62 }
 0x503   : > { %v2561_v49 = vpop.xlane.xlu1 %2560  ;;  %v2790_v39 = vmul.f32 %v4698_v51, %v2758_v5  ;;  %v2829_v22 = vmul.f32 %v6336_v34, %v2793_v63  ;;  %v2864_v45 = vadd.f32 %v6350_v11, %v2828_v7  ;;  %v2765_v5 = vsub.f32 %v6239_v1, %v6456_v38 }
 0x504   : > { %v4700_v60 = vpop.eup %4699  ;;  %4701 = vrsqrt.f32 %v2700_v52  ;;  %v2701_v16 = vadd.f32 1e-05, %v2669_v61  ;;  %v2666_v4 = vsub.f32 %v2602_v54, %v2634_v35  ;;  %v2603_v3 = vmul.f32 0.0078125, %v2561_v49 }
 0x505   : > { %v2443_v40 = vpop.xlane.xlu0 %2442  ;;  %v2791_v37 = vmul.f32 %v4700_v60, %v2759_v14  ;;  %v2826_v46 = vmul.f32 %v6336_v34, %v2790_v39  ;;  %v2865_v2 = vadd.f32 %v6350_v11, %v2829_v22  ;;  %v2896_v57 = vmax.f32 %v2864_v45, 0.0 }
 0x506   : > { %4703 = vrsqrt.f32 %v2701_v16  ;;  %v2698_v30 = vadd.f32 1e-05, %v2666_v4  ;;  %v2667_v10 = vsub.f32 %v2603_v3, %v2635_v42  ;;  %v6486_v25 = vmul.f32 0.0078125, %v2443_v40 }
 0x507   : > { %v2445_v50 = vpop.xlane.xlu1 %2444  ;;  %v2827_v23 = vmul.f32 %v6336_v34, %v2791_v37  ;;  %v2862_v15 = vadd.f32 %v6350_v11, %v2826_v46  ;;  %v2897_v6 = vmax.f32 %v2865_v2, 0.0  ;;  %v2762_v52 = vsub.f32 %v6243_v33, %v6462_v59 }
 0x508   : > { %4705 = vrsqrt.f32 %v2698_v30  ;;  %v2699_v47 = vadd.f32 1e-05, %v2667_v10  ;;  %v6488_v31 = vmul.f32 0.0078125, %v2445_v50  ;;  %v2640_v9 = vmul.f32 %v6486_v25, %v6486_v25 }
 0x509   : > { %v2439_v26 = vpop.xlane.xlu0 %2438  ;;  %v2863_v36 = vadd.f32 %v6350_v11, %v2827_v23  ;;  %v2894_v28 = vmax.f32 %v2862_v15, 0.0  ;;  %v2919_v21 = vpack.c.bf16 %v2897_v6, %v2896_v57  ;;  %v2763_v61 = vsub.f32 %v6247_v24, %v6466_v41 }
 0x50a   : > { %4707 = vrsqrt.f32 %v2699_v47  ;;  %v6494_v19 = vmul.f32 0.0078125, %v2439_v26  ;;  %v2641_v27 = vmul.f32 %v6488_v31, %v6488_v31 }
 0x50b   : > { %v2441_v13 = vpop.xlane.xlu1 %2440  ;;  %v2895_v53 = vmax.f32 %v2863_v36, 0.0 }
 0x50c   : > { %v6498_v14 = vmul.f32 0.0078125, %v2441_v13  ;;  %v2638_v42 = vmul.f32 %v6494_v19, %v6494_v19 }
 0x50d   : > { %v2571_v8 = vpop.xlane.xlu0 %2570  ;;  %v2918_v17 = vpack.c.bf16 %v2895_v53, %v2894_v28 }
 0x50e   : > { %v4702_v0 = vpop.eup %4701  ;;  %v2608_v55 = vmul.f32 0.0078125, %v2571_v8  ;;  %v2639_v22 = vmul.f32 %v6498_v14, %v6498_v14 }
 0x50f   : > { %4400 = vmatprep.mubr.bf16.mxu0 %v2918_v17  ;;  %v2573_v62 = vpop.xlane.xlu1 %2572  ;;  %v2796_v63 = vmul.f32 %v4702_v0, %v2764_v20  ;;  %v2768_v17 = vsub.f32 %v6262_v18, %v6486_v25 }
 0x510   : > { %v4704_v51 = vpop.eup %4703  ;;  %v2672_v56 = vsub.f32 %v2608_v55, %v2640_v9  ;;  %v2609_v35 = vmul.f32 0.0078125, %v2573_v62  ;;  %4401 = vmatmul.mubr.bf16.gmra.mrb[80].mxu0 %v2919_v21 }
 0x511   : > { %v2567_v54 = vpop.xlane.xlu0 %2566  ;;  %v2797_v1 = vmul.f32 %v4704_v51, %v2765_v5  ;;  %v2832_v4 = vmul.f32 %v6336_v34, %v2796_v63  ;;  %v2769_v51 = vsub.f32 %v6267_v32, %v6488_v31 }
 0x512   : > { %v4706_v38 = vpop.eup %4705  ;;  %v2704_v49 = vadd.f32 1e-05, %v2672_v56  ;;  %v2673_v39 = vsub.f32 %v2609_v35, %v2641_v27  ;;  %v2606_v7 = vmul.f32 0.0078125, %v2567_v54  ;;  %v2766_v54 = vsub.f32 %v6271_v48, %v6494_v19 }
 0x513   : > { %v2569_v60 = vpop.xlane.xlu1 %2568  ;;  %v2794_v16 = vmul.f32 %v4706_v38, %v2762_v52  ;;  %v2833_v33 = vmul.f32 %v6336_v34, %v2797_v1  ;;  %v2868_v45 = vadd.f32 %v6350_v11, %v2832_v4  ;;  %v2767_v1 = vsub.f32 %v6275_v58, %v6498_v14 }
 0x514   : > { %v4708_v59 = vpop.eup %4707  ;;  %4709 = vrsqrt.f32 %v2704_v49  ;;  %v2705_v24 = vadd.f32 1e-05, %v2673_v39  ;;  %v2670_v41 = vsub.f32 %v2606_v7, %v2638_v42  ;;  %v2607_v3 = vmul.f32 0.0078125, %v2569_v60 }
 0x515   : > { %v2451_v40 = vpop.xlane.xlu0 %2450  ;;  %v2795_v37 = vmul.f32 %v4708_v59, %v2763_v61  ;;  %v2830_v46 = vmul.f32 %v6336_v34, %v2794_v16  ;;  %v2869_v2 = vadd.f32 %v6350_v11, %v2833_v33  ;;  %v2900_v8 = vmax.f32 %v2868_v45, 0.0 }
 0x516   : > { %4711 = vrsqrt.f32 %v2705_v24  ;;  %v2702_v30 = vadd.f32 1e-05, %v2670_v41  ;;  %v2671_v10 = vsub.f32 %v2607_v3, %v2639_v22  ;;  %v6524_v21 = vmul.f32 0.0078125, %v2451_v40 }
 0x517   : > { %v2453_v50 = vpop.xlane.xlu1 %2452  ;;  %v2831_v23 = vmul.f32 %v6336_v34, %v2795_v37  ;;  %v2866_v15 = vadd.f32 %v6350_v11, %v2830_v46  ;;  %v2901_v13 = vmax.f32 %v2869_v2, 0.0 }
 0x518   : > { %4713 = vrsqrt.f32 %v2702_v30  ;;  %v2703_v47 = vadd.f32 1e-05, %v2671_v10  ;;  %v6530_v27 = vmul.f32 0.0078125, %v2453_v50  ;;  %v2644_v42 = vmul.f32 %v6524_v21, %v6524_v21 }
 0x519   : > { %v2447_v26 = vpop.xlane.xlu0 %2446  ;;  %v2867_v36 = vadd.f32 %v6350_v11, %v2831_v23  ;;  %v2898_v53 = vmax.f32 %v2866_v15, 0.0  ;;  %v2921_v63 = vpack.c.bf16 %v2901_v13, %v2900_v8  ;;  %v2772_v8 = vsub.f32 %v6290_v12, %v6524_v21 }
 0x51a   : > { %4715 = vrsqrt.f32 %v2703_v47  ;;  %v6518_v6 = vmul.f32 0.0078125, %v2447_v26  ;;  %v2645_v22 = vmul.f32 %v6530_v27, %v6530_v27 }
 0x51b   : > { %v2449_v28 = vpop.xlane.xlu1 %2448  ;;  %v2899_v57 = vmax.f32 %v2867_v36, 0.0 }
 0x51c   : > { %v6520_v20 = vmul.f32 0.0078125, %v2449_v28  ;;  %v2642_v5 = vmul.f32 %v6518_v6, %v6518_v6  ;;  %v2770_v45 = vsub.f32 %v6299_v43, %v6518_v6  ;;  %v2773_v43 = vsub.f32 %v6295_v44, %v6530_v27 }
 0x51d   : > { %v2575_v0 = vpop.xlane.xlu0 %2574  ;;  %v2920_v9 = vpack.c.bf16 %v2899_v57, %v2898_v53 }
 0x51e   : > { %v4710_v55 = vpop.eup %4709  ;;  %v2610_v62 = vmul.f32 0.0078125, %v2575_v0  ;;  %v2643_v18 = vmul.f32 %v6520_v20, %v6520_v20  ;;  %v2771_v28 = vsub.f32 %v6303_v29, %v6520_v20 }
 0x51f   : > { %4404 = vmatprep.mubr.bf16.mxu0 %v2920_v9  ;;  %v2577_v56 = vpop.xlane.xlu1 %2576  ;;  %v2800_v35 = vmul.f32 %v4710_v55, %v2768_v17 }
 0x520   : > { %v4712_v52 = vpop.eup %4711  ;;  %v2674_v25 = vsub.f32 %v2610_v62, %v2642_v5  ;;  %v2611_v61 = vmul.f32 0.0078125, %v2577_v56  ;;  %4405 = vmatmul.mubr.bf16.gmra.mrb[84].mxu0 %v2921_v63 }
 0x521   : > { %v2579_v38 = vpop.xlane.xlu0 %2578  ;;  %v2801_v32 = vmul.f32 %v4712_v52, %v2769_v51  ;;  %v2836_v4 = vmul.f32 %v6336_v34, %v2800_v35 }
 0x522   : > { %v4714_v31 = vpop.eup %4713  ;;  %v2706_v49 = vadd.f32 1e-05, %v2674_v25  ;;  %v2675_v39 = vsub.f32 %v2611_v61, %v2643_v18  ;;  %v2612_v7 = vmul.f32 0.0078125, %v2579_v38  ;;  %v6569_v25 = vld [vmem:[%s7154_s6 + $0x9] ss:$0 sm:$0xff] }
 0x523   : > { %v2581_v60 = vpop.xlane.xlu1 %2580  ;;  %v2798_v16 = vmul.f32 %v4714_v31, %v2766_v54  ;;  %v2837_v48 = vmul.f32 %v6336_v34, %v2801_v32  ;;  %v2872_v10 = vadd.f32 %v6350_v11, %v2836_v4 }
 0x524   : > { %v4716_v19 = vpop.eup %4715  ;;  %4717 = vrsqrt.f32 %v2706_v49  ;;  %v2707_v58 = vadd.f32 1e-05, %v2675_v39  ;;  %v2676_v14 = vsub.f32 %v2612_v7, %v2644_v42  ;;  %v2613_v33 = vmul.f32 0.0078125, %v2581_v60 }
 0x525   : > { %v2799_v59 = vmul.f32 %v4716_v19, %v2767_v1  ;;  %v2834_v24 = vmul.f32 %v6336_v34, %v2798_v16  ;;  %v2873_v40 = vadd.f32 %v6350_v11, %v2837_v48  ;;  %v2904_v47 = vmax.f32 %v2872_v10, 0.0 }
 0x526   : > { %4719 = vrsqrt.f32 %v2707_v58  ;;  %v2708_v41 = vadd.f32 1e-05, %v2676_v14  ;;  %v2677_v3 = vsub.f32 %v2613_v33, %v2645_v22 }
 0x527   : > { %v2835_v37 = vmul.f32 %v6336_v34, %v2799_v59  ;;  %v2870_v46 = vadd.f32 %v6350_v11, %v2834_v24  ;;  %v2905_v50 = vmax.f32 %v2873_v40, 0.0  ;;  %v4525_v59 = vld [vmem:[%s7153_s5] sm:$0xff]  }
 0x528   : > { %4721 = vrsqrt.f32 %v2708_v41  ;;  %v2709_v30 = vadd.f32 1e-05, %v2677_v3  ;;  %4416 = vmatprep.subr.bf16.mxu1 %v4525_v59  ;;  %v4526_v3 = vld [vmem:[%s7153_s5 + $0x8] sm:$0xff]  }
 0x529   : > { %v2871_v2 = vadd.f32 %v6350_v11, %v2835_v37  ;;  %v2902_v23 = vmax.f32 %v2870_v46, 0.0  ;;  %v2923_v13 = vpack.c.bf16 %v2905_v50, %v2904_v47  ;;  %4417 = vmatpush3.bf16.msra.mxu1 %v4525_v59  ;;  %v4528_v47 = vld [vmem:[%s7153_s5 + $0x18] sm:$0xff]  }
 0x52a   : > { %4723 = vrsqrt.f32 %v2709_v30  ;;  %4418 = vmatprep.subr.bf16.mxu1 %v4526_v3 }
 0x52b   : > { %v2903_v15 = vmax.f32 %v2871_v2, 0.0  ;;  %v4527_v2 = vld [vmem:[%s7153_s5 + $0x10] sm:$0xff]  }
 0x52d   : > { %v2922_v26 = vpack.c.bf16 %v2903_v15, %v2902_v23  ;;  %4419 = vmatpush3.bf16.msra.mxu1 %v4526_v3 }
 0x52e   : > { %v4718_v36 = vpop.eup %4717  ;;  %4420 = vmatprep.subr.bf16.mxu1 %v4527_v2 }
 0x52f   : > { %4408 = vmatprep.mubr.bf16.mxu0 %v2922_v26  ;;  %v2802_v53 = vmul.f32 %v4718_v36, %v2770_v45  ;;  %v4529_v36 = vld [vmem:[%s7153_s5 + $0x20] sm:$0xff]  }
 0x530   : > { %v4720_v57 = vpop.eup %4719  ;;  %4409 = vmatmul.mubr.bf16.gmra.mrb[88].mxu0 %v2923_v13 }
 0x531   : > { %v2803_v17 = vmul.f32 %v4720_v57, %v2771_v28  ;;  %v2838_v0 = vmul.f32 %v6336_v34, %v2802_v53  ;;  %4421 = vmatpush3.bf16.msra.mxu1 %v4527_v2  ;;  %v4530_v53 = vld [vmem:[%s7153_s5 + $0x28] sm:$0xff]  }
 0x532   : > { %v4722_v9 = vpop.eup %4721  ;;  %4422 = vmatprep.subr.bf16.mxu1 %v4528_v47 }
 0x533   : > { %v2839_v6 = vmul.f32 %v6336_v34, %v2803_v17  ;;  %v2874_v55 = vadd.f32 %v6350_v11, %v2838_v0  ;;  %v2804_v5 = vmul.f32 %v4722_v9, %v2772_v8 }
 0x534   : > { %v4724_v29 = vpop.eup %4723 }
 0x535   : > { %v2875_v20 = vadd.f32 %v6350_v11, %v2839_v6  ;;  %v2805_v62 = vmul.f32 %v4724_v29, %v2773_v43  ;;  %v2840_v63 = vmul.f32 %v6336_v34, %v2804_v5  ;;  %v2906_v51 = vmax.f32 %v2874_v55, 0.0  ;;  %4423 = vmatpush3.bf16.msra.mxu1 %v4528_v47  ;;  %v4531_v43 = vld [vmem:[%s7153_s5 + $0x30] sm:$0xff]   ;;  %v4532_v29 = vld [vmem:[%s7153_s5 + $0x38] sm:$0xff]  }
 0x536   : > { %4424 = vmatprep.subr.bf16.mxu1 %v4529_v36 }
 0x537   : > { %v2907_v12 = vmax.f32 %v2875_v20, 0.0  ;;  %v2841_v21 = vmul.f32 %v6336_v34, %v2805_v62  ;;  %v2876_v56 = vadd.f32 %v6350_v11, %v2840_v63 }
 0x539   : > { %v2924_v35 = vpack.c.bf16 %v2907_v12, %v2906_v51  ;;  %v2877_v44 = vadd.f32 %v6350_v11, %v2841_v21  ;;  %v2908_v27 = vmax.f32 %v2876_v56, 0.0  ;;  %4425 = vmatpush3.bf16.msra.mxu1 %v4529_v36 }
 0x53a   : > { %4426 = vmatprep.subr.bf16.mxu1 %v4530_v53 }
 0x53b   : > { %4412 = vmatprep.mubr.bf16.mxu0 %v2924_v35  ;;  %v2909_v52 = vmax.f32 %v2877_v44, 0.0 }
 0x53d   : > { %v2925_v18 = vpack.c.bf16 %v2909_v52, %v2908_v27  ;;  %4427 = vmatpush3.bf16.msra.mxu1 %v4530_v53 }
 0x53e   : > { %4428 = vmatprep.subr.bf16.mxu1 %v4531_v43 }
 0x53f   : > { %4413 = vmatmul.mubr.bf16.gmra.mrb[92].mxu0 %v2925_v18 }
 0x541   : > { %4429 = vmatpush3.bf16.msra.mxu1 %v4531_v43 }
 0x542   : > { %4430 = vmatprep.subr.bf16.mxu1 %v4532_v29 }
 0x545   : > { %4431 = vmatpush3.bf16.msra.mxu1 %v4532_v29 }
 0x5a3   : > { %v4386_v61 = vpop.f32.mrb[64].mxu0 }
 0x5a4   : > { %v6572_v54 = vadd.f32 %v4386_v61, %v6569_v25  ;;  %v3029_v34 = vpop.f32.mrb[65].mxu0 }
 0x5a5   : > { %v4387_v1 = vpop.f32.mrb[66].mxu0  ;;  %v6579_v32 = vadd.f32 %v6569_v25, %v3029_v34 }
 0x5a6   : > { %v6575_v38 = vadd.f32 %v4387_v1, %v6569_v25  ;;  %3162 = vadd.xlane.f32.xlu0 %v6572_v54  ;;  %v3032_v11 = vpop.f32.mrb[67].mxu0  ;;  %v3256_v42 = vmul.f32 %v6572_v54, %v6572_v54 }
 0x5a7   : > { %v6583_v31 = vadd.f32 %v6569_v25, %v3032_v11  ;;  %v3254_v39 = vmul.f32 %v6579_v32, %v6579_v32 }
 0x5a8   : > { %3164 = vadd.xlane.f32.xlu1 %v6575_v38  ;;  %v3257_v49 = vmul.f32 %v6575_v38, %v6575_v38 }
 0x5a9   : > { %v3255_v7 = vmul.f32 %v6583_v31, %v6583_v31 }
 0x5aa   : > { %3158 = vadd.xlane.f32.xlu0 %v6579_v32 }
 0x5ac   : > { %3160 = vadd.xlane.f32.xlu1 %v6583_v31 }
 0x5ae   : > { %3290 = vadd.xlane.f32.xlu0 %v3256_v42 }
 0x5b0   : > { %3292 = vadd.xlane.f32.xlu1 %v3257_v49 }
 0x5b2   : > { %3286 = vadd.xlane.f32.xlu0 %v3254_v39 }
 0x5b3   : > { %v4390_v22 = vpop.f32.mrb[68].mxu0 }
 0x5b4   : > { %v6596_v60 = vadd.f32 %v4390_v22, %v6569_v25  ;;  %v3045_v16 = vpop.f32.mrb[69].mxu0  ;;  %3288 = vadd.xlane.f32.xlu1 %v3255_v7 }
 0x5b5   : > { %v4391_v4 = vpop.f32.mrb[70].mxu0  ;;  %v6603_v58 = vadd.f32 %v6569_v25, %v3045_v16 }
 0x5b6   : > { %v6599_v48 = vadd.f32 %v4391_v4, %v6569_v25  ;;  %v3048_v19 = vpop.f32.mrb[71].mxu0  ;;  %3170 = vadd.xlane.f32.xlu0 %v6596_v60  ;;  %v3260_v33 = vmul.f32 %v6596_v60, %v6596_v60 }
 0x5b7   : > { %v6607_v14 = vadd.f32 %v6569_v25, %v3048_v19  ;;  %v3258_v41 = vmul.f32 %v6603_v58, %v6603_v58 }
 0x5b8   : > { %3172 = vadd.xlane.f32.xlu1 %v6599_v48  ;;  %v3261_v24 = vmul.f32 %v6599_v48, %v6599_v48 }
 0x5b9   : > { %v3259_v40 = vmul.f32 %v6607_v14, %v6607_v14 }
 0x5ba   : > { %3166 = vadd.xlane.f32.xlu0 %v6603_v58 }
 0x5bc   : > { %3168 = vadd.xlane.f32.xlu1 %v6607_v14 }
 0x5be   : > { %3298 = vadd.xlane.f32.xlu0 %v3260_v33 }
 0x5c0   : > { %3300 = vadd.xlane.f32.xlu1 %v3261_v24 }
 0x5c2   : > { %3294 = vadd.xlane.f32.xlu0 %v3258_v41 }
 0x5c3   : > { %v4394_v37 = vpop.f32.mrb[72].mxu0 }
 0x5c4   : > { %v6626_v46 = vadd.f32 %v4394_v37, %v6569_v25  ;;  %v3061_v30 = vpop.f32.mrb[73].mxu0  ;;  %3296 = vadd.xlane.f32.xlu1 %v3259_v40 }
 0x5c5   : > { %v4395_v10 = vpop.f32.mrb[74].mxu0  ;;  %v6636_v15 = vadd.f32 %v6569_v25, %v3061_v30 }
 0x5c6   : > { %v6632_v50 = vadd.f32 %v4395_v10, %v6569_v25  ;;  %v3064_v23 = vpop.f32.mrb[75].mxu0  ;;  %3178 = vadd.xlane.f32.xlu0 %v6626_v46  ;;  %v3264_v26 = vmul.f32 %v6626_v46, %v6626_v46 }
 0x5c7   : > { %v6643_v45 = vadd.f32 %v6569_v25, %v3064_v23  ;;  %v3262_v28 = vmul.f32 %v6636_v15, %v6636_v15 }
 0x5c8   : > { %3180 = vadd.xlane.f32.xlu1 %v6632_v50  ;;  %v3265_v13 = vmul.f32 %v6632_v50, %v6632_v50 }
 0x5c9   : > { %v3263_v57 = vmul.f32 %v6643_v45, %v6643_v45 }
 0x5ca   : > { %3174 = vadd.xlane.f32.xlu0 %v6636_v15 }
 0x5cc   : > { %3176 = vadd.xlane.f32.xlu1 %v6643_v45 }
 0x5ce   : > { %3306 = vadd.xlane.f32.xlu0 %v3264_v26 }
 0x5d0   : > { %3308 = vadd.xlane.f32.xlu1 %v3265_v13 }
 0x5d2   : > { %3302 = vadd.xlane.f32.xlu0 %v3262_v28 }
 0x5d3   : > { %v4398_v8 = vpop.f32.mrb[76].mxu0 }
 0x5d4   : > { %v6662_v17 = vadd.f32 %v4398_v8, %v6569_v25  ;;  %v3077_v0 = vpop.f32.mrb[77].mxu0  ;;  %3304 = vadd.xlane.f32.xlu1 %v3263_v57 }
 0x5d5   : > { %v4399_v9 = vpop.f32.mrb[78].mxu0  ;;  %v6672_v5 = vadd.f32 %v6569_v25, %v3077_v0 }
 0x5d6   : > { %v6668_v6 = vadd.f32 %v4399_v9, %v6569_v25  ;;  %v3080_v55 = vpop.f32.mrb[79].mxu0  ;;  %3186 = vadd.xlane.f32.xlu0 %v6662_v17  ;;  %v3268_v62 = vmul.f32 %v6662_v17, %v6662_v17 }
 0x5d7   : > { %v6679_v20 = vadd.f32 %v6569_v25, %v3080_v55  ;;  %v3266_v51 = vmul.f32 %v6672_v5, %v6672_v5 }
 0x5d8   : > { %3188 = vadd.xlane.f32.xlu1 %v6668_v6  ;;  %v3269_v63 = vmul.f32 %v6668_v6, %v6668_v6 }
 0x5d9   : > { %v3267_v12 = vmul.f32 %v6679_v20, %v6679_v20 }
 0x5da   : > { %3182 = vadd.xlane.f32.xlu0 %v6672_v5 }
 0x5dc   : > { %3184 = vadd.xlane.f32.xlu1 %v6679_v20 }
 0x5de   : > { %3314 = vadd.xlane.f32.xlu0 %v3268_v62 }
 0x5e0   : > { %3316 = vadd.xlane.f32.xlu1 %v3269_v63 }
 0x5e2   : > { %3310 = vadd.xlane.f32.xlu0 %v3266_v51 }
 0x5e3   : > { %v4402_v21 = vpop.f32.mrb[80].mxu0 }
 0x5e4   : > { %v6692_v56 = vadd.f32 %v4402_v21, %v6569_v25  ;;  %v3093_v35 = vpop.f32.mrb[81].mxu0  ;;  %3312 = vadd.xlane.f32.xlu1 %v3267_v12 }
 0x5e5   : > { %v4403_v44 = vpop.f32.mrb[82].mxu0  ;;  %v6699_v18 = vadd.f32 %v6569_v25, %v3093_v35 }
 0x5e6   : > { %v6695_v27 = vadd.f32 %v4403_v44, %v6569_v25  ;;  %v3096_v52 = vpop.f32.mrb[83].mxu0  ;;  %3194 = vadd.xlane.f32.xlu0 %v6692_v56  ;;  %v3272_v34 = vmul.f32 %v6692_v56, %v6692_v56 }
 0x5e7   : > { %v6703_v61 = vadd.f32 %v6569_v25, %v3096_v52  ;;  %v3270_v11 = vmul.f32 %v6699_v18, %v6699_v18 }
 0x5e8   : > { %3196 = vadd.xlane.f32.xlu1 %v6695_v27  ;;  %v3273_v1 = vmul.f32 %v6695_v27, %v6695_v27 }
 0x5e9   : > { %v3271_v42 = vmul.f32 %v6703_v61, %v6703_v61 }
 0x5ea   : > { %3190 = vadd.xlane.f32.xlu0 %v6699_v18 }
 0x5ec   : > { %3192 = vadd.xlane.f32.xlu1 %v6703_v61 }
 0x5ee   : > { %3322 = vadd.xlane.f32.xlu0 %v3272_v34 }
 0x5f0   : > { %3324 = vadd.xlane.f32.xlu1 %v3273_v1 }
 0x5f2   : > { %3318 = vadd.xlane.f32.xlu0 %v3270_v11 }
 0x5f3   : > { %v4406_v49 = vpop.f32.mrb[84].mxu0 }
 0x5f4   : > { %v6716_v39 = vadd.f32 %v4406_v49, %v6569_v25  ;;  %v3109_v7 = vpop.f32.mrb[85].mxu0  ;;  %3320 = vadd.xlane.f32.xlu1 %v3271_v42 }
 0x5f5   : > { %v4407_v22 = vpop.f32.mrb[86].mxu0  ;;  %v6723_v19 = vadd.f32 %v6569_v25, %v3109_v7 }
 0x5f6   : > { %v6719_v16 = vadd.f32 %v4407_v22, %v6569_v25  ;;  %v3112_v4 = vpop.f32.mrb[87].mxu0  ;;  %3202 = vadd.xlane.f32.xlu0 %v6716_v39  ;;  %v3276_v59 = vmul.f32 %v6716_v39, %v6716_v39 }
 0x5f7   : > { %v6727_v33 = vadd.f32 %v6569_v25, %v3112_v4  ;;  %v3274_v41 = vmul.f32 %v6723_v19, %v6723_v19 }
 0x5f8   : > { %3204 = vadd.xlane.f32.xlu1 %v6719_v16  ;;  %v3277_v24 = vmul.f32 %v6719_v16, %v6719_v16 }
 0x5f9   : > { %v3275_v3 = vmul.f32 %v6727_v33, %v6727_v33 }
 0x5fa   : > { %3198 = vadd.xlane.f32.xlu0 %v6723_v19 }
 0x5fc   : > { %3200 = vadd.xlane.f32.xlu1 %v6727_v33 }
 0x5fe   : > { %3330 = vadd.xlane.f32.xlu0 %v3276_v59 }
 0x600   : > { %3332 = vadd.xlane.f32.xlu1 %v3277_v24 }
 0x602   : > { %3326 = vadd.xlane.f32.xlu0 %v3274_v41 }
 0x603   : > { %v4410_v40 = vpop.f32.mrb[88].mxu0 }
 0x604   : > { %v6740_v37 = vadd.f32 %v4410_v40, %v6569_v25  ;;  %v3125_v30 = vpop.f32.mrb[89].mxu0  ;;  %3328 = vadd.xlane.f32.xlu1 %v3275_v3 }
 0x605   : > { %v4411_v10 = vpop.f32.mrb[90].mxu0  ;;  %v6747_v47 = vadd.f32 %v6569_v25, %v3125_v30 }
 0x606   : > { %v6743_v2 = vadd.f32 %v4411_v10, %v6569_v25  ;;  %v3128_v23 = vpop.f32.mrb[91].mxu0  ;;  %3210 = vadd.xlane.f32.xlu0 %v6740_v37  ;;  %v3280_v36 = vmul.f32 %v6740_v37, %v6740_v37 }
 0x607   : > { %v6751_v26 = vadd.f32 %v6569_v25, %v3128_v23  ;;  %v3278_v28 = vmul.f32 %v6747_v47, %v6747_v47 }
 0x608   : > { %3212 = vadd.xlane.f32.xlu1 %v6743_v2  ;;  %v3281_v13 = vmul.f32 %v6743_v2, %v6743_v2 }
 0x609   : > { %v3279_v57 = vmul.f32 %v6751_v26, %v6751_v26 }
 0x60a   : > { %3206 = vadd.xlane.f32.xlu0 %v6747_v47 }
 0x60c   : > { %3208 = vadd.xlane.f32.xlu1 %v6751_v26 }
 0x60e   : > { %3338 = vadd.xlane.f32.xlu0 %v3280_v36 }
 0x610   : > { %3340 = vadd.xlane.f32.xlu1 %v3281_v13 }
 0x612   : > { %3334 = vadd.xlane.f32.xlu0 %v3278_v28  ;;  %v4414_v53 = vpop.f32.mrb[92].mxu0 }
 0x613   : > { %v6764_v8 = vadd.f32 %v4414_v53, %v6569_v25  ;;  %v3141_v0 = vpop.f32.mrb[93].mxu0 }
 0x614   : > { %3336 = vadd.xlane.f32.xlu1 %v3279_v57  ;;  %v4415_v9 = vpop.f32.mrb[94].mxu0  ;;  %v6771_v29 = vadd.f32 %v6569_v25, %v3141_v0 }
 0x615   : > { %v6767_v43 = vadd.f32 %v4415_v9, %v6569_v25  ;;  %v3144_v55 = vpop.f32.mrb[95].mxu0  ;;  %v3284_v12 = vmul.f32 %v6764_v8, %v6764_v8 }
 0x616   : > { %3218 = vadd.xlane.f32.xlu0 %v6764_v8  ;;  %v6775_v62 = vadd.f32 %v6569_v25, %v3144_v55  ;;  %v3282_v63 = vmul.f32 %v6771_v29, %v6771_v29 }
 0x617   : > { %v3285_v25 = vmul.f32 %v6767_v43, %v6767_v43 }
 0x618   : > { %3220 = vadd.xlane.f32.xlu1 %v6767_v43  ;;  %v3283_v51 = vmul.f32 %v6775_v62, %v6775_v62 }
 0x61a   : > { %3214 = vadd.xlane.f32.xlu0 %v6771_v29 }
 0x61c   : > { %3216 = vadd.xlane.f32.xlu1 %v6775_v62 }
 0x61e   : > { %3342 = vadd.xlane.f32.xlu0 %v3282_v63 }
 0x620   : > { %3344 = vadd.xlane.f32.xlu1 %v3283_v51 }
 0x622   : > { %3346 = vadd.xlane.f32.xlu0 %v3284_v12 }
 0x624   : > { %3348 = vadd.xlane.f32.xlu1 %v3285_v25 }
 0x633   : > { %v3163_v21 = vpop.xlane.xlu0 %3162 }
 0x634   : > { %v3224_v52 = vmul.f32 0.0078125, %v3163_v21 }
 0x635   : > { %v3165_v35 = vpop.xlane.xlu1 %3164 }
 0x636   : > { %v3225_v1 = vmul.f32 0.0078125, %v3165_v35  ;;  %v3384_v42 = vmul.f32 %v3224_v52, %v3224_v52 }
 0x637   : > { %v3159_v44 = vpop.xlane.xlu0 %3158 }
 0x638   : > { %v3222_v49 = vmul.f32 0.0078125, %v3159_v44  ;;  %v3385_v59 = vmul.f32 %v3225_v1, %v3225_v1  ;;  %v3512_v44 = vsub.f32 %v6572_v54, %v3224_v52  ;;  %v6808_v52 = vld [vmem:[%s7154_s6 + $0xa] ss:$0 sm:$0xff] }
 0x639   : > { %v3161_v34 = vpop.xlane.xlu1 %3160 }
 0x63a   : > { %v6787_v22 = vmul.f32 0.0078125, %v3161_v34  ;;  %v3382_v40 = vmul.f32 %v3222_v49, %v3222_v49 }
 0x63b   : > { %v3291_v11 = vpop.xlane.xlu0 %3290 }
 0x63c   : > { %v3352_v7 = vmul.f32 0.0078125, %v3291_v11  ;;  %v3383_v36 = vmul.f32 %v6787_v22, %v6787_v22 }
 0x63d   : > { %v3293_v4 = vpop.xlane.xlu1 %3292 }
 0x63e   : > { %v3416_v24 = vsub.f32 %v3352_v7, %v3384_v42  ;;  %v3353_v41 = vmul.f32 0.0078125, %v3293_v4 }
 0x63f   : > { %v3287_v3 = vpop.xlane.xlu0 %3286 }
 0x640   : > { %v3448_v30 = vadd.f32 1e-05, %v3416_v24  ;;  %v3417_v10 = vsub.f32 %v3353_v41, %v3385_v59  ;;  %v3350_v23 = vmul.f32 0.0078125, %v3287_v3  ;;  %v3513_v59 = vsub.f32 %v6575_v38, %v3225_v1 }
 0x641   : > { %v3289_v13 = vpop.xlane.xlu1 %3288  ;;  %v3511_v38 = vsub.f32 %v6583_v31, %v6787_v22 }
 0x642   : > { %4725 = vrsqrt.f32 %v3448_v30  ;;  %v3449_v28 = vadd.f32 1e-05, %v3417_v10  ;;  %v3414_v53 = vsub.f32 %v3350_v23, %v3382_v40  ;;  %v3351_v57 = vmul.f32 0.0078125, %v3289_v13 }
 0x643   : > { %v3171_v0 = vpop.xlane.xlu0 %3170  ;;  %v3510_v23 = vsub.f32 %v6579_v32, %v3222_v49 }
 0x644   : > { %4727 = vrsqrt.f32 %v3449_v28  ;;  %v3446_v9 = vadd.f32 1e-05, %v3414_v53  ;;  %v3415_v55 = vsub.f32 %v3351_v57, %v3383_v36  ;;  %v6791_v25 = vmul.f32 0.0078125, %v3171_v0 }
 0x645   : > { %v3173_v63 = vpop.xlane.xlu1 %3172 }
 0x646   : > { %4729 = vrsqrt.f32 %v3446_v9  ;;  %v3447_v51 = vadd.f32 1e-05, %v3415_v55  ;;  %v6793_v35 = vmul.f32 0.0078125, %v3173_v63  ;;  %v3388_v42 = vmul.f32 %v6791_v25, %v6791_v25 }
 0x647   : > { %v3167_v12 = vpop.xlane.xlu0 %3166 }
 0x648   : > { %4731 = vrsqrt.f32 %v3447_v51  ;;  %v6798_v7 = vmul.f32 0.0078125, %v3167_v12  ;;  %v3389_v30 = vmul.f32 %v6793_v35, %v6793_v35 }
 0x649   : > { %v3169_v21 = vpop.xlane.xlu1 %3168 }
 0x64a   : > { %v6801_v41 = vmul.f32 0.0078125, %v3169_v21  ;;  %v3386_v28 = vmul.f32 %v6798_v7, %v6798_v7 }
 0x64b   : > { %v3299_v34 = vpop.xlane.xlu0 %3298 }
 0x64c   : > { %v4726_v11 = vpop.eup %4725  ;;  %v3356_v4 = vmul.f32 0.0078125, %v3299_v34  ;;  %v3387_v9 = vmul.f32 %v6801_v41, %v6801_v41 }
 0x64d   : > { %v3544_v24 = vmul.f32 %v4726_v11, %v3512_v44  ;;  %v3301_v3 = vpop.xlane.xlu1 %3300  ;;  %v6822_v44 = vld [vmem:[%s7154_s6 + $0xb] ss:$0 sm:$0xff] }
 0x64e   : > { %v4728_v40 = vpop.eup %4727  ;;  %v3420_v10 = vsub.f32 %v3356_v4, %v3388_v42  ;;  %v3357_v54 = vmul.f32 0.0078125, %v3301_v3 }
 0x64f   : > { %v3545_v1 = vmul.f32 %v4728_v40, %v3513_v59  ;;  %v3295_v36 = vpop.xlane.xlu0 %3294  ;;  %v3580_v51 = vmul.f32 %v6808_v52, %v3544_v24 }
 0x650   : > { %v4730_v13 = vpop.eup %4729  ;;  %v3452_v53 = vadd.f32 1e-05, %v3420_v10  ;;  %v3421_v57 = vsub.f32 %v3357_v54, %v3389_v30  ;;  %v3354_v0 = vmul.f32 0.0078125, %v3295_v36 }
 0x651   : > { %v3297_v55 = vpop.xlane.xlu1 %3296  ;;  %v3542_v63 = vmul.f32 %v4730_v13, %v3510_v23  ;;  %v3581_v32 = vmul.f32 %v6808_v52, %v3545_v1  ;;  %v3616_v10 = vadd.f32 %v6822_v44, %v3580_v51 }
 0x652   : > { %v4732_v49 = vpop.eup %4731  ;;  %4733 = vrsqrt.f32 %v3452_v53  ;;  %v3453_v31 = vadd.f32 1e-05, %v3421_v57  ;;  %v3418_v22 = vsub.f32 %v3354_v0, %v3386_v28  ;;  %v3355_v12 = vmul.f32 0.0078125, %v3297_v55 }
 0x653   : > { %v3179_v21 = vpop.xlane.xlu0 %3178  ;;  %v3543_v34 = vmul.f32 %v4732_v49, %v3511_v38  ;;  %v3578_v11 = vmul.f32 %v6808_v52, %v3542_v63  ;;  %v3617_v59 = vadd.f32 %v6822_v44, %v3581_v32  ;;  %v3648_v57 = vmax.f32 %v3616_v10, 0.0 }
 0x654   : > { %4735 = vrsqrt.f32 %v3453_v31  ;;  %v3450_v42 = vadd.f32 1e-05, %v3418_v22  ;;  %v3419_v4 = vsub.f32 %v3355_v12, %v3387_v9  ;;  %v6830_v38 = vmul.f32 0.0078125, %v3179_v21 }
 0x655   : > { %v3181_v24 = vpop.xlane.xlu1 %3180  ;;  %v3579_v3 = vmul.f32 %v6808_v52, %v3543_v34  ;;  %v3614_v40 = vadd.f32 %v6822_v44, %v3578_v11  ;;  %v3649_v1 = vmax.f32 %v3617_v59, 0.0  ;;  %v3516_v0 = vsub.f32 %v6596_v60, %v6791_v25 }
 0x656   : > { %4737 = vrsqrt.f32 %v3450_v42  ;;  %v3451_v30 = vadd.f32 1e-05, %v3419_v4  ;;  %v6832_v53 = vmul.f32 0.0078125, %v3181_v24  ;;  %v3392_v51 = vmul.f32 %v6830_v38, %v6830_v38 }
 0x657   : > { %v3175_v54 = vpop.xlane.xlu0 %3174  ;;  %v3615_v23 = vadd.f32 %v6822_v44, %v3579_v3  ;;  %v3646_v13 = vmax.f32 %v3614_v40, 0.0  ;;  %v3679_v31 = vpack.c.bf16 %v3649_v1, %v3648_v57  ;;  %v3517_v22 = vsub.f32 %v6599_v48, %v6793_v35 }
 0x658   : > { %4739 = vrsqrt.f32 %v3451_v30  ;;  %v6838_v32 = vmul.f32 0.0078125, %v3175_v54  ;;  %v3393_v60 = vmul.f32 %v6832_v53, %v6832_v53  ;;  %v3514_v4 = vsub.f32 %v6603_v58, %v6798_v7 }
 0x659   : > { %v3177_v36 = vpop.xlane.xlu1 %3176  ;;  %v3647_v28 = vmax.f32 %v3615_v23, 0.0  ;;  %v3515_v59 = vsub.f32 %v6607_v14, %v6801_v41 }
 0x65a   : > { %v6842_v12 = vmul.f32 0.0078125, %v3177_v36  ;;  %v3390_v3 = vmul.f32 %v6838_v32, %v6838_v32 }
 0x65b   : > { %v3307_v9 = vpop.xlane.xlu0 %3306  ;;  %v3678_v55 = vpack.c.bf16 %v3647_v28, %v3646_v13 }
 0x65c   : > { %v4734_v63 = vpop.eup %4733  ;;  %v3360_v49 = vmul.f32 0.0078125, %v3307_v9  ;;  %v3391_v54 = vmul.f32 %v6842_v12, %v6842_v12 }
 0x65d   : > { %4432 = vmatprep.mubr.bf16.mxu1 %v3678_v55  ;;  %v3309_v21 = vpop.xlane.xlu1 %3308  ;;  %v3548_v34 = vmul.f32 %v4734_v63, %v3516_v0 }
 0x65e   : > { %v4736_v11 = vpop.eup %4735  ;;  %v3424_v25 = vsub.f32 %v3360_v49, %v3392_v51  ;;  %v3361_v42 = vmul.f32 0.0078125, %v3309_v21  ;;  %4433 = vmatmul.mubr.bf16.vlgmr.msra.gmra.mrb[64].mxu1 %v3679_v31 }
 0x65f   : > { %v3303_v24 = vpop.xlane.xlu0 %3302  ;;  %v3549_v48 = vmul.f32 %v4736_v11, %v3517_v22  ;;  %v3584_v36 = vmul.f32 %v6808_v52, %v3548_v34 }
 0x660   : > { %v4738_v35 = vpop.eup %4737  ;;  %v3456_v40 = vadd.f32 1e-05, %v3424_v25  ;;  %v3425_v30 = vsub.f32 %v3361_v42, %v3393_v60  ;;  %v3358_v10 = vmul.f32 0.0078125, %v3303_v24 }
 0x661   : > { %v3305_v23 = vpop.xlane.xlu1 %3304  ;;  %v3546_v1 = vmul.f32 %v4738_v35, %v3514_v4  ;;  %v3585_v58 = vmul.f32 %v6808_v52, %v3549_v48  ;;  %v3620_v21 = vadd.f32 %v6822_v44, %v3584_v36  ;;  %v3520_v35 = vsub.f32 %v6626_v46, %v6830_v38 }
 0x662   : > { %v4740_v7 = vpop.eup %4739  ;;  %4741 = vrsqrt.f32 %v3456_v40  ;;  %v3457_v14 = vadd.f32 1e-05, %v3425_v30  ;;  %v3422_v41 = vsub.f32 %v3358_v10, %v3390_v3  ;;  %v3359_v13 = vmul.f32 0.0078125, %v3305_v23 }
 0x663   : > { %v3187_v28 = vpop.xlane.xlu0 %3186  ;;  %v3547_v57 = vmul.f32 %v4740_v7, %v3515_v59  ;;  %v3582_v0 = vmul.f32 %v6808_v52, %v3546_v1  ;;  %v3621_v63 = vadd.f32 %v6822_v44, %v3585_v58  ;;  %v3652_v48 = vmax.f32 %v3620_v21, 0.0 }
 0x664   : > { %4743 = vrsqrt.f32 %v3457_v14  ;;  %v3454_v9 = vadd.f32 1e-05, %v3422_v41  ;;  %v3423_v55 = vsub.f32 %v3359_v13, %v3391_v54  ;;  %v6862_v60 = vmul.f32 0.0078125, %v3187_v28 }
 0x665   : > { %v3189_v51 = vpop.xlane.xlu1 %3188  ;;  %v3583_v49 = vmul.f32 %v6808_v52, %v3547_v57  ;;  %v3618_v31 = vadd.f32 %v6822_v44, %v3582_v0  ;;  %v3653_v25 = vmax.f32 %v3621_v63, 0.0  ;;  %v3521_v36 = vsub.f32 %v6632_v50, %v6832_v53 }
 0x666   : > { %4745 = vrsqrt.f32 %v3454_v9  ;;  %v3455_v22 = vadd.f32 1e-05, %v3423_v55  ;;  %v6864_v24 = vmul.f32 0.0078125, %v3189_v51  ;;  %v3396_v10 = vmul.f32 %v6862_v60, %v6862_v60 }
 0x667   : > { %v3183_v34 = vpop.xlane.xlu0 %3182  ;;  %v3619_v11 = vadd.f32 %v6822_v44, %v3583_v49  ;;  %v3650_v4 = vmax.f32 %v3618_v31, 0.0  ;;  %v3681_v1 = vpack.c.bf16 %v3653_v25, %v3652_v48  ;;  %v3518_v28 = vsub.f32 %v6636_v15, %v6838_v32 }
 0x668   : > { %4747 = vrsqrt.f32 %v3455_v22  ;;  %v6870_v54 = vmul.f32 0.0078125, %v3183_v34  ;;  %v3397_v46 = vmul.f32 %v6864_v24, %v6864_v24  ;;  %v3519_v57 = vsub.f32 %v6643_v45, %v6842_v12 }
 0x669   : > { %v3185_v42 = vpop.xlane.xlu1 %3184  ;;  %v3651_v59 = vmax.f32 %v3619_v11, 0.0 }
 0x66a   : > { %v6874_v58 = vmul.f32 0.0078125, %v3185_v42  ;;  %v3394_v9 = vmul.f32 %v6870_v54, %v6870_v54 }
 0x66b   : > { %v3315_v3 = vpop.xlane.xlu0 %3314  ;;  %v3680_v40 = vpack.c.bf16 %v3651_v59, %v3650_v4 }
 0x66c   : > { %v4742_v30 = vpop.eup %4741  ;;  %v3364_v23 = vmul.f32 0.0078125, %v3315_v3  ;;  %v3395_v49 = vmul.f32 %v6874_v58, %v6874_v58 }
 0x66d   : > { %4436 = vmatprep.mubr.bf16.mxu1 %v3680_v40  ;;  %v3317_v7 = vpop.xlane.xlu1 %3316  ;;  %v3552_v14 = vmul.f32 %v4742_v30, %v3520_v35 }
 0x66e   : > { %v4744_v41 = vpop.eup %4743  ;;  %v3428_v38 = vsub.f32 %v3364_v23, %v3396_v10  ;;  %v3365_v13 = vmul.f32 0.0078125, %v3317_v7  ;;  %4437 = vmatmul.mubr.bf16.gmra.mrb[68].mxu1 %v3681_v1 }
 0x66f   : > { %v3311_v0 = vpop.xlane.xlu0 %3310  ;;  %v3553_v50 = vmul.f32 %v4744_v41, %v3521_v36  ;;  %v3588_v21 = vmul.f32 %v6808_v52, %v3552_v14 }
 0x670   : > { %v4746_v53 = vpop.eup %4745  ;;  %v3460_v55 = vadd.f32 1e-05, %v3428_v38  ;;  %v3429_v63 = vsub.f32 %v3365_v13, %v3397_v46  ;;  %v3362_v51 = vmul.f32 0.0078125, %v3311_v0 }
 0x671   : > { %v3313_v31 = vpop.xlane.xlu1 %3312  ;;  %v3550_v22 = vmul.f32 %v4746_v53, %v3518_v28  ;;  %v3589_v15 = vmul.f32 %v6808_v52, %v3553_v50  ;;  %v3624_v10 = vadd.f32 %v6822_v44, %v3588_v21  ;;  %v3524_v28 = vsub.f32 %v6662_v17, %v6862_v60 }
 0x672   : > { %v4748_v32 = vpop.eup %4747  ;;  %4749 = vrsqrt.f32 %v3460_v55  ;;  %v3461_v45 = vadd.f32 1e-05, %v3429_v63  ;;  %v3426_v12 = vsub.f32 %v3362_v51, %v3394_v9  ;;  %v3363_v34 = vmul.f32 0.0078125, %v3313_v31 }
 0x673   : > { %v3195_v11 = vpop.xlane.xlu0 %3194  ;;  %v3551_v25 = vmul.f32 %v4748_v32, %v3519_v57  ;;  %v3586_v42 = vmul.f32 %v6808_v52, %v3550_v22  ;;  %v3625_v48 = vadd.f32 %v6822_v44, %v3589_v15  ;;  %v3656_v13 = vmax.f32 %v3624_v10, 0.0 }
 0x674   : > { %4751 = vrsqrt.f32 %v3461_v45  ;;  %v3458_v4 = vadd.f32 1e-05, %v3426_v12  ;;  %v3427_v59 = vsub.f32 %v3363_v34, %v3395_v49  ;;  %v6894_v36 = vmul.f32 0.0078125, %v3195_v11 }
 0x675   : > { %v3197_v35 = vpop.xlane.xlu1 %3196  ;;  %v3587_v3 = vmul.f32 %v6808_v52, %v3551_v25  ;;  %v3622_v40 = vadd.f32 %v6822_v44, %v3586_v42  ;;  %v3657_v7 = vmax.f32 %v3625_v48, 0.0  ;;  %v3525_v51 = vsub.f32 %v6668_v6, %v6864_v24 }
 0x676   : > { %4753 = vrsqrt.f32 %v3458_v4  ;;  %v3459_v30 = vadd.f32 1e-05, %v3427_v59  ;;  %v6896_v38 = vmul.f32 0.0078125, %v3197_v35  ;;  %v3400_v53 = vmul.f32 %v6894_v36, %v6894_v36 }
 0x677   : > { %v3191_v23 = vpop.xlane.xlu0 %3190  ;;  %v3623_v1 = vadd.f32 %v6822_v44, %v3587_v3  ;;  %v3654_v41 = vmax.f32 %v3622_v40, 0.0  ;;  %v3683_v63 = vpack.c.bf16 %v3657_v7, %v3656_v13  ;;  %v3522_v32 = vsub.f32 %v6672_v5, %v6870_v54 }
 0x678   : > { %4755 = vrsqrt.f32 %v3459_v30  ;;  %v6902_v9 = vmul.f32 0.0078125, %v3191_v23  ;;  %v3401_v17 = vmul.f32 %v6896_v38, %v6896_v38  ;;  %v3523_v45 = vsub.f32 %v6679_v20, %v6874_v58 }
 0x679   : > { %v3193_v14 = vpop.xlane.xlu1 %3192  ;;  %v3655_v46 = vmax.f32 %v3623_v1, 0.0 }
 0x67a   : > { %v6906_v49 = vmul.f32 0.0078125, %v3193_v14  ;;  %v3398_v34 = vmul.f32 %v6902_v9, %v6902_v9 }
 0x67b   : > { %v3323_v57 = vpop.xlane.xlu0 %3322  ;;  %v3682_v0 = vpack.c.bf16 %v3655_v46, %v3654_v41 }
 0x67c   : > { %v4750_v50 = vpop.eup %4749  ;;  %v3368_v55 = vmul.f32 0.0078125, %v3323_v57  ;;  %v3399_v4 = vmul.f32 %v6906_v49, %v6906_v49 }
 0x67d   : > { %4440 = vmatprep.mubr.bf16.mxu1 %v3682_v0  ;;  %v3325_v31 = vpop.xlane.xlu1 %3324  ;;  %v3556_v22 = vmul.f32 %v4750_v50, %v3524_v28 }
 0x67e   : > { %v4752_v21 = vpop.eup %4751  ;;  %v3432_v60 = vsub.f32 %v3368_v55, %v3400_v53  ;;  %v3369_v15 = vmul.f32 0.0078125, %v3325_v31  ;;  %4441 = vmatmul.mubr.bf16.gmra.mrb[72].mxu1 %v3683_v63 }
 0x67f   : > { %v3319_v12 = vpop.xlane.xlu0 %3318  ;;  %v3557_v6 = vmul.f32 %v4752_v21, %v3525_v51  ;;  %v3592_v35 = vmul.f32 %v6808_v52, %v3556_v22  ;;  %v3528_v21 = vsub.f32 %v6692_v56, %v6894_v36 }
 0x680   : > { %v4754_v24 = vpop.eup %4753  ;;  %v3464_v11 = vadd.f32 1e-05, %v3432_v60  ;;  %v3433_v25 = vsub.f32 %v3369_v15, %v3401_v17  ;;  %v3366_v42 = vmul.f32 0.0078125, %v3319_v12 }
 0x681   : > { %v3321_v59 = vpop.xlane.xlu1 %3320  ;;  %v3554_v48 = vmul.f32 %v4754_v24, %v3522_v32  ;;  %v3593_v5 = vmul.f32 %v6808_v52, %v3557_v6  ;;  %v3628_v28 = vadd.f32 %v6822_v44, %v3592_v35  ;;  %v3529_v24 = vsub.f32 %v6695_v27, %v6896_v38 }
 0x682   : > { %v4756_v54 = vpop.eup %4755  ;;  %4757 = vrsqrt.f32 %v3464_v11  ;;  %v3465_v20 = vadd.f32 1e-05, %v3433_v25  ;;  %v3430_v58 = vsub.f32 %v3366_v42, %v3398_v34  ;;  %v3367_v3 = vmul.f32 0.0078125, %v3321_v59 }
 0x683   : > { %v3203_v40 = vpop.xlane.xlu0 %3202  ;;  %v3555_v30 = vmul.f32 %v4756_v54, %v3523_v45  ;;  %v3590_v10 = vmul.f32 %v6808_v52, %v3554_v48  ;;  %v3629_v7 = vadd.f32 %v6822_v44, %v3593_v5  ;;  %v3660_v22 = vmax.f32 %v3628_v28, 0.0 }
 0x684   : > { %4759 = vrsqrt.f32 %v3465_v20  ;;  %v3462_v23 = vadd.f32 1e-05, %v3430_v58  ;;  %v3431_v1 = vsub.f32 %v3367_v3, %v3399_v4  ;;  %v6926_v50 = vmul.f32 0.0078125, %v3203_v40 }
 0x685   : > { %v3205_v14 = vpop.xlane.xlu1 %3204  ;;  %v3591_v41 = vmul.f32 %v6808_v52, %v3555_v30  ;;  %v3626_v46 = vadd.f32 %v6822_v44, %v3590_v10  ;;  %v3661_v53 = vmax.f32 %v3629_v7, 0.0  ;;  %v3526_v59 = vsub.f32 %v6699_v18, %v6902_v9 }
 0x686   : > { %4761 = vrsqrt.f32 %v3462_v23  ;;  %v3463_v13 = vadd.f32 1e-05, %v3431_v1  ;;  %v6928_v31 = vmul.f32 0.0078125, %v3205_v14  ;;  %v3404_v32 = vmul.f32 %v6926_v50, %v6926_v50 }
 0x687   : > { %v3199_v57 = vpop.xlane.xlu0 %3198  ;;  %v3627_v0 = vadd.f32 %v6822_v44, %v3591_v41  ;;  %v3658_v63 = vmax.f32 %v3626_v46, 0.0  ;;  %v3685_v6 = vpack.c.bf16 %v3661_v53, %v3660_v22  ;;  %v3527_v48 = vsub.f32 %v6703_v61, %v6906_v49 }
 0x688   : > { %4763 = vrsqrt.f32 %v3463_v13  ;;  %v6934_v45 = vmul.f32 0.0078125, %v3199_v57  ;;  %v3405_v56 = vmul.f32 %v6928_v31, %v6928_v31 }
 0x689   : > { %v3201_v55 = vpop.xlane.xlu1 %3200  ;;  %v3659_v51 = vmax.f32 %v3627_v0, 0.0 }
 0x68a   : > { %v6938_v34 = vmul.f32 0.0078125, %v3201_v55  ;;  %v3402_v5 = vmul.f32 %v6934_v45, %v6934_v45 }
 0x68b   : > { %v3331_v17 = vpop.xlane.xlu0 %3330  ;;  %v3684_v60 = vpack.c.bf16 %v3659_v51, %v3658_v63 }
 0x68c   : > { %v4758_v15 = vpop.eup %4757  ;;  %v3372_v12 = vmul.f32 0.0078125, %v3331_v17  ;;  %v3403_v3 = vmul.f32 %v6938_v34, %v6938_v34 }
 0x68d   : > { %4444 = vmatprep.mubr.bf16.mxu1 %v3684_v60  ;;  %v3333_v11 = vpop.xlane.xlu1 %3332  ;;  %v3560_v25 = vmul.f32 %v4758_v15, %v3528_v21 }
 0x68e   : > { %v4760_v42 = vpop.eup %4759  ;;  %v3436_v36 = vsub.f32 %v3372_v12, %v3404_v32  ;;  %v3373_v4 = vmul.f32 0.0078125, %v3333_v11  ;;  %4445 = vmatmul.mubr.bf16.gmra.mrb[76].mxu1 %v3685_v6  ;;  %v3532_v6 = vsub.f32 %v6716_v39, %v6926_v50 }
 0x68f   : > { %v3327_v35 = vpop.xlane.xlu0 %3326  ;;  %v3561_v27 = vmul.f32 %v4760_v42, %v3529_v24  ;;  %v3596_v10 = vmul.f32 %v6808_v52, %v3560_v25 }
 0x690   : > { %v4762_v38 = vpop.eup %4761  ;;  %v3468_v54 = vadd.f32 1e-05, %v3436_v36  ;;  %v3437_v20 = vsub.f32 %v3373_v4, %v3405_v56  ;;  %v3370_v58 = vmul.f32 0.0078125, %v3327_v35 }
 0x691   : > { %v3329_v40 = vpop.xlane.xlu1 %3328  ;;  %v3558_v30 = vmul.f32 %v4762_v38, %v3526_v59  ;;  %v3597_v18 = vmul.f32 %v6808_v52, %v3561_v27  ;;  %v3632_v55 = vadd.f32 %v6822_v44, %v3596_v10  ;;  %v3533_v59 = vsub.f32 %v6719_v16, %v6928_v31 }
 0x692   : > { %v4764_v9 = vpop.eup %4763  ;;  %4765 = vrsqrt.f32 %v3468_v54  ;;  %v3469_v61 = vadd.f32 1e-05, %v3437_v20  ;;  %v3434_v49 = vsub.f32 %v3370_v58, %v3402_v5  ;;  %v3371_v23 = vmul.f32 0.0078125, %v3329_v40 }
 0x693   : > { %v3211_v1 = vpop.xlane.xlu0 %3210  ;;  %v3559_v7 = vmul.f32 %v4764_v9, %v3527_v48  ;;  %v3594_v14 = vmul.f32 %v6808_v52, %v3558_v30  ;;  %v3633_v13 = vadd.f32 %v6822_v44, %v3597_v18  ;;  %v3664_v12 = vmax.f32 %v3632_v55, 0.0 }
 0x694   : > { %4767 = vrsqrt.f32 %v3469_v61  ;;  %v3466_v41 = vadd.f32 1e-05, %v3434_v49  ;;  %v3435_v46 = vsub.f32 %v3371_v23, %v3403_v3  ;;  %v6958_v22 = vmul.f32 0.0078125, %v3211_v1 }
 0x695   : > { %v3213_v28 = vpop.xlane.xlu1 %3212  ;;  %v3595_v57 = vmul.f32 %v6808_v52, %v3559_v7  ;;  %v3630_v0 = vadd.f32 %v6822_v44, %v3594_v14  ;;  %v3665_v21 = vmax.f32 %v3633_v13, 0.0  ;;  %v3530_v54 = vsub.f32 %v6723_v19, %v6934_v45 }
 0x696   : > { %4769 = vrsqrt.f32 %v3466_v41  ;;  %v3467_v53 = vadd.f32 1e-05, %v3435_v46  ;;  %v6960_v32 = vmul.f32 0.0078125, %v3213_v28  ;;  %v3408_v42 = vmul.f32 %v6958_v22, %v6958_v22 }
 0x697   : > { %v3207_v63 = vpop.xlane.xlu0 %3206  ;;  %v3631_v51 = vadd.f32 %v6822_v44, %v3595_v57  ;;  %v3662_v60 = vmax.f32 %v3630_v0, 0.0  ;;  %v3687_v4 = vpack.c.bf16 %v3665_v21, %v3664_v12  ;;  %v3531_v20 = vsub.f32 %v6727_v33, %v6938_v34 }
 0x698   : > { %4771 = vrsqrt.f32 %v3467_v53  ;;  %v6966_v56 = vmul.f32 0.0078125, %v3207_v63  ;;  %v3409_v39 = vmul.f32 %v6960_v32, %v6960_v32 }
 0x699   : > { %v3209_v17 = vpop.xlane.xlu1 %3208  ;;  %v3663_v15 = vmax.f32 %v3631_v51, 0.0 }
 0x69a   : > { %v6970_v48 = vmul.f32 0.0078125, %v3209_v17  ;;  %v3406_v3 = vmul.f32 %v6966_v56, %v6966_v56 }
 0x69b   : > { %v3339_v24 = vpop.xlane.xlu0 %3338  ;;  %v3686_v11 = vpack.c.bf16 %v3663_v15, %v3662_v60 }
 0x69c   : > { %v4766_v25 = vpop.eup %4765  ;;  %v3376_v36 = vmul.f32 0.0078125, %v3339_v24  ;;  %v3407_v18 = vmul.f32 %v6970_v48, %v6970_v48 }
 0x69d   : > { %4448 = vmatprep.mubr.bf16.mxu1 %v3686_v11  ;;  %v3341_v35 = vpop.xlane.xlu1 %3340  ;;  %v3564_v27 = vmul.f32 %v4766_v25, %v3532_v6  ;;  %v3536_v11 = vsub.f32 %v6740_v37, %v6958_v22 }
 0x69e   : > { %v4768_v38 = vpop.eup %4767  ;;  %v3440_v50 = vsub.f32 %v3376_v36, %v3408_v42  ;;  %v3377_v5 = vmul.f32 0.0078125, %v3341_v35  ;;  %4449 = vmatmul.mubr.bf16.gmra.mrb[80].mxu1 %v3687_v4 }
 0x69f   : > { %v3335_v58 = vpop.xlane.xlu0 %3334  ;;  %v3565_v16 = vmul.f32 %v4768_v38, %v3533_v59  ;;  %v3600_v49 = vmul.f32 %v6808_v52, %v3564_v27  ;;  %v3537_v38 = vsub.f32 %v6743_v2, %v6960_v32 }
 0x6a0   : > { %v4770_v31 = vpop.eup %4769  ;;  %v3472_v40 = vadd.f32 1e-05, %v3440_v50  ;;  %v3441_v30 = vsub.f32 %v3377_v5, %v3409_v39  ;;  %v3374_v10 = vmul.f32 0.0078125, %v3335_v58  ;;  %v3534_v58 = vsub.f32 %v6747_v47, %v6966_v56 }
 0x6a1   : > { %v3337_v9 = vpop.xlane.xlu1 %3336  ;;  %v3562_v61 = vmul.f32 %v4770_v31, %v3530_v54  ;;  %v3601_v19 = vmul.f32 %v6808_v52, %v3565_v16  ;;  %v3636_v55 = vadd.f32 %v6822_v44, %v3600_v49  ;;  %v3535_v16 = vsub.f32 %v6751_v26, %v6970_v48 }
 0x6a2   : > { %v4772_v45 = vpop.eup %4771  ;;  %4773 = vrsqrt.f32 %v3472_v40  ;;  %v3473_v33 = vadd.f32 1e-05, %v3441_v30  ;;  %v3438_v34 = vsub.f32 %v3374_v10, %v3406_v3  ;;  %v3375_v23 = vmul.f32 0.0078125, %v3337_v9 }
 0x6a3   : > { %v3219_v1 = vpop.xlane.xlu0 %3218  ;;  %v3563_v7 = vmul.f32 %v4772_v45, %v3531_v20  ;;  %v3598_v14 = vmul.f32 %v6808_v52, %v3562_v61  ;;  %v3637_v13 = vadd.f32 %v6822_v44, %v3601_v19  ;;  %v3668_v24 = vmax.f32 %v3636_v55, 0.0 }
 0x6a4   : > { %4775 = vrsqrt.f32 %v3473_v33  ;;  %v3470_v41 = vadd.f32 1e-05, %v3438_v34  ;;  %v3439_v46 = vsub.f32 %v3375_v23, %v3407_v18  ;;  %v6996_v4 = vmul.f32 0.0078125, %v3219_v1 }
 0x6a5   : > { %v3221_v28 = vpop.xlane.xlu1 %3220  ;;  %v3599_v57 = vmul.f32 %v6808_v52, %v3563_v7  ;;  %v3634_v0 = vadd.f32 %v6822_v44, %v3598_v14  ;;  %v3669_v17 = vmax.f32 %v3637_v13, 0.0 }
 0x6a6   : > { %4777 = vrsqrt.f32 %v3470_v41  ;;  %v3471_v53 = vadd.f32 1e-05, %v3439_v46  ;;  %v7002_v39 = vmul.f32 0.0078125, %v3221_v28  ;;  %v3412_v3 = vmul.f32 %v6996_v4, %v6996_v4 }
 0x6a7   : > { %v3215_v63 = vpop.xlane.xlu0 %3214  ;;  %v3635_v51 = vadd.f32 %v6822_v44, %v3599_v57  ;;  %v3666_v15 = vmax.f32 %v3634_v0, 0.0  ;;  %v3689_v27 = vpack.c.bf16 %v3669_v17, %v3668_v24  ;;  %v3540_v24 = vsub.f32 %v6764_v8, %v6996_v4 }
 0x6a8   : > { %4779 = vrsqrt.f32 %v3471_v53  ;;  %v6990_v21 = vmul.f32 0.0078125, %v3215_v63  ;;  %v3413_v18 = vmul.f32 %v7002_v39, %v7002_v39 }
 0x6a9   : > { %v3217_v60 = vpop.xlane.xlu1 %3216  ;;  %v3667_v12 = vmax.f32 %v3635_v51, 0.0 }
 0x6aa   : > { %v6992_v6 = vmul.f32 0.0078125, %v3217_v60  ;;  %v3410_v59 = vmul.f32 %v6990_v21, %v6990_v21  ;;  %v3538_v55 = vsub.f32 %v6771_v29, %v6990_v21  ;;  %v3541_v29 = vsub.f32 %v6767_v43, %v7002_v39 }
 0x6ab   : > { %v3343_v25 = vpop.xlane.xlu0 %3342  ;;  %v3688_v42 = vpack.c.bf16 %v3667_v12, %v3666_v15 }
 0x6ac   : > { %v4774_v36 = vpop.eup %4773  ;;  %v3378_v35 = vmul.f32 0.0078125, %v3343_v25  ;;  %v3411_v37 = vmul.f32 %v6992_v6, %v6992_v6  ;;  %v3539_v60 = vsub.f32 %v6775_v62, %v6992_v6 }
 0x6ad   : > { %4452 = vmatprep.mubr.bf16.mxu1 %v3688_v42  ;;  %v3345_v50 = vpop.xlane.xlu1 %3344  ;;  %v3568_v5 = vmul.f32 %v4774_v36, %v3536_v11 }
 0x6ae   : > { %v4776_v54 = vpop.eup %4775  ;;  %v3442_v22 = vsub.f32 %v3378_v35, %v3410_v59  ;;  %v3379_v20 = vmul.f32 0.0078125, %v3345_v50  ;;  %4453 = vmatmul.mubr.bf16.gmra.mrb[84].mxu1 %v3689_v27 }
 0x6af   : > { %v3347_v31 = vpop.xlane.xlu0 %3346  ;;  %v3569_v2 = vmul.f32 %v4776_v54, %v3537_v38  ;;  %v3604_v49 = vmul.f32 %v6808_v52, %v3568_v5 }
 0x6b0   : > { %v4778_v32 = vpop.eup %4777  ;;  %v3474_v40 = vadd.f32 1e-05, %v3442_v22  ;;  %v3443_v30 = vsub.f32 %v3379_v20, %v3411_v37  ;;  %v3380_v10 = vmul.f32 0.0078125, %v3347_v31  ;;  %v7041_v22 = vld [vmem:[%s7154_s6 + $0xc] ss:$0 sm:$0xff] }
 0x6b1   : > { %v3349_v9 = vpop.xlane.xlu1 %3348  ;;  %v3566_v61 = vmul.f32 %v4778_v32, %v3534_v58  ;;  %v3605_v47 = vmul.f32 %v6808_v52, %v3569_v2  ;;  %v3640_v46 = vadd.f32 %v6822_v44, %v3604_v49 }
 0x6b2   : > { %v4780_v56 = vpop.eup %4779  ;;  %4781 = vrsqrt.f32 %v3474_v40  ;;  %v3475_v26 = vadd.f32 1e-05, %v3443_v30  ;;  %v3444_v48 = vsub.f32 %v3380_v10, %v3412_v3  ;;  %v3381_v19 = vmul.f32 0.0078125, %v3349_v9 }
 0x6b3   : > { %v3567_v45 = vmul.f32 %v4780_v56, %v3535_v16  ;;  %v3602_v33 = vmul.f32 %v6808_v52, %v3566_v61  ;;  %v3641_v1 = vadd.f32 %v6822_v44, %v3605_v47  ;;  %v3672_v53 = vmax.f32 %v3640_v46, 0.0 }
 0x6b4   : > { %4783 = vrsqrt.f32 %v3475_v26  ;;  %v3476_v34 = vadd.f32 1e-05, %v3444_v48  ;;  %v3445_v23 = vsub.f32 %v3381_v19, %v3413_v18 }
 0x6b5   : > { %v3603_v7 = vmul.f32 %v6808_v52, %v3567_v45  ;;  %v3638_v14 = vadd.f32 %v6822_v44, %v3602_v33  ;;  %v3673_v28 = vmax.f32 %v3641_v1, 0.0 }
 0x6b6   : > { %4785 = vrsqrt.f32 %v3476_v34  ;;  %v3477_v41 = vadd.f32 1e-05, %v3445_v23 }
 0x6b7   : > { %v3639_v13 = vadd.f32 %v6822_v44, %v3603_v7  ;;  %v3670_v57 = vmax.f32 %v3638_v14, 0.0  ;;  %v3691_v17 = vpack.c.bf16 %v3673_v28, %v3672_v53 }
 0x6b8   : > { %4787 = vrsqrt.f32 %v3477_v41 }
 0x6b9   : > { %v3671_v0 = vmax.f32 %v3639_v13, 0.0 }
 0x6bb   : > { %v3690_v63 = vpack.c.bf16 %v3671_v0, %v3670_v57 }
 0x6bc   : > { %v4782_v51 = vpop.eup %4781 }
 0x6bd   : > { %4456 = vmatprep.mubr.bf16.mxu1 %v3690_v63  ;;  %v3570_v15 = vmul.f32 %v4782_v51, %v3538_v55 }
 0x6be   : > { %v4784_v12 = vpop.eup %4783  ;;  %4457 = vmatmul.mubr.bf16.gmra.mrb[88].mxu1 %v3691_v17 }
 0x6bf   : > { %v3571_v11 = vmul.f32 %v4784_v12, %v3539_v60  ;;  %v3606_v25 = vmul.f32 %v6808_v52, %v3570_v15 }
 0x6c0   : > { %v4786_v42 = vpop.eup %4785 }
 0x6c1   : > { %v3607_v21 = vmul.f32 %v6808_v52, %v3571_v11  ;;  %v3642_v36 = vadd.f32 %v6822_v44, %v3606_v25  ;;  %v3572_v59 = vmul.f32 %v4786_v42, %v3540_v24 }
 0x6c2   : > { %v4788_v62 = vpop.eup %4787 }
 0x6c3   : > { %v3643_v6 = vadd.f32 %v6822_v44, %v3607_v21  ;;  %v3573_v35 = vmul.f32 %v4788_v62, %v3541_v29  ;;  %v3608_v27 = vmul.f32 %v6808_v52, %v3572_v59  ;;  %v3674_v38 = vmax.f32 %v3642_v36, 0.0 }
 0x6c5   : > { %v3675_v8 = vmax.f32 %v3643_v6, 0.0  ;;  %v3609_v4 = vmul.f32 %v6808_v52, %v3573_v35  ;;  %v3644_v50 = vadd.f32 %v6822_v44, %v3608_v27 }
 0x6c7   : > { %v3692_v5 = vpack.c.bf16 %v3675_v8, %v3674_v38  ;;  %v3645_v43 = vadd.f32 %v6822_v44, %v3609_v4  ;;  %v3676_v39 = vmax.f32 %v3644_v50, 0.0 }
 0x6c9   : > { %4460 = vmatprep.mubr.bf16.mxu1 %v3692_v5  ;;  %v3677_v54 = vmax.f32 %v3645_v43, 0.0 }
 0x6cb   : > { %v3693_v37 = vpack.c.bf16 %v3677_v54, %v3676_v39 }
 0x6cd   : > { %4461 = vmatmul.mubr.bf16.gmra.mrb[92].mxu1 %v3693_v37 }
 0x731   : > { %v4434_v20 = vpop.f32.mrb[64].mxu1 }
 0x732   : > { %v3926_v58 = vadd.f32 %v4434_v20, %v7041_v22  ;;  %v3792_v52 = vpop.f32.mrb[65].mxu1 }
 0x733   : > { %v3924_v16 = vadd.f32 %v7041_v22, %v3792_v52  ;;  %v4435_v31 = vpop.f32.mrb[66].mxu1 }
 0x734   : > { %4789 = vtanh.f32 %v3926_v58  ;;  %v3927_v44 = vadd.f32 %v4435_v31, %v7041_v22  ;;  %v3795_v2 = vpop.f32.mrb[67].mxu1 }
 0x735   : > { %4791 = vtanh.f32 %v3924_v16  ;;  %v3925_v32 = vadd.f32 %v7041_v22, %v3795_v2 }
 0x736   : > { %4793 = vtanh.f32 %v3927_v44 }
 0x737   : > { %4795 = vtanh.f32 %v3925_v32 }
 0x73e   : > { %v4790_v3 = vpop.eup %4789 }
 0x73f   : > { %v4792_v40 = vpop.eup %4791  ;;  %3991 = vst.msk [vmem:[%s7051_s8 + $0x10] sm:$0xff] %vm3988_vm4, %v4790_v3 }
 0x740   : > { %v4794_v30 = vpop.eup %4793  ;;  %3989 = vst.msk [vmem:[%s7051_s8] sm:$0xff] %vm3988_vm4, %v4792_v40 }
 0x741   : > { %v4796_v10 = vpop.eup %4795  ;;  %3992 = vst.msk [vmem:[%s7051_s8 + $0x18] sm:$0xff] %vm3988_vm4, %v4794_v30  ;;  %v4438_v18 = vpop.f32.mrb[68].mxu1 }
 0x742   : > { %3990 = vst.msk [vmem:[%s7051_s8 + $0x8] sm:$0xff] %vm3988_vm4, %v4796_v10  ;;  %v3930_v9 = vadd.f32 %v4438_v18, %v7041_v22  ;;  %v3808_v61 = vpop.f32.mrb[69].mxu1 }
 0x743   : > { %v3928_v49 = vadd.f32 %v7041_v22, %v3808_v61  ;;  %v4439_v47 = vpop.f32.mrb[70].mxu1 }
 0x744   : > { %4797 = vtanh.f32 %v3930_v9  ;;  %v3931_v56 = vadd.f32 %v4439_v47, %v7041_v22  ;;  %v3811_v26 = vpop.f32.mrb[71].mxu1 }
 0x745   : > { %4799 = vtanh.f32 %v3928_v49  ;;  %v3929_v48 = vadd.f32 %v7041_v22, %v3811_v26 }
 0x746   : > { %4801 = vtanh.f32 %v3931_v56 }
 0x747   : > { %4803 = vtanh.f32 %v3929_v48 }
 0x74e   : > { %v4798_v19 = vpop.eup %4797 }
 0x74f   : > { %v4800_v45 = vpop.eup %4799  ;;  %3995 = vst.msk [vmem:[%s7051_s8 + $0x30] sm:$0xff] %vm3988_vm4, %v4798_v19 }
 0x750   : > { %v4802_v33 = vpop.eup %4801  ;;  %3993 = vst.msk [vmem:[%s7051_s8 + $0x20] sm:$0xff] %vm3988_vm4, %v4800_v45 }
 0x751   : > { %v4804_v34 = vpop.eup %4803  ;;  %3996 = vst.msk [vmem:[%s7051_s8 + $0x38] sm:$0xff] %vm3988_vm4, %v4802_v33  ;;  %v4442_v23 = vpop.f32.mrb[72].mxu1 }
 0x752   : > { %3994 = vst.msk [vmem:[%s7051_s8 + $0x28] sm:$0xff] %vm3988_vm4, %v4804_v34  ;;  %v3934_v1 = vadd.f32 %v4442_v23, %v7041_v22  ;;  %v3824_v7 = vpop.f32.mrb[73].mxu1 }
 0x753   : > { %v3932_v14 = vadd.f32 %v7041_v22, %v3824_v7  ;;  %v4443_v41 = vpop.f32.mrb[74].mxu1 }
 0x754   : > { %4805 = vtanh.f32 %v3934_v1  ;;  %v3935_v46 = vadd.f32 %v4443_v41, %v7041_v22  ;;  %v3827_v13 = vpop.f32.mrb[75].mxu1 }
 0x755   : > { %4807 = vtanh.f32 %v3932_v14  ;;  %v3933_v28 = vadd.f32 %v7041_v22, %v3827_v13 }
 0x756   : > { %4809 = vtanh.f32 %v3935_v46 }
 0x757   : > { %4811 = vtanh.f32 %v3933_v28 }
 0x75e   : > { %v4806_v57 = vpop.eup %4805 }
 0x75f   : > { %v4808_v0 = vpop.eup %4807  ;;  %3999 = vst.msk [vmem:[%s7051_s8 + $0x50] sm:$0xff] %vm3988_vm4, %v4806_v57 }
 0x760   : > { %v4810_v53 = vpop.eup %4809  ;;  %3997 = vst.msk [vmem:[%s7051_s8 + $0x40] sm:$0xff] %vm3988_vm4, %v4808_v0 }
 0x761   : > { %v4812_v55 = vpop.eup %4811  ;;  %4000 = vst.msk [vmem:[%s7051_s8 + $0x58] sm:$0xff] %vm3988_vm4, %v4810_v53  ;;  %v4446_v63 = vpop.f32.mrb[76].mxu1 }
 0x762   : > { %3998 = vst.msk [vmem:[%s7051_s8 + $0x48] sm:$0xff] %vm3988_vm4, %v4812_v55  ;;  %v3938_v51 = vadd.f32 %v4446_v63, %v7041_v22  ;;  %v3840_v17 = vpop.f32.mrb[77].mxu1 }
 0x763   : > { %v3936_v60 = vadd.f32 %v7041_v22, %v3840_v17  ;;  %v4447_v15 = vpop.f32.mrb[78].mxu1 }
 0x764   : > { %4813 = vtanh.f32 %v3938_v51  ;;  %v3939_v12 = vadd.f32 %v4447_v15, %v7041_v22  ;;  %v3843_v24 = vpop.f32.mrb[79].mxu1 }
 0x765   : > { %4815 = vtanh.f32 %v3936_v60  ;;  %v3937_v11 = vadd.f32 %v7041_v22, %v3843_v24 }
 0x766   : > { %4817 = vtanh.f32 %v3939_v12 }
 0x767   : > { %4819 = vtanh.f32 %v3937_v11 }
 0x76e   : > { %v4814_v25 = vpop.eup %4813 }
 0x76f   : > { %v4816_v42 = vpop.eup %4815  ;;  %4003 = vst.msk [vmem:[%s7051_s8 + $0x70] sm:$0xff] %vm3988_vm4, %v4814_v25 }
 0x770   : > { %v4818_v29 = vpop.eup %4817  ;;  %4001 = vst.msk [vmem:[%s7051_s8 + $0x60] sm:$0xff] %vm3988_vm4, %v4816_v42 }
 0x771   : > { %v4820_v21 = vpop.eup %4819  ;;  %4004 = vst.msk [vmem:[%s7051_s8 + $0x78] sm:$0xff] %vm3988_vm4, %v4818_v29  ;;  %v4450_v36 = vpop.f32.mrb[80].mxu1 }
 0x772   : > { %4002 = vst.msk [vmem:[%s7051_s8 + $0x68] sm:$0xff] %vm3988_vm4, %v4820_v21  ;;  %v3942_v59 = vadd.f32 %v4450_v36, %v7041_v22  ;;  %v3856_v62 = vpop.f32.mrb[81].mxu1 }
 0x773   : > { %v3940_v6 = vadd.f32 %v7041_v22, %v3856_v62  ;;  %v4451_v35 = vpop.f32.mrb[82].mxu1 }
 0x774   : > { %4821 = vtanh.f32 %v3942_v59  ;;  %v3943_v27 = vadd.f32 %v4451_v35, %v7041_v22  ;;  %v3859_v38 = vpop.f32.mrb[83].mxu1 }
 0x775   : > { %4823 = vtanh.f32 %v3940_v6  ;;  %v3941_v8 = vadd.f32 %v7041_v22, %v3859_v38 }
 0x776   : > { %4825 = vtanh.f32 %v3943_v27 }
 0x777   : > { %4827 = vtanh.f32 %v3941_v8 }
 0x77e   : > { %v4822_v4 = vpop.eup %4821 }
 0x77f   : > { %v4824_v50 = vpop.eup %4823  ;;  %4007 = vst.msk [vmem:[%s7051_s8 + $0x90] sm:$0xff] %vm3988_vm4, %v4822_v4 }
 0x780   : > { %v4826_v5 = vpop.eup %4825  ;;  %4005 = vst.msk [vmem:[%s7051_s8 + $0x80] sm:$0xff] %vm3988_vm4, %v4824_v50 }
 0x781   : > { %v4828_v43 = vpop.eup %4827  ;;  %4008 = vst.msk [vmem:[%s7051_s8 + $0x98] sm:$0xff] %vm3988_vm4, %v4826_v5  ;;  %v4454_v39 = vpop.f32.mrb[84].mxu1 }
 0x782   : > { %4006 = vst.msk [vmem:[%s7051_s8 + $0x88] sm:$0xff] %vm3988_vm4, %v4828_v43  ;;  %v3946_v54 = vadd.f32 %v4454_v39, %v7041_v22  ;;  %v3872_v37 = vpop.f32.mrb[85].mxu1 }
 0x783   : > { %v3944_v20 = vadd.f32 %v7041_v22, %v3872_v37  ;;  %v4455_v58 = vpop.f32.mrb[86].mxu1 }
 0x784   : > { %4829 = vtanh.f32 %v3946_v54  ;;  %v3947_v52 = vadd.f32 %v4455_v58, %v7041_v22  ;;  %v3875_v16 = vpop.f32.mrb[87].mxu1 }
 0x785   : > { %4831 = vtanh.f32 %v3944_v20  ;;  %v3945_v31 = vadd.f32 %v7041_v22, %v3875_v16 }
 0x786   : > { %4833 = vtanh.f32 %v3947_v52 }
 0x787   : > { %4835 = vtanh.f32 %v3945_v31 }
 0x78e   : > { %v4830_v44 = vpop.eup %4829 }
 0x78f   : > { %v4832_v2 = vpop.eup %4831  ;;  %4011 = vst.msk [vmem:[%s7051_s8 + $0xb0] sm:$0xff] %vm3988_vm4, %v4830_v44 }
 0x790   : > { %v4834_v32 = vpop.eup %4833  ;;  %4009 = vst.msk [vmem:[%s7051_s8 + $0xa0] sm:$0xff] %vm3988_vm4, %v4832_v2 }
 0x791   : > { %v4836_v3 = vpop.eup %4835  ;;  %4012 = vst.msk [vmem:[%s7051_s8 + $0xb8] sm:$0xff] %vm3988_vm4, %v4834_v32  ;;  %v4458_v40 = vpop.f32.mrb[88].mxu1 }
 0x792   : > { %4010 = vst.msk [vmem:[%s7051_s8 + $0xa8] sm:$0xff] %vm3988_vm4, %v4836_v3  ;;  %v3950_v30 = vadd.f32 %v4458_v40, %v7041_v22  ;;  %v3888_v10 = vpop.f32.mrb[89].mxu1 }
 0x793   : > { %v3948_v18 = vadd.f32 %v7041_v22, %v3888_v10  ;;  %v4459_v9 = vpop.f32.mrb[90].mxu1 }
 0x794   : > { %4837 = vtanh.f32 %v3950_v30  ;;  %v3951_v61 = vadd.f32 %v4459_v9, %v7041_v22  ;;  %v3891_v49 = vpop.f32.mrb[91].mxu1 }
 0x795   : > { %4839 = vtanh.f32 %v3948_v18  ;;  %v3949_v47 = vadd.f32 %v7041_v22, %v3891_v49 }
 0x796   : > { %4841 = vtanh.f32 %v3951_v61 }
 0x797   : > { %4843 = vtanh.f32 %v3949_v47 }
 0x79e   : > { %v4838_v56 = vpop.eup %4837 }
 0x79f   : > { %v4840_v26 = vpop.eup %4839  ;;  %4015 = vst.msk [vmem:[%s7051_s8 + $0xd0] sm:$0xff] %vm3988_vm4, %v4838_v56 }
 0x7a0   : > { %v4842_v48 = vpop.eup %4841  ;;  %4013 = vst.msk [vmem:[%s7051_s8 + $0xc0] sm:$0xff] %vm3988_vm4, %v4840_v26  ;;  %v4462_v19 = vpop.f32.mrb[92].mxu1 }
 0x7a1   : > { %v4844_v45 = vpop.eup %4843  ;;  %4016 = vst.msk [vmem:[%s7051_s8 + $0xd8] sm:$0xff] %vm3988_vm4, %v4842_v48  ;;  %v3954_v33 = vadd.f32 %v4462_v19, %v7041_v22  ;;  %v3904_v34 = vpop.f32.mrb[93].mxu1 }
 0x7a2   : > { %4014 = vst.msk [vmem:[%s7051_s8 + $0xc8] sm:$0xff] %vm3988_vm4, %v4844_v45  ;;  %v3952_v23 = vadd.f32 %v7041_v22, %v3904_v34  ;;  %v4463_v1 = vpop.f32.mrb[94].mxu1 }
 0x7a3   : > { %4845 = vtanh.f32 %v3954_v33  ;;  %v3955_v7 = vadd.f32 %v4463_v1, %v7041_v22  ;;  %v3907_v14 = vpop.f32.mrb[95].mxu1 }
 0x7a4   : > { %4847 = vtanh.f32 %v3952_v23  ;;  %v3953_v41 = vadd.f32 %v7041_v22, %v3907_v14 }
 0x7a5   : > { %4849 = vtanh.f32 %v3955_v7 }
 0x7a6   : > { %4851 = vtanh.f32 %v3953_v41 }
 0x7ad   : > { %v4846_v46 = vpop.eup %4845 }
 0x7ae   : > { %v4848_v13 = vpop.eup %4847  ;;  %4019 = vst.msk [vmem:[%s7051_s8 + $0xf0] sm:$0xff] %vm3988_vm4, %v4846_v46 }
 0x7af   : > { %v4850_v28 = vpop.eup %4849  ;;  %4017 = vst.msk [vmem:[%s7051_s8 + $0xe0] sm:$0xff] %vm3988_vm4, %v4848_v13 }
 0x7b0   : > { %v4852_v57 = vpop.eup %4851  ;;  %4020 = vst.msk [vmem:[%s7051_s8 + $0xf8] sm:$0xff] %vm3988_vm4, %v4850_v28 }
 0x7b1   : > { %4018 = vst.msk [vmem:[%s7051_s8 + $0xe8] sm:$0xff] %vm3988_vm4, %v4852_v57 }
 0x7b2 PF: > { %s17_s24 = sadd.s32 1, %s4859_s24  }
 0x7b3   : > { %p14_p4 = scmp.ge.s32.totalorder %s17_s24, 4  }
 0x7b5   :  { %16 = sbr.rel (!%p14_p4) target bundleno = 1 (0x1), region = 78 }

</bundles_post_ra>
